<compile_context>
chip_gen: v5e
topology: v5e:2x2
jax: 0.10.0
libtpu: 0.0.40
codegen_flags: <defaults>
</compile_context>

<pallas_src>
import math

import jax
import jax.numpy as jnp
from jax.experimental import pallas as pl
from jax.experimental.pallas import tpu as pltpu

# ------------------------- model configuration (small) -------------------------
IMAGE_SIZE = 20
PATCH_SIZE = 4
NUM_CLASSES = 10
DIM = 32
DEPTH = 2
HEADS = 4
DIM_HEAD = 8
FF_HIDDEN = 64
CHANNELS = 3
POOL = "cls"

NUM_PATCHES = (IMAGE_SIZE // PATCH_SIZE) ** 2          # 25  (> MIN_NUM_PATCHES = 16)
PATCH_DIM = CHANNELS * PATCH_SIZE ** 2                 # 48
INNER_DIM = HEADS * DIM_HEAD                           # 32
SCALE = DIM ** (-0.5)            # NOTE: module scales by dim**-0.5 (not dim_head**-0.5)
INV_SQRT2 = 1.0 / math.sqrt(2.0)
LN_EPS = 1e-5

assert IMAGE_SIZE % PATCH_SIZE == 0
assert NUM_PATCHES > 16


# ------------------------------ fused Pallas kernel ------------------------------
def _layernorm(x, g, b):
    """torch.nn.LayerNorm semantics (biased variance), f32 statistics."""
    mu = jnp.mean(x, axis=-1, keepdims=True)
    xc = x - mu
    var = jnp.mean(xc * xc, axis=-1, keepdims=True)
    return xc * jax.lax.rsqrt(var + LN_EPS) * g + b


def _gelu_exact(x):
    # exact GELU (matches torch.nn.GELU default, approximate='none')
    return 0.5 * x * (1.0 + jax.lax.erf(x * INV_SQRT2))


def optical_former_kernel(
    patches_ref, pos_ref, patch_w_ref, patch_b_ref,
    ln1_g_ref, ln1_b_ref, qkv_w_ref, out_w_ref, out_b_ref,
    ln2_g_ref, ln2_b_ref, ff1_w_ref, ff1_b_ref, ff2_w_ref, ff2_b_ref,
    head_ln_g_ref, head_ln_b_ref, head_w_ref, head_b_ref,
    o_ref,
):
    """One grid step == full forward pass for one batch element (tokens stay in VMEM)."""
    n = NUM_PATCHES

    # patch embedding + positional embedding
    x = jnp.dot(patches_ref[0], patch_w_ref[...],
                preferred_element_type=jnp.float32) + patch_b_ref[...]
    x = x + pos_ref[...]                                                     # (N, DIM)

    for d in range(DEPTH):                       # static unroll (DEPTH = 2)
        # ---- Residual(PreNorm(Attention)) ----
        xn = _layernorm(x, ln1_g_ref[d:d + 1, :], ln1_b_ref[d:d + 1, :])
        qkv = jnp.dot(xn, qkv_w_ref[d], preferred_element_type=jnp.float32)  # (N, 3*inner)
        wo = out_w_ref[d]                                                    # (inner, DIM)

        attn_out = jnp.zeros((n, DIM), jnp.float32)
        for h in range(HEADS):                   # static unroll (HEADS = 4)
            lo = h * DIM_HEAD
            hi = lo + DIM_HEAD
            qh = qkv[:, lo:hi] * SCALE           # fold softmax scale into q
            kh = qkv[:, INNER_DIM + lo:INNER_DIM + hi]
            vh = qkv[:, 2 * INNER_DIM + lo:2 * INNER_DIM + hi]

            dots = jax.lax.dot_general(qh, kh, (((1,), (1,)), ((), ())),
                                       preferred_element_type=jnp.float32)   # (N, N)
            dots = dots - jnp.max(dots, axis=-1, keepdims=True)              # stable softmax
            e = jnp.exp(dots)
            p = e * pl.reciprocal(jnp.sum(e, axis=-1, keepdims=True), approx=True)
            ctx = jnp.dot(p, vh, preferred_element_type=jnp.float32)         # (N, d_head)
            # concat-of-heads @ W_out  ==  sum over heads of ctx_h @ W_out[h-block]
            attn_out = attn_out + jnp.dot(ctx, wo[lo:hi, :],
                                          preferred_element_type=jnp.float32)

        x = x + attn_out + out_b_ref[d:d + 1, :]

        # ---- Residual(PreNorm(FeedForward)) ----
        xn = _layernorm(x, ln2_g_ref[d:d + 1, :], ln2_b_ref[d:d + 1, :])
        h1 = jnp.dot(xn, ff1_w_ref[d],
                     preferred_element_type=jnp.float32) + ff1_b_ref[d:d + 1, :]
        h1 = _gelu_exact(h1)
        h2 = jnp.dot(h1, ff2_w_ref[d],
                     preferred_element_type=jnp.float32) + ff2_b_ref[d:d + 1, :]
        x = x + h2

    # pool ('cls' = token 0; the module itself does not prepend a CLS token)
    if POOL == "cls":
        pooled = x[0:1, :]
    else:
        pooled = jnp.mean(x, axis=0, keepdims=True)

    # mlp_head: LayerNorm (clip_grad != 'agc') + Linear
    pooled = _layernorm(pooled, head_ln_g_ref[...], head_ln_b_ref[...])
    logits = jnp.dot(pooled, head_w_ref[...],
                     preferred_element_type=jnp.float32) + head_b_ref[...]
    o_ref[0] = logits


# ------------------------------ parameters -------------------------------------
def init_params(key):
    ks = iter(jax.random.split(key, 8))

    def nrm(shape, std=0.02):
        return (std * jax.random.normal(next(ks), shape)).astype(jnp.float32)

    return {
        "pos_emb": nrm((NUM_PATCHES, DIM)),
        "patch_w": nrm((PATCH_DIM, DIM)),                       # Linear(patch_dim, dim)
        "patch_b": jnp.zeros((1, DIM), jnp.float32),
        # per-layer weights stacked along a leading DEPTH axis
        "ln1_g": jnp.ones((DEPTH, DIM), jnp.float32),
        "ln1_b": jnp.zeros((DEPTH, DIM), jnp.float32),
        "qkv_w": nrm((DEPTH, DIM, 3 * INNER_DIM)),              # to_qkv (bias=False)
        "out_w": nrm((DEPTH, INNER_DIM, DIM)),                  # to_out Linear
        "out_b": jnp.zeros((DEPTH, DIM), jnp.float32),
        "ln2_g": jnp.ones((DEPTH, DIM), jnp.float32),
        "ln2_b": jnp.zeros((DEPTH, DIM), jnp.float32),
        "ff1_w": nrm((DEPTH, DIM, FF_HIDDEN)),
        "ff1_b": jnp.zeros((DEPTH, FF_HIDDEN), jnp.float32),
        "ff2_w": nrm((DEPTH, FF_HIDDEN, DIM)),
        "ff2_b": jnp.zeros((DEPTH, DIM), jnp.float32),
        "head_ln_g": jnp.ones((1, DIM), jnp.float32),           # mlp_head LayerNorm
        "head_ln_b": jnp.zeros((1, DIM), jnp.float32),
        "head_w": nrm((DIM, NUM_CLASSES)),                      # Linear(dim, num_classes)
        "head_b": jnp.zeros((1, NUM_CLASSES), jnp.float32),
    }


# ------------------------------ forward pass -----------------------------------
def optical_former_forward(params, img):
    B, C, Himg, Wimg = img.shape
    p = PATCH_SIZE
    hp, wp = Himg // p, Wimg // p
    n = hp * wp

    # einops: 'b c (h p1) (w p2) -> b (h w) (p1 p2 c)'   (plain-JAX glue)
    patches = img.reshape(B, C, hp, p, wp, p)
    patches = jnp.transpose(patches, (0, 2, 4, 3, 5, 1)).reshape(B, n, p * p * C)

    def full_spec(shape):
        return pl.BlockSpec(shape, lambda b: (0,) * len(shape))

    grid_spec = pltpu.PrefetchScalarGridSpec(
        num_scalar_prefetch=0,
        grid=(B,),
        in_specs=[
            pl.BlockSpec((1, n, PATCH_DIM), lambda b: (b, 0, 0)),   # patches (per-batch)
            full_spec((NUM_PATCHES, DIM)),                          # pos_emb
            full_spec((PATCH_DIM, DIM)),                            # patch_w
            full_spec((1, DIM)),                                    # patch_b
            full_spec((DEPTH, DIM)),                                # ln1_g
            full_spec((DEPTH, DIM)),                                # ln1_b
            full_spec((DEPTH, DIM, 3 * INNER_DIM)),                 # qkv_w
            full_spec((DEPTH, INNER_DIM, DIM)),                     # out_w
            full_spec((DEPTH, DIM)),                                # out_b
            full_spec((DEPTH, DIM)),                                # ln2_g
            full_spec((DEPTH, DIM)),                                # ln2_b
            full_spec((DEPTH, DIM, FF_HIDDEN)),                     # ff1_w
            full_spec((DEPTH, FF_HIDDEN)),                          # ff1_b
            full_spec((DEPTH, FF_HIDDEN, DIM)),                     # ff2_w
            full_spec((DEPTH, DIM)),                                # ff2_b
            full_spec((1, DIM)),                                    # head_ln_g
            full_spec((1, DIM)),                                    # head_ln_b
            full_spec((DIM, NUM_CLASSES)),                          # head_w
            full_spec((1, NUM_CLASSES)),                            # head_b
        ],
        out_specs=pl.BlockSpec((1, 1, NUM_CLASSES), lambda b: (b, 0, 0)),
    )

    logits = pl.pallas_call(
        optical_former_kernel,
        out_shape=jax.ShapeDtypeStruct((B, 1, NUM_CLASSES), jnp.float32),
        grid_spec=grid_spec,
        compiler_params=pltpu.CompilerParams(
            dimension_semantics=("parallel",)),   # v7x: one sample per TensorCore
    )(
        patches, params["pos_emb"], params["patch_w"], params["patch_b"],
        params["ln1_g"], params["ln1_b"], params["qkv_w"], params["out_w"], params["out_b"],
        params["ln2_g"], params["ln2_b"], params["ff1_w"], params["ff1_b"],
        params["ff2_w"], params["ff2_b"],
        params["head_ln_g"], params["head_ln_b"], params["head_w"], params["head_b"],
    )
    return logits.reshape(B, NUM_CLASSES)


# ---------------------------------- main ----------------------------------------
if __name__ == "__main__":
    key = jax.random.PRNGKey(0)
    pkey, xkey = jax.random.split(key)
    params = init_params(pkey)
    img = jax.random.normal(xkey, (2, CHANNELS, IMAGE_SIZE, IMAGE_SIZE), dtype=jnp.float32)

    fwd = jax.jit(optical_former_forward)
    logits = jax.block_until_ready(fwd(params, img))

    assert logits.shape == (2, NUM_CLASSES)
    assert bool(jnp.all(jnp.isfinite(logits)))
    print("KERNEL_OK")
</pallas_src>

<mosaic_0001>
module attributes {stable_mosaic.version = 11 : i64} {
  func.func @optical_former_kernel(%arg0: i32, %arg1: memref<1x25x48xf32, #tpu.memory_space<vmem>>, %arg2: memref<25x32xf32, #tpu.memory_space<vmem>>, %arg3: memref<48x32xf32, #tpu.memory_space<vmem>>, %arg4: memref<1x32xf32, #tpu.memory_space<vmem>>, %arg5: memref<2x32xf32, #tpu.memory_space<vmem>>, %arg6: memref<2x32xf32, #tpu.memory_space<vmem>>, %arg7: memref<2x32x96xf32, #tpu.memory_space<vmem>>, %arg8: memref<2x32x32xf32, #tpu.memory_space<vmem>>, %arg9: memref<2x32xf32, #tpu.memory_space<vmem>>, %arg10: memref<2x32xf32, #tpu.memory_space<vmem>>, %arg11: memref<2x32xf32, #tpu.memory_space<vmem>>, %arg12: memref<2x32x64xf32, #tpu.memory_space<vmem>>, %arg13: memref<2x64xf32, #tpu.memory_space<vmem>>, %arg14: memref<2x64x32xf32, #tpu.memory_space<vmem>>, %arg15: memref<2x32xf32, #tpu.memory_space<vmem>>, %arg16: memref<1x32xf32, #tpu.memory_space<vmem>>, %arg17: memref<1x32xf32, #tpu.memory_space<vmem>>, %arg18: memref<32x10xf32, #tpu.memory_space<vmem>>, %arg19: memref<1x10xf32, #tpu.memory_space<vmem>>, %arg20: memref<1x1x10xf32, #tpu.memory_space<vmem>>) attributes {dimension_semantics = [#tpu.dimension_semantics<parallel>], iteration_bounds = array<i64: 2>, scalar_prefetch = 0 : i64, scratch_operands = 0 : i64, tpu.core_type = #tpu.core_type<tc>, window_params = [{transform_indices = @transform_0, window_bounds = array<i64: 1, 25, 48>}, {pipeline_mode = #tpu.pipeline_mode<synchronous>, transform_indices = @transform_1, window_bounds = array<i64: 25, 32>}, {pipeline_mode = #tpu.pipeline_mode<synchronous>, transform_indices = @transform_2, window_bounds = array<i64: 48, 32>}, {pipeline_mode = #tpu.pipeline_mode<synchronous>, transform_indices = @transform_3, window_bounds = array<i64: 1, 32>}, {pipeline_mode = #tpu.pipeline_mode<synchronous>, transform_indices = @transform_4, window_bounds = array<i64: 2, 32>}, {pipeline_mode = #tpu.pipeline_mode<synchronous>, transform_indices = @transform_5, window_bounds = array<i64: 2, 32>}, {pipeline_mode = #tpu.pipeline_mode<synchronous>, transform_indices = @transform_6, window_bounds = array<i64: 2, 32, 96>}, {pipeline_mode = #tpu.pipeline_mode<synchronous>, transform_indices = @transform_7, window_bounds = array<i64: 2, 32, 32>}, {pipeline_mode = #tpu.pipeline_mode<synchronous>, transform_indices = @transform_8, window_bounds = array<i64: 2, 32>}, {pipeline_mode = #tpu.pipeline_mode<synchronous>, transform_indices = @transform_9, window_bounds = array<i64: 2, 32>}, {pipeline_mode = #tpu.pipeline_mode<synchronous>, transform_indices = @transform_10, window_bounds = array<i64: 2, 32>}, {pipeline_mode = #tpu.pipeline_mode<synchronous>, transform_indices = @transform_11, window_bounds = array<i64: 2, 32, 64>}, {pipeline_mode = #tpu.pipeline_mode<synchronous>, transform_indices = @transform_12, window_bounds = array<i64: 2, 64>}, {pipeline_mode = #tpu.pipeline_mode<synchronous>, transform_indices = @transform_13, window_bounds = array<i64: 2, 64, 32>}, {pipeline_mode = #tpu.pipeline_mode<synchronous>, transform_indices = @transform_14, window_bounds = array<i64: 2, 32>}, {pipeline_mode = #tpu.pipeline_mode<synchronous>, transform_indices = @transform_15, window_bounds = array<i64: 1, 32>}, {pipeline_mode = #tpu.pipeline_mode<synchronous>, transform_indices = @transform_16, window_bounds = array<i64: 1, 32>}, {pipeline_mode = #tpu.pipeline_mode<synchronous>, transform_indices = @transform_17, window_bounds = array<i64: 32, 10>}, {pipeline_mode = #tpu.pipeline_mode<synchronous>, transform_indices = @transform_18, window_bounds = array<i64: 1, 10>}, {transform_indices = @transform_19, window_bounds = array<i64: 1, 1, 10>}]} {
    %c0 = arith.constant 0 : index
    %c0_0 = arith.constant 0 : index
    %c0_1 = arith.constant 0 : index
    %0 = vector.load %arg1[%c0, %c0_0, %c0_1] : memref<1x25x48xf32, #tpu.memory_space<vmem>>, vector<1x25x48xf32>
    %1 = vector.shape_cast %0 : vector<1x25x48xf32> to vector<25x48xf32>
    %c0_2 = arith.constant 0 : index
    %c0_3 = arith.constant 0 : index
    %2 = vector.load %arg3[%c0_2, %c0_3] : memref<48x32xf32, #tpu.memory_space<vmem>>, vector<48x32xf32>
    %cst = arith.constant dense<0.000000e+00> : vector<25x32xf32>
    %3 = tpu.matmul %1, %2, %cst {dimension_numbers = #tpu.dot_dimension_numbers<[1], [0], [0], [1], [0, 0, 1, 1], [], []>} : vector<25x48xf32>, vector<48x32xf32>, vector<25x32xf32> -> vector<25x32xf32>
    %c0_4 = arith.constant 0 : index
    %c0_5 = arith.constant 0 : index
    %4 = vector.load %arg4[%c0_4, %c0_5] : memref<1x32xf32, #tpu.memory_space<vmem>>, vector<1x32xf32>
    %5 = vector.broadcast %4 : vector<1x32xf32> to vector<25x32xf32>
    %6 = arith.addf %3, %5 : vector<25x32xf32>
    %c0_6 = arith.constant 0 : index
    %c0_7 = arith.constant 0 : index
    %7 = vector.load %arg2[%c0_6, %c0_7] : memref<25x32xf32, #tpu.memory_space<vmem>>, vector<25x32xf32>
    %8 = arith.addf %6, %7 : vector<25x32xf32>
    %c0_8 = arith.constant 0 : index
    %c0_9 = arith.constant 0 : index
    %9 = vector.load %arg5[%c0_8, %c0_9] : memref<2x32xf32, #tpu.memory_space<vmem>>, vector<1x32xf32>
    %c0_10 = arith.constant 0 : index
    %c0_11 = arith.constant 0 : index
    %10 = vector.load %arg6[%c0_10, %c0_11] : memref<2x32xf32, #tpu.memory_space<vmem>>, vector<1x32xf32>
    %cst_12 = arith.constant dense<0.000000e+00> : vector<25xf32>
    %11 = vector.multi_reduction <add>, %8, %cst_12 [1] : vector<25x32xf32> to vector<25xf32>
    %12 = vector.shape_cast %11 : vector<25xf32> to vector<25x1xf32>
    %cst_13 = arith.constant 3.200000e+01 : f32
    %13 = vector.broadcast %cst_13 : f32 to vector<25x1xf32>
    %14 = arith.divf %12, %13 : vector<25x1xf32>
    %15 = vector.broadcast %14 : vector<25x1xf32> to vector<25x32xf32>
    %16 = arith.subf %8, %15 : vector<25x32xf32>
    %17 = arith.mulf %16, %16 : vector<25x32xf32>
    %cst_14 = arith.constant dense<0.000000e+00> : vector<25xf32>
    %18 = vector.multi_reduction <add>, %17, %cst_14 [1] : vector<25x32xf32> to vector<25xf32>
    %19 = vector.shape_cast %18 : vector<25xf32> to vector<25x1xf32>
    %cst_15 = arith.constant 3.200000e+01 : f32
    %20 = vector.broadcast %cst_15 : f32 to vector<25x1xf32>
    %21 = arith.divf %19, %20 : vector<25x1xf32>
    %cst_16 = arith.constant 9.99999974E-6 : f32
    %22 = vector.broadcast %cst_16 : f32 to vector<25x1xf32>
    %23 = arith.addf %21, %22 : vector<25x1xf32>
    %24 = math.rsqrt %23 : vector<25x1xf32>
    %25 = vector.broadcast %24 : vector<25x1xf32> to vector<25x32xf32>
    %26 = arith.mulf %16, %25 : vector<25x32xf32>
    %27 = vector.broadcast %9 : vector<1x32xf32> to vector<25x32xf32>
    %28 = arith.mulf %26, %27 : vector<25x32xf32>
    %29 = vector.broadcast %10 : vector<1x32xf32> to vector<25x32xf32>
    %30 = arith.addf %28, %29 : vector<25x32xf32>
    %c0_17 = arith.constant 0 : index
    %c0_18 = arith.constant 0 : index
    %c0_19 = arith.constant 0 : index
    %31 = vector.load %arg7[%c0_17, %c0_18, %c0_19] : memref<2x32x96xf32, #tpu.memory_space<vmem>>, vector<1x32x96xf32>
    %32 = vector.shape_cast %31 : vector<1x32x96xf32> to vector<32x96xf32>
    %cst_20 = arith.constant dense<0.000000e+00> : vector<25x96xf32>
    %33 = tpu.matmul %30, %32, %cst_20 {dimension_numbers = #tpu.dot_dimension_numbers<[1], [0], [0], [1], [0, 0, 1, 1], [], []>} : vector<25x32xf32>, vector<32x96xf32>, vector<25x96xf32> -> vector<25x96xf32>
    %c0_21 = arith.constant 0 : index
    %c0_22 = arith.constant 0 : index
    %c0_23 = arith.constant 0 : index
    %34 = vector.load %arg8[%c0_21, %c0_22, %c0_23] : memref<2x32x32xf32, #tpu.memory_space<vmem>>, vector<1x32x32xf32>
    %35 = vector.shape_cast %34 : vector<1x32x32xf32> to vector<32x32xf32>
    %cst_24 = arith.constant 0.000000e+00 : f32
    %36 = vector.broadcast %cst_24 : f32 to vector<25x32xf32>
    %37 = vector.extract_strided_slice %33 {offsets = [0, 0], sizes = [25, 8], strides = [1, 1]} : vector<25x96xf32> to vector<25x8xf32>
    %cst_25 = arith.constant 0.176776692 : f32
    %38 = vector.broadcast %cst_25 : f32 to vector<25x8xf32>
    %39 = arith.mulf %37, %38 : vector<25x8xf32>
    %40 = vector.extract_strided_slice %33 {offsets = [0, 32], sizes = [25, 8], strides = [1, 1]} : vector<25x96xf32> to vector<25x8xf32>
    %41 = vector.extract_strided_slice %33 {offsets = [0, 64], sizes = [25, 8], strides = [1, 1]} : vector<25x96xf32> to vector<25x8xf32>
    %cst_26 = arith.constant dense<0.000000e+00> : vector<25x25xf32>
    %42 = tpu.matmul %39, %40, %cst_26 {dimension_numbers = #tpu.dot_dimension_numbers<[1], [1], [0], [0], [0, 0, 1, 0], [], []>} : vector<25x8xf32>, vector<25x8xf32>, vector<25x25xf32> -> vector<25x25xf32>
    %cst_27 = arith.constant dense<0xFF800000> : vector<25xf32>
    %43 = vector.multi_reduction <maximumf>, %42, %cst_27 [1] : vector<25x25xf32> to vector<25xf32>
    %44 = vector.shape_cast %43 : vector<25xf32> to vector<25x1xf32>
    %45 = vector.broadcast %44 : vector<25x1xf32> to vector<25x25xf32>
    %46 = arith.subf %42, %45 : vector<25x25xf32>
    %47 = math.exp %46 : vector<25x25xf32>
    %cst_28 = arith.constant dense<0.000000e+00> : vector<25xf32>
    %48 = vector.multi_reduction <add>, %47, %cst_28 [1] : vector<25x25xf32> to vector<25xf32>
    %49 = vector.shape_cast %48 : vector<25xf32> to vector<25x1xf32>
    %50 = tpu.reciprocal %49 {approx = true} : vector<25x1xf32> -> vector<25x1xf32>
    %51 = vector.broadcast %50 : vector<25x1xf32> to vector<25x25xf32>
    %52 = arith.mulf %47, %51 : vector<25x25xf32>
    %cst_29 = arith.constant dense<0.000000e+00> : vector<25x8xf32>
    %53 = tpu.matmul %52, %41, %cst_29 {dimension_numbers = #tpu.dot_dimension_numbers<[1], [0], [0], [1], [0, 0, 1, 1], [], []>} : vector<25x25xf32>, vector<25x8xf32>, vector<25x8xf32> -> vector<25x8xf32>
    %54 = vector.extract_strided_slice %35 {offsets = [0, 0], sizes = [8, 32], strides = [1, 1]} : vector<32x32xf32> to vector<8x32xf32>
    %cst_30 = arith.constant dense<0.000000e+00> : vector<25x32xf32>
    %55 = tpu.matmul %53, %54, %cst_30 {dimension_numbers = #tpu.dot_dimension_numbers<[1], [0], [0], [1], [0, 0, 1, 1], [], []>} : vector<25x8xf32>, vector<8x32xf32>, vector<25x32xf32> -> vector<25x32xf32>
    %56 = arith.addf %36, %55 : vector<25x32xf32>
    %57 = vector.extract_strided_slice %33 {offsets = [0, 8], sizes = [25, 8], strides = [1, 1]} : vector<25x96xf32> to vector<25x8xf32>
    %cst_31 = arith.constant 0.176776692 : f32
    %58 = vector.broadcast %cst_31 : f32 to vector<25x8xf32>
    %59 = arith.mulf %57, %58 : vector<25x8xf32>
    %60 = vector.extract_strided_slice %33 {offsets = [0, 40], sizes = [25, 8], strides = [1, 1]} : vector<25x96xf32> to vector<25x8xf32>
    %61 = vector.extract_strided_slice %33 {offsets = [0, 72], sizes = [25, 8], strides = [1, 1]} : vector<25x96xf32> to vector<25x8xf32>
    %cst_32 = arith.constant dense<0.000000e+00> : vector<25x25xf32>
    %62 = tpu.matmul %59, %60, %cst_32 {dimension_numbers = #tpu.dot_dimension_numbers<[1], [1], [0], [0], [0, 0, 1, 0], [], []>} : vector<25x8xf32>, vector<25x8xf32>, vector<25x25xf32> -> vector<25x25xf32>
    %cst_33 = arith.constant dense<0xFF800000> : vector<25xf32>
    %63 = vector.multi_reduction <maximumf>, %62, %cst_33 [1] : vector<25x25xf32> to vector<25xf32>
    %64 = vector.shape_cast %63 : vector<25xf32> to vector<25x1xf32>
    %65 = vector.broadcast %64 : vector<25x1xf32> to vector<25x25xf32>
    %66 = arith.subf %62, %65 : vector<25x25xf32>
    %67 = math.exp %66 : vector<25x25xf32>
    %cst_34 = arith.constant dense<0.000000e+00> : vector<25xf32>
    %68 = vector.multi_reduction <add>, %67, %cst_34 [1] : vector<25x25xf32> to vector<25xf32>
    %69 = vector.shape_cast %68 : vector<25xf32> to vector<25x1xf32>
    %70 = tpu.reciprocal %69 {approx = true} : vector<25x1xf32> -> vector<25x1xf32>
    %71 = vector.broadcast %70 : vector<25x1xf32> to vector<25x25xf32>
    %72 = arith.mulf %67, %71 : vector<25x25xf32>
    %cst_35 = arith.constant dense<0.000000e+00> : vector<25x8xf32>
    %73 = tpu.matmul %72, %61, %cst_35 {dimension_numbers = #tpu.dot_dimension_numbers<[1], [0], [0], [1], [0, 0, 1, 1], [], []>} : vector<25x25xf32>, vector<25x8xf32>, vector<25x8xf32> -> vector<25x8xf32>
    %74 = vector.extract_strided_slice %35 {offsets = [8, 0], sizes = [8, 32], strides = [1, 1]} : vector<32x32xf32> to vector<8x32xf32>
    %cst_36 = arith.constant dense<0.000000e+00> : vector<25x32xf32>
    %75 = tpu.matmul %73, %74, %cst_36 {dimension_numbers = #tpu.dot_dimension_numbers<[1], [0], [0], [1], [0, 0, 1, 1], [], []>} : vector<25x8xf32>, vector<8x32xf32>, vector<25x32xf32> -> vector<25x32xf32>
    %76 = arith.addf %56, %75 : vector<25x32xf32>
    %77 = vector.extract_strided_slice %33 {offsets = [0, 16], sizes = [25, 8], strides = [1, 1]} : vector<25x96xf32> to vector<25x8xf32>
    %cst_37 = arith.constant 0.176776692 : f32
    %78 = vector.broadcast %cst_37 : f32 to vector<25x8xf32>
    %79 = arith.mulf %77, %78 : vector<25x8xf32>
    %80 = vector.extract_strided_slice %33 {offsets = [0, 48], sizes = [25, 8], strides = [1, 1]} : vector<25x96xf32> to vector<25x8xf32>
    %81 = vector.extract_strided_slice %33 {offsets = [0, 80], sizes = [25, 8], strides = [1, 1]} : vector<25x96xf32> to vector<25x8xf32>
    %cst_38 = arith.constant dense<0.000000e+00> : vector<25x25xf32>
    %82 = tpu.matmul %79, %80, %cst_38 {dimension_numbers = #tpu.dot_dimension_numbers<[1], [1], [0], [0], [0, 0, 1, 0], [], []>} : vector<25x8xf32>, vector<25x8xf32>, vector<25x25xf32> -> vector<25x25xf32>
    %cst_39 = arith.constant dense<0xFF800000> : vector<25xf32>
    %83 = vector.multi_reduction <maximumf>, %82, %cst_39 [1] : vector<25x25xf32> to vector<25xf32>
    %84 = vector.shape_cast %83 : vector<25xf32> to vector<25x1xf32>
    %85 = vector.broadcast %84 : vector<25x1xf32> to vector<25x25xf32>
    %86 = arith.subf %82, %85 : vector<25x25xf32>
    %87 = math.exp %86 : vector<25x25xf32>
    %cst_40 = arith.constant dense<0.000000e+00> : vector<25xf32>
    %88 = vector.multi_reduction <add>, %87, %cst_40 [1] : vector<25x25xf32> to vector<25xf32>
    %89 = vector.shape_cast %88 : vector<25xf32> to vector<25x1xf32>
    %90 = tpu.reciprocal %89 {approx = true} : vector<25x1xf32> -> vector<25x1xf32>
    %91 = vector.broadcast %90 : vector<25x1xf32> to vector<25x25xf32>
    %92 = arith.mulf %87, %91 : vector<25x25xf32>
    %cst_41 = arith.constant dense<0.000000e+00> : vector<25x8xf32>
    %93 = tpu.matmul %92, %81, %cst_41 {dimension_numbers = #tpu.dot_dimension_numbers<[1], [0], [0], [1], [0, 0, 1, 1], [], []>} : vector<25x25xf32>, vector<25x8xf32>, vector<25x8xf32> -> vector<25x8xf32>
    %94 = vector.extract_strided_slice %35 {offsets = [16, 0], sizes = [8, 32], strides = [1, 1]} : vector<32x32xf32> to vector<8x32xf32>
    %cst_42 = arith.constant dense<0.000000e+00> : vector<25x32xf32>
    %95 = tpu.matmul %93, %94, %cst_42 {dimension_numbers = #tpu.dot_dimension_numbers<[1], [0], [0], [1], [0, 0, 1, 1], [], []>} : vector<25x8xf32>, vector<8x32xf32>, vector<25x32xf32> -> vector<25x32xf32>
    %96 = arith.addf %76, %95 : vector<25x32xf32>
    %97 = vector.extract_strided_slice %33 {offsets = [0, 24], sizes = [25, 8], strides = [1, 1]} : vector<25x96xf32> to vector<25x8xf32>
    %cst_43 = arith.constant 0.176776692 : f32
    %98 = vector.broadcast %cst_43 : f32 to vector<25x8xf32>
    %99 = arith.mulf %97, %98 : vector<25x8xf32>
    %100 = vector.extract_strided_slice %33 {offsets = [0, 56], sizes = [25, 8], strides = [1, 1]} : vector<25x96xf32> to vector<25x8xf32>
    %101 = vector.extract_strided_slice %33 {offsets = [0, 88], sizes = [25, 8], strides = [1, 1]} : vector<25x96xf32> to vector<25x8xf32>
    %cst_44 = arith.constant dense<0.000000e+00> : vector<25x25xf32>
    %102 = tpu.matmul %99, %100, %cst_44 {dimension_numbers = #tpu.dot_dimension_numbers<[1], [1], [0], [0], [0, 0, 1, 0], [], []>} : vector<25x8xf32>, vector<25x8xf32>, vector<25x25xf32> -> vector<25x25xf32>
    %cst_45 = arith.constant dense<0xFF800000> : vector<25xf32>
    %103 = vector.multi_reduction <maximumf>, %102, %cst_45 [1] : vector<25x25xf32> to vector<25xf32>
    %104 = vector.shape_cast %103 : vector<25xf32> to vector<25x1xf32>
    %105 = vector.broadcast %104 : vector<25x1xf32> to vector<25x25xf32>
    %106 = arith.subf %102, %105 : vector<25x25xf32>
    %107 = math.exp %106 : vector<25x25xf32>
    %cst_46 = arith.constant dense<0.000000e+00> : vector<25xf32>
    %108 = vector.multi_reduction <add>, %107, %cst_46 [1] : vector<25x25xf32> to vector<25xf32>
    %109 = vector.shape_cast %108 : vector<25xf32> to vector<25x1xf32>
    %110 = tpu.reciprocal %109 {approx = true} : vector<25x1xf32> -> vector<25x1xf32>
    %111 = vector.broadcast %110 : vector<25x1xf32> to vector<25x25xf32>
    %112 = arith.mulf %107, %111 : vector<25x25xf32>
    %cst_47 = arith.constant dense<0.000000e+00> : vector<25x8xf32>
    %113 = tpu.matmul %112, %101, %cst_47 {dimension_numbers = #tpu.dot_dimension_numbers<[1], [0], [0], [1], [0, 0, 1, 1], [], []>} : vector<25x25xf32>, vector<25x8xf32>, vector<25x8xf32> -> vector<25x8xf32>
    %114 = vector.extract_strided_slice %35 {offsets = [24, 0], sizes = [8, 32], strides = [1, 1]} : vector<32x32xf32> to vector<8x32xf32>
    %cst_48 = arith.constant dense<0.000000e+00> : vector<25x32xf32>
    %115 = tpu.matmul %113, %114, %cst_48 {dimension_numbers = #tpu.dot_dimension_numbers<[1], [0], [0], [1], [0, 0, 1, 1], [], []>} : vector<25x8xf32>, vector<8x32xf32>, vector<25x32xf32> -> vector<25x32xf32>
    %116 = arith.addf %96, %115 : vector<25x32xf32>
    %117 = arith.addf %8, %116 : vector<25x32xf32>
    %c0_49 = arith.constant 0 : index
    %c0_50 = arith.constant 0 : index
    %118 = vector.load %arg9[%c0_49, %c0_50] : memref<2x32xf32, #tpu.memory_space<vmem>>, vector<1x32xf32>
    %119 = vector.broadcast %118 : vector<1x32xf32> to vector<25x32xf32>
    %120 = arith.addf %117, %119 : vector<25x32xf32>
    %c0_51 = arith.constant 0 : index
    %c0_52 = arith.constant 0 : index
    %121 = vector.load %arg10[%c0_51, %c0_52] : memref<2x32xf32, #tpu.memory_space<vmem>>, vector<1x32xf32>
    %c0_53 = arith.constant 0 : index
    %c0_54 = arith.constant 0 : index
    %122 = vector.load %arg11[%c0_53, %c0_54] : memref<2x32xf32, #tpu.memory_space<vmem>>, vector<1x32xf32>
    %cst_55 = arith.constant dense<0.000000e+00> : vector<25xf32>
    %123 = vector.multi_reduction <add>, %120, %cst_55 [1] : vector<25x32xf32> to vector<25xf32>
    %124 = vector.shape_cast %123 : vector<25xf32> to vector<25x1xf32>
    %cst_56 = arith.constant 3.200000e+01 : f32
    %125 = vector.broadcast %cst_56 : f32 to vector<25x1xf32>
    %126 = arith.divf %124, %125 : vector<25x1xf32>
    %127 = vector.broadcast %126 : vector<25x1xf32> to vector<25x32xf32>
    %128 = arith.subf %120, %127 : vector<25x32xf32>
    %129 = arith.mulf %128, %128 : vector<25x32xf32>
    %cst_57 = arith.constant dense<0.000000e+00> : vector<25xf32>
    %130 = vector.multi_reduction <add>, %129, %cst_57 [1] : vector<25x32xf32> to vector<25xf32>
    %131 = vector.shape_cast %130 : vector<25xf32> to vector<25x1xf32>
    %cst_58 = arith.constant 3.200000e+01 : f32
    %132 = vector.broadcast %cst_58 : f32 to vector<25x1xf32>
    %133 = arith.divf %131, %132 : vector<25x1xf32>
    %cst_59 = arith.constant 9.99999974E-6 : f32
    %134 = vector.broadcast %cst_59 : f32 to vector<25x1xf32>
    %135 = arith.addf %133, %134 : vector<25x1xf32>
    %136 = math.rsqrt %135 : vector<25x1xf32>
    %137 = vector.broadcast %136 : vector<25x1xf32> to vector<25x32xf32>
    %138 = arith.mulf %128, %137 : vector<25x32xf32>
    %139 = vector.broadcast %121 : vector<1x32xf32> to vector<25x32xf32>
    %140 = arith.mulf %138, %139 : vector<25x32xf32>
    %141 = vector.broadcast %122 : vector<1x32xf32> to vector<25x32xf32>
    %142 = arith.addf %140, %141 : vector<25x32xf32>
    %c0_60 = arith.constant 0 : index
    %c0_61 = arith.constant 0 : index
    %c0_62 = arith.constant 0 : index
    %143 = vector.load %arg12[%c0_60, %c0_61, %c0_62] : memref<2x32x64xf32, #tpu.memory_space<vmem>>, vector<1x32x64xf32>
    %144 = vector.shape_cast %143 : vector<1x32x64xf32> to vector<32x64xf32>
    %cst_63 = arith.constant dense<0.000000e+00> : vector<25x64xf32>
    %145 = tpu.matmul %142, %144, %cst_63 {dimension_numbers = #tpu.dot_dimension_numbers<[1], [0], [0], [1], [0, 0, 1, 1], [], []>} : vector<25x32xf32>, vector<32x64xf32>, vector<25x64xf32> -> vector<25x64xf32>
    %c0_64 = arith.constant 0 : index
    %c0_65 = arith.constant 0 : index
    %146 = vector.load %arg13[%c0_64, %c0_65] : memref<2x64xf32, #tpu.memory_space<vmem>>, vector<1x64xf32>
    %147 = vector.broadcast %146 : vector<1x64xf32> to vector<25x64xf32>
    %148 = arith.addf %145, %147 : vector<25x64xf32>
    %cst_66 = arith.constant 5.000000e-01 : f32
    %149 = vector.broadcast %cst_66 : f32 to vector<25x64xf32>
    %150 = arith.mulf %149, %148 : vector<25x64xf32>
    %cst_67 = arith.constant 0.707106769 : f32
    %151 = vector.broadcast %cst_67 : f32 to vector<25x64xf32>
    %152 = arith.mulf %148, %151 : vector<25x64xf32>
    %153 = math.erf %152 : vector<25x64xf32>
    %cst_68 = arith.constant 1.000000e+00 : f32
    %154 = vector.broadcast %cst_68 : f32 to vector<25x64xf32>
    %155 = arith.addf %154, %153 : vector<25x64xf32>
    %156 = arith.mulf %150, %155 : vector<25x64xf32>
    %c0_69 = arith.constant 0 : index
    %c0_70 = arith.constant 0 : index
    %c0_71 = arith.constant 0 : index
    %157 = vector.load %arg14[%c0_69, %c0_70, %c0_71] : memref<2x64x32xf32, #tpu.memory_space<vmem>>, vector<1x64x32xf32>
    %158 = vector.shape_cast %157 : vector<1x64x32xf32> to vector<64x32xf32>
    %cst_72 = arith.constant dense<0.000000e+00> : vector<25x32xf32>
    %159 = tpu.matmul %156, %158, %cst_72 {dimension_numbers = #tpu.dot_dimension_numbers<[1], [0], [0], [1], [0, 0, 1, 1], [], []>} : vector<25x64xf32>, vector<64x32xf32>, vector<25x32xf32> -> vector<25x32xf32>
    %c0_73 = arith.constant 0 : index
    %c0_74 = arith.constant 0 : index
    %160 = vector.load %arg15[%c0_73, %c0_74] : memref<2x32xf32, #tpu.memory_space<vmem>>, vector<1x32xf32>
    %161 = vector.broadcast %160 : vector<1x32xf32> to vector<25x32xf32>
    %162 = arith.addf %159, %161 : vector<25x32xf32>
    %163 = arith.addf %120, %162 : vector<25x32xf32>
    %c1 = arith.constant 1 : index
    %c0_75 = arith.constant 0 : index
    %164 = vector.load %arg5[%c1, %c0_75] : memref<2x32xf32, #tpu.memory_space<vmem>>, vector<1x32xf32>
    %c1_76 = arith.constant 1 : index
    %c0_77 = arith.constant 0 : index
    %165 = vector.load %arg6[%c1_76, %c0_77] : memref<2x32xf32, #tpu.memory_space<vmem>>, vector<1x32xf32>
    %cst_78 = arith.constant dense<0.000000e+00> : vector<25xf32>
    %166 = vector.multi_reduction <add>, %163, %cst_78 [1] : vector<25x32xf32> to vector<25xf32>
    %167 = vector.shape_cast %166 : vector<25xf32> to vector<25x1xf32>
    %cst_79 = arith.constant 3.200000e+01 : f32
    %168 = vector.broadcast %cst_79 : f32 to vector<25x1xf32>
    %169 = arith.divf %167, %168 : vector<25x1xf32>
    %170 = vector.broadcast %169 : vector<25x1xf32> to vector<25x32xf32>
    %171 = arith.subf %163, %170 : vector<25x32xf32>
    %172 = arith.mulf %171, %171 : vector<25x32xf32>
    %cst_80 = arith.constant dense<0.000000e+00> : vector<25xf32>
    %173 = vector.multi_reduction <add>, %172, %cst_80 [1] : vector<25x32xf32> to vector<25xf32>
    %174 = vector.shape_cast %173 : vector<25xf32> to vector<25x1xf32>
    %cst_81 = arith.constant 3.200000e+01 : f32
    %175 = vector.broadcast %cst_81 : f32 to vector<25x1xf32>
    %176 = arith.divf %174, %175 : vector<25x1xf32>
    %cst_82 = arith.constant 9.99999974E-6 : f32
    %177 = vector.broadcast %cst_82 : f32 to vector<25x1xf32>
    %178 = arith.addf %176, %177 : vector<25x1xf32>
    %179 = math.rsqrt %178 : vector<25x1xf32>
    %180 = vector.broadcast %179 : vector<25x1xf32> to vector<25x32xf32>
    %181 = arith.mulf %171, %180 : vector<25x32xf32>
    %182 = vector.broadcast %164 : vector<1x32xf32> to vector<25x32xf32>
    %183 = arith.mulf %181, %182 : vector<25x32xf32>
    %184 = vector.broadcast %165 : vector<1x32xf32> to vector<25x32xf32>
    %185 = arith.addf %183, %184 : vector<25x32xf32>
    %c1_83 = arith.constant 1 : index
    %c0_84 = arith.constant 0 : index
    %c0_85 = arith.constant 0 : index
    %186 = vector.load %arg7[%c1_83, %c0_84, %c0_85] : memref<2x32x96xf32, #tpu.memory_space<vmem>>, vector<1x32x96xf32>
    %187 = vector.shape_cast %186 : vector<1x32x96xf32> to vector<32x96xf32>
    %cst_86 = arith.constant dense<0.000000e+00> : vector<25x96xf32>
    %188 = tpu.matmul %185, %187, %cst_86 {dimension_numbers = #tpu.dot_dimension_numbers<[1], [0], [0], [1], [0, 0, 1, 1], [], []>} : vector<25x32xf32>, vector<32x96xf32>, vector<25x96xf32> -> vector<25x96xf32>
    %c1_87 = arith.constant 1 : index
    %c0_88 = arith.constant 0 : index
    %c0_89 = arith.constant 0 : index
    %189 = vector.load %arg8[%c1_87, %c0_88, %c0_89] : memref<2x32x32xf32, #tpu.memory_space<vmem>>, vector<1x32x32xf32>
    %190 = vector.shape_cast %189 : vector<1x32x32xf32> to vector<32x32xf32>
    %cst_90 = arith.constant 0.000000e+00 : f32
    %191 = vector.broadcast %cst_90 : f32 to vector<25x32xf32>
    %192 = vector.extract_strided_slice %188 {offsets = [0, 0], sizes = [25, 8], strides = [1, 1]} : vector<25x96xf32> to vector<25x8xf32>
    %cst_91 = arith.constant 0.176776692 : f32
    %193 = vector.broadcast %cst_91 : f32 to vector<25x8xf32>
    %194 = arith.mulf %192, %193 : vector<25x8xf32>
    %195 = vector.extract_strided_slice %188 {offsets = [0, 32], sizes = [25, 8], strides = [1, 1]} : vector<25x96xf32> to vector<25x8xf32>
    %196 = vector.extract_strided_slice %188 {offsets = [0, 64], sizes = [25, 8], strides = [1, 1]} : vector<25x96xf32> to vector<25x8xf32>
    %cst_92 = arith.constant dense<0.000000e+00> : vector<25x25xf32>
    %197 = tpu.matmul %194, %195, %cst_92 {dimension_numbers = #tpu.dot_dimension_numbers<[1], [1], [0], [0], [0, 0, 1, 0], [], []>} : vector<25x8xf32>, vector<25x8xf32>, vector<25x25xf32> -> vector<25x25xf32>
    %cst_93 = arith.constant dense<0xFF800000> : vector<25xf32>
    %198 = vector.multi_reduction <maximumf>, %197, %cst_93 [1] : vector<25x25xf32> to vector<25xf32>
    %199 = vector.shape_cast %198 : vector<25xf32> to vector<25x1xf32>
    %200 = vector.broadcast %199 : vector<25x1xf32> to vector<25x25xf32>
    %201 = arith.subf %197, %200 : vector<25x25xf32>
    %202 = math.exp %201 : vector<25x25xf32>
    %cst_94 = arith.constant dense<0.000000e+00> : vector<25xf32>
    %203 = vector.multi_reduction <add>, %202, %cst_94 [1] : vector<25x25xf32> to vector<25xf32>
    %204 = vector.shape_cast %203 : vector<25xf32> to vector<25x1xf32>
    %205 = tpu.reciprocal %204 {approx = true} : vector<25x1xf32> -> vector<25x1xf32>
    %206 = vector.broadcast %205 : vector<25x1xf32> to vector<25x25xf32>
    %207 = arith.mulf %202, %206 : vector<25x25xf32>
    %cst_95 = arith.constant dense<0.000000e+00> : vector<25x8xf32>
    %208 = tpu.matmul %207, %196, %cst_95 {dimension_numbers = #tpu.dot_dimension_numbers<[1], [0], [0], [1], [0, 0, 1, 1], [], []>} : vector<25x25xf32>, vector<25x8xf32>, vector<25x8xf32> -> vector<25x8xf32>
    %209 = vector.extract_strided_slice %190 {offsets = [0, 0], sizes = [8, 32], strides = [1, 1]} : vector<32x32xf32> to vector<8x32xf32>
    %cst_96 = arith.constant dense<0.000000e+00> : vector<25x32xf32>
    %210 = tpu.matmul %208, %209, %cst_96 {dimension_numbers = #tpu.dot_dimension_numbers<[1], [0], [0], [1], [0, 0, 1, 1], [], []>} : vector<25x8xf32>, vector<8x32xf32>, vector<25x32xf32> -> vector<25x32xf32>
    %211 = arith.addf %191, %210 : vector<25x32xf32>
    %212 = vector.extract_strided_slice %188 {offsets = [0, 8], sizes = [25, 8], strides = [1, 1]} : vector<25x96xf32> to vector<25x8xf32>
    %cst_97 = arith.constant 0.176776692 : f32
    %213 = vector.broadcast %cst_97 : f32 to vector<25x8xf32>
    %214 = arith.mulf %212, %213 : vector<25x8xf32>
    %215 = vector.extract_strided_slice %188 {offsets = [0, 40], sizes = [25, 8], strides = [1, 1]} : vector<25x96xf32> to vector<25x8xf32>
    %216 = vector.extract_strided_slice %188 {offsets = [0, 72], sizes = [25, 8], strides = [1, 1]} : vector<25x96xf32> to vector<25x8xf32>
    %cst_98 = arith.constant dense<0.000000e+00> : vector<25x25xf32>
    %217 = tpu.matmul %214, %215, %cst_98 {dimension_numbers = #tpu.dot_dimension_numbers<[1], [1], [0], [0], [0, 0, 1, 0], [], []>} : vector<25x8xf32>, vector<25x8xf32>, vector<25x25xf32> -> vector<25x25xf32>
    %cst_99 = arith.constant dense<0xFF800000> : vector<25xf32>
    %218 = vector.multi_reduction <maximumf>, %217, %cst_99 [1] : vector<25x25xf32> to vector<25xf32>
    %219 = vector.shape_cast %218 : vector<25xf32> to vector<25x1xf32>
    %220 = vector.broadcast %219 : vector<25x1xf32> to vector<25x25xf32>
    %221 = arith.subf %217, %220 : vector<25x25xf32>
    %222 = math.exp %221 : vector<25x25xf32>
    %cst_100 = arith.constant dense<0.000000e+00> : vector<25xf32>
    %223 = vector.multi_reduction <add>, %222, %cst_100 [1] : vector<25x25xf32> to vector<25xf32>
    %224 = vector.shape_cast %223 : vector<25xf32> to vector<25x1xf32>
    %225 = tpu.reciprocal %224 {approx = true} : vector<25x1xf32> -> vector<25x1xf32>
    %226 = vector.broadcast %225 : vector<25x1xf32> to vector<25x25xf32>
    %227 = arith.mulf %222, %226 : vector<25x25xf32>
    %cst_101 = arith.constant dense<0.000000e+00> : vector<25x8xf32>
    %228 = tpu.matmul %227, %216, %cst_101 {dimension_numbers = #tpu.dot_dimension_numbers<[1], [0], [0], [1], [0, 0, 1, 1], [], []>} : vector<25x25xf32>, vector<25x8xf32>, vector<25x8xf32> -> vector<25x8xf32>
    %229 = vector.extract_strided_slice %190 {offsets = [8, 0], sizes = [8, 32], strides = [1, 1]} : vector<32x32xf32> to vector<8x32xf32>
    %cst_102 = arith.constant dense<0.000000e+00> : vector<25x32xf32>
    %230 = tpu.matmul %228, %229, %cst_102 {dimension_numbers = #tpu.dot_dimension_numbers<[1], [0], [0], [1], [0, 0, 1, 1], [], []>} : vector<25x8xf32>, vector<8x32xf32>, vector<25x32xf32> -> vector<25x32xf32>
    %231 = arith.addf %211, %230 : vector<25x32xf32>
    %232 = vector.extract_strided_slice %188 {offsets = [0, 16], sizes = [25, 8], strides = [1, 1]} : vector<25x96xf32> to vector<25x8xf32>
    %cst_103 = arith.constant 0.176776692 : f32
    %233 = vector.broadcast %cst_103 : f32 to vector<25x8xf32>
    %234 = arith.mulf %232, %233 : vector<25x8xf32>
    %235 = vector.extract_strided_slice %188 {offsets = [0, 48], sizes = [25, 8], strides = [1, 1]} : vector<25x96xf32> to vector<25x8xf32>
    %236 = vector.extract_strided_slice %188 {offsets = [0, 80], sizes = [25, 8], strides = [1, 1]} : vector<25x96xf32> to vector<25x8xf32>
    %cst_104 = arith.constant dense<0.000000e+00> : vector<25x25xf32>
    %237 = tpu.matmul %234, %235, %cst_104 {dimension_numbers = #tpu.dot_dimension_numbers<[1], [1], [0], [0], [0, 0, 1, 0], [], []>} : vector<25x8xf32>, vector<25x8xf32>, vector<25x25xf32> -> vector<25x25xf32>
    %cst_105 = arith.constant dense<0xFF800000> : vector<25xf32>
    %238 = vector.multi_reduction <maximumf>, %237, %cst_105 [1] : vector<25x25xf32> to vector<25xf32>
    %239 = vector.shape_cast %238 : vector<25xf32> to vector<25x1xf32>
    %240 = vector.broadcast %239 : vector<25x1xf32> to vector<25x25xf32>
    %241 = arith.subf %237, %240 : vector<25x25xf32>
    %242 = math.exp %241 : vector<25x25xf32>
    %cst_106 = arith.constant dense<0.000000e+00> : vector<25xf32>
    %243 = vector.multi_reduction <add>, %242, %cst_106 [1] : vector<25x25xf32> to vector<25xf32>
    %244 = vector.shape_cast %243 : vector<25xf32> to vector<25x1xf32>
    %245 = tpu.reciprocal %244 {approx = true} : vector<25x1xf32> -> vector<25x1xf32>
    %246 = vector.broadcast %245 : vector<25x1xf32> to vector<25x25xf32>
    %247 = arith.mulf %242, %246 : vector<25x25xf32>
    %cst_107 = arith.constant dense<0.000000e+00> : vector<25x8xf32>
    %248 = tpu.matmul %247, %236, %cst_107 {dimension_numbers = #tpu.dot_dimension_numbers<[1], [0], [0], [1], [0, 0, 1, 1], [], []>} : vector<25x25xf32>, vector<25x8xf32>, vector<25x8xf32> -> vector<25x8xf32>
    %249 = vector.extract_strided_slice %190 {offsets = [16, 0], sizes = [8, 32], strides = [1, 1]} : vector<32x32xf32> to vector<8x32xf32>
    %cst_108 = arith.constant dense<0.000000e+00> : vector<25x32xf32>
    %250 = tpu.matmul %248, %249, %cst_108 {dimension_numbers = #tpu.dot_dimension_numbers<[1], [0], [0], [1], [0, 0, 1, 1], [], []>} : vector<25x8xf32>, vector<8x32xf32>, vector<25x32xf32> -> vector<25x32xf32>
    %251 = arith.addf %231, %250 : vector<25x32xf32>
    %252 = vector.extract_strided_slice %188 {offsets = [0, 24], sizes = [25, 8], strides = [1, 1]} : vector<25x96xf32> to vector<25x8xf32>
    %cst_109 = arith.constant 0.176776692 : f32
    %253 = vector.broadcast %cst_109 : f32 to vector<25x8xf32>
    %254 = arith.mulf %252, %253 : vector<25x8xf32>
    %255 = vector.extract_strided_slice %188 {offsets = [0, 56], sizes = [25, 8], strides = [1, 1]} : vector<25x96xf32> to vector<25x8xf32>
    %256 = vector.extract_strided_slice %188 {offsets = [0, 88], sizes = [25, 8], strides = [1, 1]} : vector<25x96xf32> to vector<25x8xf32>
    %cst_110 = arith.constant dense<0.000000e+00> : vector<25x25xf32>
    %257 = tpu.matmul %254, %255, %cst_110 {dimension_numbers = #tpu.dot_dimension_numbers<[1], [1], [0], [0], [0, 0, 1, 0], [], []>} : vector<25x8xf32>, vector<25x8xf32>, vector<25x25xf32> -> vector<25x25xf32>
    %cst_111 = arith.constant dense<0xFF800000> : vector<25xf32>
    %258 = vector.multi_reduction <maximumf>, %257, %cst_111 [1] : vector<25x25xf32> to vector<25xf32>
    %259 = vector.shape_cast %258 : vector<25xf32> to vector<25x1xf32>
    %260 = vector.broadcast %259 : vector<25x1xf32> to vector<25x25xf32>
    %261 = arith.subf %257, %260 : vector<25x25xf32>
    %262 = math.exp %261 : vector<25x25xf32>
    %cst_112 = arith.constant dense<0.000000e+00> : vector<25xf32>
    %263 = vector.multi_reduction <add>, %262, %cst_112 [1] : vector<25x25xf32> to vector<25xf32>
    %264 = vector.shape_cast %263 : vector<25xf32> to vector<25x1xf32>
    %265 = tpu.reciprocal %264 {approx = true} : vector<25x1xf32> -> vector<25x1xf32>
    %266 = vector.broadcast %265 : vector<25x1xf32> to vector<25x25xf32>
    %267 = arith.mulf %262, %266 : vector<25x25xf32>
    %cst_113 = arith.constant dense<0.000000e+00> : vector<25x8xf32>
    %268 = tpu.matmul %267, %256, %cst_113 {dimension_numbers = #tpu.dot_dimension_numbers<[1], [0], [0], [1], [0, 0, 1, 1], [], []>} : vector<25x25xf32>, vector<25x8xf32>, vector<25x8xf32> -> vector<25x8xf32>
    %269 = vector.extract_strided_slice %190 {offsets = [24, 0], sizes = [8, 32], strides = [1, 1]} : vector<32x32xf32> to vector<8x32xf32>
    %cst_114 = arith.constant dense<0.000000e+00> : vector<25x32xf32>
    %270 = tpu.matmul %268, %269, %cst_114 {dimension_numbers = #tpu.dot_dimension_numbers<[1], [0], [0], [1], [0, 0, 1, 1], [], []>} : vector<25x8xf32>, vector<8x32xf32>, vector<25x32xf32> -> vector<25x32xf32>
    %271 = arith.addf %251, %270 : vector<25x32xf32>
    %272 = arith.addf %163, %271 : vector<25x32xf32>
    %c1_115 = arith.constant 1 : index
    %c0_116 = arith.constant 0 : index
    %273 = vector.load %arg9[%c1_115, %c0_116] : memref<2x32xf32, #tpu.memory_space<vmem>>, vector<1x32xf32>
    %274 = vector.broadcast %273 : vector<1x32xf32> to vector<25x32xf32>
    %275 = arith.addf %272, %274 : vector<25x32xf32>
    %c1_117 = arith.constant 1 : index
    %c0_118 = arith.constant 0 : index
    %276 = vector.load %arg10[%c1_117, %c0_118] : memref<2x32xf32, #tpu.memory_space<vmem>>, vector<1x32xf32>
    %c1_119 = arith.constant 1 : index
    %c0_120 = arith.constant 0 : index
    %277 = vector.load %arg11[%c1_119, %c0_120] : memref<2x32xf32, #tpu.memory_space<vmem>>, vector<1x32xf32>
    %cst_121 = arith.constant dense<0.000000e+00> : vector<25xf32>
    %278 = vector.multi_reduction <add>, %275, %cst_121 [1] : vector<25x32xf32> to vector<25xf32>
    %279 = vector.shape_cast %278 : vector<25xf32> to vector<25x1xf32>
    %cst_122 = arith.constant 3.200000e+01 : f32
    %280 = vector.broadcast %cst_122 : f32 to vector<25x1xf32>
    %281 = arith.divf %279, %280 : vector<25x1xf32>
    %282 = vector.broadcast %281 : vector<25x1xf32> to vector<25x32xf32>
    %283 = arith.subf %275, %282 : vector<25x32xf32>
    %284 = arith.mulf %283, %283 : vector<25x32xf32>
    %cst_123 = arith.constant dense<0.000000e+00> : vector<25xf32>
    %285 = vector.multi_reduction <add>, %284, %cst_123 [1] : vector<25x32xf32> to vector<25xf32>
    %286 = vector.shape_cast %285 : vector<25xf32> to vector<25x1xf32>
    %cst_124 = arith.constant 3.200000e+01 : f32
    %287 = vector.broadcast %cst_124 : f32 to vector<25x1xf32>
    %288 = arith.divf %286, %287 : vector<25x1xf32>
    %cst_125 = arith.constant 9.99999974E-6 : f32
    %289 = vector.broadcast %cst_125 : f32 to vector<25x1xf32>
    %290 = arith.addf %288, %289 : vector<25x1xf32>
    %291 = math.rsqrt %290 : vector<25x1xf32>
    %292 = vector.broadcast %291 : vector<25x1xf32> to vector<25x32xf32>
    %293 = arith.mulf %283, %292 : vector<25x32xf32>
    %294 = vector.broadcast %276 : vector<1x32xf32> to vector<25x32xf32>
    %295 = arith.mulf %293, %294 : vector<25x32xf32>
    %296 = vector.broadcast %277 : vector<1x32xf32> to vector<25x32xf32>
    %297 = arith.addf %295, %296 : vector<25x32xf32>
    %c1_126 = arith.constant 1 : index
    %c0_127 = arith.constant 0 : index
    %c0_128 = arith.constant 0 : index
    %298 = vector.load %arg12[%c1_126, %c0_127, %c0_128] : memref<2x32x64xf32, #tpu.memory_space<vmem>>, vector<1x32x64xf32>
    %299 = vector.shape_cast %298 : vector<1x32x64xf32> to vector<32x64xf32>
    %cst_129 = arith.constant dense<0.000000e+00> : vector<25x64xf32>
    %300 = tpu.matmul %297, %299, %cst_129 {dimension_numbers = #tpu.dot_dimension_numbers<[1], [0], [0], [1], [0, 0, 1, 1], [], []>} : vector<25x32xf32>, vector<32x64xf32>, vector<25x64xf32> -> vector<25x64xf32>
    %c1_130 = arith.constant 1 : index
    %c0_131 = arith.constant 0 : index
    %301 = vector.load %arg13[%c1_130, %c0_131] : memref<2x64xf32, #tpu.memory_space<vmem>>, vector<1x64xf32>
    %302 = vector.broadcast %301 : vector<1x64xf32> to vector<25x64xf32>
    %303 = arith.addf %300, %302 : vector<25x64xf32>
    %cst_132 = arith.constant 5.000000e-01 : f32
    %304 = vector.broadcast %cst_132 : f32 to vector<25x64xf32>
    %305 = arith.mulf %304, %303 : vector<25x64xf32>
    %cst_133 = arith.constant 0.707106769 : f32
    %306 = vector.broadcast %cst_133 : f32 to vector<25x64xf32>
    %307 = arith.mulf %303, %306 : vector<25x64xf32>
    %308 = math.erf %307 : vector<25x64xf32>
    %cst_134 = arith.constant 1.000000e+00 : f32
    %309 = vector.broadcast %cst_134 : f32 to vector<25x64xf32>
    %310 = arith.addf %309, %308 : vector<25x64xf32>
    %311 = arith.mulf %305, %310 : vector<25x64xf32>
    %c1_135 = arith.constant 1 : index
    %c0_136 = arith.constant 0 : index
    %c0_137 = arith.constant 0 : index
    %312 = vector.load %arg14[%c1_135, %c0_136, %c0_137] : memref<2x64x32xf32, #tpu.memory_space<vmem>>, vector<1x64x32xf32>
    %313 = vector.shape_cast %312 : vector<1x64x32xf32> to vector<64x32xf32>
    %cst_138 = arith.constant dense<0.000000e+00> : vector<25x32xf32>
    %314 = tpu.matmul %311, %313, %cst_138 {dimension_numbers = #tpu.dot_dimension_numbers<[1], [0], [0], [1], [0, 0, 1, 1], [], []>} : vector<25x64xf32>, vector<64x32xf32>, vector<25x32xf32> -> vector<25x32xf32>
    %c1_139 = arith.constant 1 : index
    %c0_140 = arith.constant 0 : index
    %315 = vector.load %arg15[%c1_139, %c0_140] : memref<2x32xf32, #tpu.memory_space<vmem>>, vector<1x32xf32>
    %316 = vector.broadcast %315 : vector<1x32xf32> to vector<25x32xf32>
    %317 = arith.addf %314, %316 : vector<25x32xf32>
    %318 = arith.addf %275, %317 : vector<25x32xf32>
    %319 = vector.extract_strided_slice %318 {offsets = [0, 0], sizes = [1, 32], strides = [1, 1]} : vector<25x32xf32> to vector<1x32xf32>
    %c0_141 = arith.constant 0 : index
    %c0_142 = arith.constant 0 : index
    %320 = vector.load %arg16[%c0_141, %c0_142] : memref<1x32xf32, #tpu.memory_space<vmem>>, vector<1x32xf32>
    %c0_143 = arith.constant 0 : index
    %c0_144 = arith.constant 0 : index
    %321 = vector.load %arg17[%c0_143, %c0_144] : memref<1x32xf32, #tpu.memory_space<vmem>>, vector<1x32xf32>
    %cst_145 = arith.constant dense<0.000000e+00> : vector<1xf32>
    %322 = vector.multi_reduction <add>, %319, %cst_145 [1] : vector<1x32xf32> to vector<1xf32>
    %323 = vector.shape_cast %322 : vector<1xf32> to vector<1x1xf32>
    %cst_146 = arith.constant 3.200000e+01 : f32
    %324 = vector.broadcast %cst_146 : f32 to vector<1x1xf32>
    %325 = arith.divf %323, %324 : vector<1x1xf32>
    %326 = vector.broadcast %325 : vector<1x1xf32> to vector<1x32xf32>
    %327 = arith.subf %319, %326 : vector<1x32xf32>
    %328 = arith.mulf %327, %327 : vector<1x32xf32>
    %cst_147 = arith.constant dense<0.000000e+00> : vector<1xf32>
    %329 = vector.multi_reduction <add>, %328, %cst_147 [1] : vector<1x32xf32> to vector<1xf32>
    %330 = vector.shape_cast %329 : vector<1xf32> to vector<1x1xf32>
    %cst_148 = arith.constant 3.200000e+01 : f32
    %331 = vector.broadcast %cst_148 : f32 to vector<1x1xf32>
    %332 = arith.divf %330, %331 : vector<1x1xf32>
    %cst_149 = arith.constant 9.99999974E-6 : f32
    %333 = vector.broadcast %cst_149 : f32 to vector<1x1xf32>
    %334 = arith.addf %332, %333 : vector<1x1xf32>
    %335 = math.rsqrt %334 : vector<1x1xf32>
    %336 = vector.broadcast %335 : vector<1x1xf32> to vector<1x32xf32>
    %337 = arith.mulf %327, %336 : vector<1x32xf32>
    %338 = arith.mulf %337, %320 : vector<1x32xf32>
    %339 = arith.addf %338, %321 : vector<1x32xf32>
    %c0_150 = arith.constant 0 : index
    %c0_151 = arith.constant 0 : index
    %340 = vector.load %arg18[%c0_150, %c0_151] : memref<32x10xf32, #tpu.memory_space<vmem>>, vector<32x10xf32>
    %cst_152 = arith.constant dense<0.000000e+00> : vector<1x10xf32>
    %341 = tpu.matmul %339, %340, %cst_152 {dimension_numbers = #tpu.dot_dimension_numbers<[1], [0], [0], [1], [0, 0, 1, 1], [], []>} : vector<1x32xf32>, vector<32x10xf32>, vector<1x10xf32> -> vector<1x10xf32>
    %c0_153 = arith.constant 0 : index
    %c0_154 = arith.constant 0 : index
    %342 = vector.load %arg19[%c0_153, %c0_154] : memref<1x10xf32, #tpu.memory_space<vmem>>, vector<1x10xf32>
    %343 = arith.addf %341, %342 : vector<1x10xf32>
    %c0_155 = arith.constant 0 : index
    %c0_156 = arith.constant 0 : index
    %c0_157 = arith.constant 0 : index
    %344 = vector.load %arg20[%c0_155, %c0_156, %c0_157] : memref<1x1x10xf32, #tpu.memory_space<vmem>>, vector<1x1x10xf32>
    %345 = vector.shape_cast %344 : vector<1x1x10xf32> to vector<1x10xf32>
    %346 = vector.shape_cast %343 : vector<1x10xf32> to vector<1x1x10xf32>
    tpu.vector_store %arg20[%c0_155, %c0_156, %c0_157], %346 {strides = array<i32>} : memref<1x1x10xf32, #tpu.memory_space<vmem>>, vector<1x1x10xf32>,
    return
  }
  func.func @transform_0(%arg0: i32) -> (i32, i32, i32) {
    %c0_i32 = arith.constant 0 : i32
    %c0_i32_0 = arith.constant 0 : i32
    %c0_i32_1 = arith.constant 0 : i32
    return %arg0, %c0_i32, %c0_i32_0 : i32, i32, i32
  }
  func.func @transform_1(%arg0: i32) -> (i32, i32) {
    %c0_i32 = arith.constant 0 : i32
    %c0_i32_0 = arith.constant 0 : i32
    %c0_i32_1 = arith.constant 0 : i32
    return %c0_i32, %c0_i32_0 : i32, i32
  }
  func.func @transform_2(%arg0: i32) -> (i32, i32) {
    %c0_i32 = arith.constant 0 : i32
    %c0_i32_0 = arith.constant 0 : i32
    %c0_i32_1 = arith.constant 0 : i32
    return %c0_i32, %c0_i32_0 : i32, i32
  }
  func.func @transform_3(%arg0: i32) -> (i32, i32) {
    %c0_i32 = arith.constant 0 : i32
    %c0_i32_0 = arith.constant 0 : i32
    %c0_i32_1 = arith.constant 0 : i32
    return %c0_i32, %c0_i32_0 : i32, i32
  }
  func.func @transform_4(%arg0: i32) -> (i32, i32) {
    %c0_i32 = arith.constant 0 : i32
    %c0_i32_0 = arith.constant 0 : i32
    %c0_i32_1 = arith.constant 0 : i32
    return %c0_i32, %c0_i32_0 : i32, i32
  }
  func.func @transform_5(%arg0: i32) -> (i32, i32) {
    %c0_i32 = arith.constant 0 : i32
    %c0_i32_0 = arith.constant 0 : i32
    %c0_i32_1 = arith.constant 0 : i32
    return %c0_i32, %c0_i32_0 : i32, i32
  }
  func.func @transform_6(%arg0: i32) -> (i32, i32, i32) {
    %c0_i32 = arith.constant 0 : i32
    %c0_i32_0 = arith.constant 0 : i32
    %c0_i32_1 = arith.constant 0 : i32
    %c0_i32_2 = arith.constant 0 : i32
    return %c0_i32, %c0_i32_0, %c0_i32_1 : i32, i32, i32
  }
  func.func @transform_7(%arg0: i32) -> (i32, i32, i32) {
    %c0_i32 = arith.constant 0 : i32
    %c0_i32_0 = arith.constant 0 : i32
    %c0_i32_1 = arith.constant 0 : i32
    %c0_i32_2 = arith.constant 0 : i32
    return %c0_i32, %c0_i32_0, %c0_i32_1 : i32, i32, i32
  }
  func.func @transform_8(%arg0: i32) -> (i32, i32) {
    %c0_i32 = arith.constant 0 : i32
    %c0_i32_0 = arith.constant 0 : i32
    %c0_i32_1 = arith.constant 0 : i32
    return %c0_i32, %c0_i32_0 : i32, i32
  }
  func.func @transform_9(%arg0: i32) -> (i32, i32) {
    %c0_i32 = arith.constant 0 : i32
    %c0_i32_0 = arith.constant 0 : i32
    %c0_i32_1 = arith.constant 0 : i32
    return %c0_i32, %c0_i32_0 : i32, i32
  }
  func.func @transform_10(%arg0: i32) -> (i32, i32) {
    %c0_i32 = arith.constant 0 : i32
    %c0_i32_0 = arith.constant 0 : i32
    %c0_i32_1 = arith.constant 0 : i32
    return %c0_i32, %c0_i32_0 : i32, i32
  }
  func.func @transform_11(%arg0: i32) -> (i32, i32, i32) {
    %c0_i32 = arith.constant 0 : i32
    %c0_i32_0 = arith.constant 0 : i32
    %c0_i32_1 = arith.constant 0 : i32
    %c0_i32_2 = arith.constant 0 : i32
    return %c0_i32, %c0_i32_0, %c0_i32_1 : i32, i32, i32
  }
  func.func @transform_12(%arg0: i32) -> (i32, i32) {
    %c0_i32 = arith.constant 0 : i32
    %c0_i32_0 = arith.constant 0 : i32
    %c0_i32_1 = arith.constant 0 : i32
    return %c0_i32, %c0_i32_0 : i32, i32
  }
  func.func @transform_13(%arg0: i32) -> (i32, i32, i32) {
    %c0_i32 = arith.constant 0 : i32
    %c0_i32_0 = arith.constant 0 : i32
    %c0_i32_1 = arith.constant 0 : i32
    %c0_i32_2 = arith.constant 0 : i32
    return %c0_i32, %c0_i32_0, %c0_i32_1 : i32, i32, i32
  }
  func.func @transform_14(%arg0: i32) -> (i32, i32) {
    %c0_i32 = arith.constant 0 : i32
    %c0_i32_0 = arith.constant 0 : i32
    %c0_i32_1 = arith.constant 0 : i32
    return %c0_i32, %c0_i32_0 : i32, i32
  }
  func.func @transform_15(%arg0: i32) -> (i32, i32) {
    %c0_i32 = arith.constant 0 : i32
    %c0_i32_0 = arith.constant 0 : i32
    %c0_i32_1 = arith.constant 0 : i32
    return %c0_i32, %c0_i32_0 : i32, i32
  }
  func.func @transform_16(%arg0: i32) -> (i32, i32) {
    %c0_i32 = arith.constant 0 : i32
    %c0_i32_0 = arith.constant 0 : i32
    %c0_i32_1 = arith.constant 0 : i32
    return %c0_i32, %c0_i32_0 : i32, i32
  }
  func.func @transform_17(%arg0: i32) -> (i32, i32) {
    %c0_i32 = arith.constant 0 : i32
    %c0_i32_0 = arith.constant 0 : i32
    %c0_i32_1 = arith.constant 0 : i32
    return %c0_i32, %c0_i32_0 : i32, i32
  }
  func.func @transform_18(%arg0: i32) -> (i32, i32) {
    %c0_i32 = arith.constant 0 : i32
    %c0_i32_0 = arith.constant 0 : i32
    %c0_i32_1 = arith.constant 0 : i32
    return %c0_i32, %c0_i32_0 : i32, i32
  }
  func.func @transform_19(%arg0: i32) -> (i32, i32, i32) {
    %c0_i32 = arith.constant 0 : i32
    %c0_i32_0 = arith.constant 0 : i32
    %c0_i32_1 = arith.constant 0 : i32
    return %arg0, %c0_i32, %c0_i32_0 : i32, i32, i32
  }
}

</mosaic_0001>

<bundles_post_ra>
// kernel: optical_former_forward.1
= control target key start
LH: loop header
LB: loop body
LE: loop exit
PB: predicated region body
PF: predicated region fallthrough
CT: control target
= control target key end

     0   :  { %s5311_s0 = inlined_call_operand.vmem [shape: f32[2,25,48], index: 0, kind: input, shape index: {}]   ;;  %s5312_s1 = inlined_call_operand.vmem [shape: f32[25,32], index: 1, kind: input, shape index: {}]   ;;  %s5313_s2 = inlined_call_operand.vmem [shape: f32[48,32], index: 2, kind: input, shape index: {}]   ;;  %s5314_s3 = inlined_call_operand.vmem [shape: f32[1,32], index: 3, kind: input, shape index: {}]   ;;  %s5315_s4 = inlined_call_operand.vmem [shape: f32[2,32], index: 4, kind: input, shape index: {}]   ;;  %s5316_s5 = inlined_call_operand.vmem [shape: f32[2,32], index: 5, kind: input, shape index: {}]   ;;  %s5317_s6 = inlined_call_operand.vmem [shape: f32[2,32,96], index: 6, kind: input, shape index: {}]   ;;  %s5318_s7 = inlined_call_operand.vmem [shape: f32[2,32,32], index: 7, kind: input, shape index: {}]   ;;  %s5319_s8 = inlined_call_operand.vmem [shape: f32[2,32], index: 8, kind: input, shape index: {}]   ;;  %s5320_s9 = inlined_call_operand.vmem [shape: f32[2,32], index: 9, kind: input, shape index: {}]   ;;  %s5321_s10 = inlined_call_operand.vmem [shape: f32[2,32], index: 10, kind: input, shape index: {}]   ;;  %s5322_s11 = inlined_call_operand.vmem [shape: f32[2,32,64], index: 11, kind: input, shape index: {}]   ;;  %s5323_s12 = inlined_call_operand.vmem [shape: f32[2,64], index: 12, kind: input, shape index: {}]   ;;  %s5324_s13 = inlined_call_operand.vmem [shape: f32[2,64,32], index: 13, kind: input, shape index: {}]   ;;  %s5325_s14 = inlined_call_operand.vmem [shape: f32[2,32], index: 14, kind: input, shape index: {}]   ;;  %s5326_s15 = inlined_call_operand.vmem [shape: f32[1,32], index: 15, kind: input, shape index: {}]   ;;  %s5327_s16 = inlined_call_operand.vmem [shape: f32[1,32], index: 16, kind: input, shape index: {}]   ;;  %s5328_s17 = inlined_call_operand.vmem [shape: f32[32,10], index: 17, kind: input, shape index: {}]   ;;  %s5329_s18 = inlined_call_operand.vmem [shape: f32[1,10], index: 18, kind: input, shape index: {}]   ;;  %s5330_s19 = inlined_call_operand.hbm [shape: f32[2,1,10], index: 19, kind: output, shape index: {}]  }
   0x1   :  { %5355 = sst [smem:[#allocation12_spill]] %s5311_s0 }
   0x2   :  { %5356 = sst [smem:[#allocation13_spill]] %s5312_s1 }
   0x3   :  { %5357 = sst [smem:[#allocation14_spill]] %s5313_s2 }
   0x4   :  { %5358 = sst [smem:[#allocation15_spill]] %s5314_s3 }
   0x5   :  { %5359 = sst [smem:[#allocation16_spill]] %s5315_s4 }
   0x6   :  { %5360 = sst [smem:[#allocation17_spill]] %s5316_s5 }
   0x7   :  { %5361 = sst [smem:[#allocation18_spill]] %s5329_s18 }
   0x8   :  { %24 = vsyncpa [#allocation3], 0 }
   0x9   :  { %26 = vsyncpa [#allocation3 + $0x1], 0  ;;  %s4163_s0 = smov 0   ;;  %s4165_s30 = smov 0  }
   0xa   :  { %s4167_s20 = smov 0   ;;  %s4169_s21 = smov 0  }
   0xb LB: > { %5362 = sst [smem:[#allocation5_spill]] %s4037_s0  ;;  %s4184_s1 = sadd.s32 4294967295, %s4049_s21   ;;  %s4049_s21 = sphi %s4169_s21, %s5389_s21   ;;  %s4045_s20 = sphi %s4167_s20, %s5391_s20   ;;  %s4041_s30 = sphi %s4165_s30, %s5393_s30   ;;  %s4037_s0 = sphi %s4163_s0, %s5392_s0  }
   0xc   : > { %5363 = sst [smem:[#allocation6_spill]] %s4045_s20  ;;  %s3498_s22 = sadd.s32 4294967294, %s4049_s21  }
   0xd   : > { %5364 = sst [smem:[#allocation7_spill]] %s4049_s21  ;;  %s4188_s2 = sadd.s32 1, %s4049_s21  }
   0xe   : > { %5365 = sst [smem:[#allocation8_spill]] %s4188_s2  ;;  %s443_s23 = sadd.s32 1, %s4045_s20 }
   0xf   : > { %s440_s24 = ssub.s32 %s4049_s21, %s4188_s2  ;;  %p453_p0 = scmp.ne.s32.totalorder %s4045_s20, %s4041_s30 }
  0x10   : > { %p441_p1 = scmp.eq.s32.totalorder %s440_s24, 0  ;;  %p454_p2 = scmp.eq.s32.totalorder %s4184_s1, 1 }
  0x11   : > { %p459_p3 = scmp.ne.s32.totalorder %s4041_s30, %s4037_s0  ;;  %p460_p4 = scmp.eq.s32.totalorder %s3498_s22, 1 }
  0x12   : > { %s4199_s25 = scalar_select %p441_p1, %s4045_s20, %s443_s23  }
  0x13   : > { %p4201_p5 = por %p454_p2, %p453_p0  ;;  %p4205_p6 = por %p460_p4, %p459_p3 }
  0x14   : > { %5366 = sst [smem:[#allocation9_spill]] %s4199_s25  ;;  %p3501_p7 = scmp.ge.s32.totalorder %s4049_s21, 1 }
  0x15   : > { %s5367_s3 = scalar_select %p4201_p5, 1, 0 }
  0x16   : > { %s5369_s26 = scalar_select %p4205_p6, 1, 0 }
  0x17   : > { %5368 = sst [smem:[#allocation10_spill]] %s5367_s3  ;;  %p540_p8 = scmp.lt.s32.totalorder %s4049_s21, 3 }
  0x18   : > { %5370 = sst [smem:[#allocation11_spill]] %s5369_s26 }
  0x19   : > { %p541_p9 = pnand %p3501_p7, %p540_p8 }
  0x1a   : > { %s5371_s29 = sld [smem:[#allocation14_spill]] (!%p541_p9)  ;;  %p595_p10 = scmp.lt.s32.totalorder (!%p541_p9), %s4184_s1, 1 }
  0x1b   : > { %544 = sbr.rel (%p541_p9) target bundleno = 5394 (0x1512), region = 96  ;;  %s5372_s21 = sld [smem:[#allocation12_spill]] (!%p541_p9) }
  0x1c   : > { %s5373_s2 = sld [smem:[#allocation15_spill]] (!%p541_p9)  ;;  %s4052_s25 = smov (!%p541_p9), 96  }
  0x1d   : > { %s5374_s18 = sld [smem:[#allocation13_spill]] (!%p541_p9)  ;;  %s4053_s0 = smov (!%p541_p9), 64  }
  0x1e   : > { %s5375_s4 = sld [smem:[#allocation16_spill]] (!%p541_p9)  ;;  %s5351_s26 = smov (!%p541_p9), 72  }
  0x1f   : > { %s5376_s5 = sld [smem:[#allocation17_spill]] (!%p541_p9)  ;;  %s5347_s24 = smov (!%p541_p9), 104  }
  0x20   : > { %v609_v0 = vld [vmem:[%s5371_s29 + $0x28] sm:$0xff]  ;;  %v608_v1 = vld [vmem:[%s5371_s29 + $0x20] sm:$0xff]  ;;  %v607_v2 = vld [vmem:[%s5371_s29 + $0x18] sm:$0xff]  ;;  %s596_s20 = scalar_select %p595_p10, %s4184_s1, 1  ;;  %vm614_vm0 = vcmask 392192   ;;  %vm666_vm1 = vcmask 261120  }
  0x21   : > { %637 = vmatpush.msra.mxu0 %v609_v0  ;;  %v606_v3 = vld [vmem:[%s5371_s29 + $0x10] sm:$0xff]  ;;  %v605_v4 = vld [vmem:[%s5371_s29 + $0x8] sm:$0xff]  ;;  %v604_v5 = vld [vmem:[%s5371_s29] sm:$0xff]  ;;  %vm676_vm2 = vcmask 253952   ;;  %v4051_v31 = vmov 32.0   ;;  %s5345_s22 = smov 56  }
  0x22   : > { %s3699_s27 = sshll.u32 %s596_s20, 5  ;;  %v3792_v10 = vld [vmem:[%s5373_s2] ss:$0 sm:$0xff]  ;;  %3807 = vrcp.f32 %v4051_v31  ;;  %v776_v58 = vld [vmem:[%s5317_s6 + $0x18] sm:$0xff]  ;;  %v775_v59 = vld [vmem:[%s5317_s6 + $0x10] sm:$0xff]  ;;  %s4054_s20 = smov 120  }
  0x23   : > { %638 = vmatpush.msra.mxu0 %v608_v1  ;;  %s599_s3 = scalar_lea.vmem %s5372_s21, %s3699_s27  ;;  %v656_v12 = vld [vmem:[%s5374_s18] sm:$0xff]  ;;  %v657_v17 = vld [vmem:[%s5374_s18 + $0x8] sm:$0xff]  ;;  %v658_v22 = vld [vmem:[%s5374_s18 + $0x10] sm:$0xff]  ;;  %801 = vmatpush.msra.mxu1 %v776_v58  ;;  %s4055_s2 = smov 88  }
  0x24   : > { %v600_v6 = vld [vmem:[%s599_s3] sm:$0xff]  ;;  %v601_v7 = vld [vmem:[%s599_s3 + $0x8] sm:$0xff]  ;;  %v602_v8 = vld [vmem:[%s599_s3 + $0x10] sm:$0xff]  ;;  %s5353_s21 = smov 80   ;;  %s5343_s23 = smov 48  }
  0x25   : > { %639 = vmatpush.msra.mxu0 %v607_v2  ;;  %v603_v9 = vld [vmem:[%s599_s3 + $0x18] sm:$0x1]  ;;  %802 = vmatpush.msra.mxu1 %v775_v59  ;;  %v774_v60 = vld [vmem:[%s5317_s6 + $0x8] sm:$0xff]  ;;  %v773_v61 = vld [vmem:[%s5317_s6] sm:$0xff]  ;;  %s5349_s3 = smov 112   ;;  %s5341_s27 = smov 40  }
  0x26   : > { %v659_v27 = vld [vmem:[%s5374_s18 + $0x18] sm:$0x1]  ;;  %s5382_s28 = smov 48  }
  0x27   : > { %640 = vmatpush.msra.mxu0 %v606_v3  ;;  %803 = vmatpush.msra.mxu1 %v774_v60 }
  0x28   : > { %v3808_v32 = vpop.eup %3807 }
  0x29   : > { %641 = vmatpush.msra.mxu0 %v605_v4  ;;  %v681_v33 = vmul.f32 32.0, %v3808_v32  ;;  %vm685_vm3 = vweird.f32 %v3808_v32  ;;  %804 = vmatpush.msra.mxu1 %v773_v61 }
  0x2b   : > { %642 = vmatpush.msra.mxu0 %v604_v5  ;;  %v682_v34 = vsub.f32 1.0, %v681_v33 }
  0x2c   : > { %3504 = vmatmul.msk.f32.vlgmr.msra.gmra.mxu0 %vm614_vm0, %v600_v6 }
  0x2d   : > { %v683_v35 = vmul.f32 %v3808_v32, %v682_v34 }
  0x2f   : > { %v684_v36 = vadd.f32 %v3808_v32, %v683_v35 }
  0x31   : > { %v4265_v37 = vsel %vm685_vm3, %v3808_v32, %v684_v36  ;;  %vm888_vm3 = vcmask 203776  }
  0x34   : > { %3505 = vmatmul.msk.f32.gmra.mxu0 %vm614_vm0, %v601_v7 }
  0x3c   : > { %3506 = vmatmul.msk.f32.gmra.mxu0 %vm614_vm0, %v602_v8 }
  0x44   : > { %3507 = vmatmul.msk.f32.gmra.mxu0 %vm614_vm0, %v603_v9  ;;  %vm838_vm0 = vcmask 64512  }
  0xa9   : > { %v644_v11 = vpop.f32.mrf.mxu0 }
  0xaa   : > { %v645_v13 = vadd.f32 %v3792_v10, %v644_v11 }
  0xac   : > { %v4240_v14 = vadd.f32 %v656_v12, %v645_v13 }
  0xae   : > { %v667_v15 = vsel %vm666_vm1, %v4240_v14, 0.0 }
  0xaf   : > { %668 = vadd.xlane.f32.xlu0 %v667_v15 }
  0xb1   : > { %v647_v16 = vpop.f32.mrf.mxu0 }
  0xb2   : > { %v648_v18 = vadd.f32 %v3792_v10, %v647_v16  ;;  %v3793_v16 = vld [vmem:[%s5375_s4] ss:$0 sm:$0xff] }
  0xb4   : > { %v4247_v19 = vadd.f32 %v657_v17, %v648_v18 }
  0xb6   : > { %v670_v20 = vsel %vm666_vm1, %v4247_v19, 0.0 }
  0xb7   : > { %671 = vadd.xlane.f32.xlu0 %v670_v20 }
  0xb9   : > { %v650_v21 = vpop.f32.mrf.mxu0 }
  0xba   : > { %v651_v23 = vadd.f32 %v3792_v10, %v650_v21  ;;  %v3794_v21 = vld [vmem:[%s5376_s5] ss:$0 sm:$0xff] }
  0xbc   : > { %v4254_v24 = vadd.f32 %v658_v22, %v651_v23 }
  0xbe   : > { %v673_v25 = vsel %vm666_vm1, %v4254_v24, 0.0 }
  0xbf   : > { %674 = vadd.xlane.f32.xlu1 %v673_v25 }
  0xc1   : > { %v653_v26 = vpop.f32.mrf.mxu0 }
  0xc2   : > { %v654_v28 = vadd.f32 %v3792_v10, %v653_v26 }
  0xc4   : > { %v4261_v29 = vadd.f32 %v659_v27, %v654_v28 }
  0xc6   : > { %v677_v30 = vsel %vm676_vm2, %v4261_v29, 0.0 }
  0xc7   : > { %678 = vadd.xlane.f32.xlu1 %v677_v30 }
 0x122   : > { %v669_v38 = vpop.xlane.xlu0 %668 }
 0x123   : > { %v687_v39 = vmul.f32 %v4265_v37, %v669_v38 }
 0x125   : > { %v691_v40 = vsub.f32 %v4240_v14, %v687_v39 }
 0x127   : > { %v695_v41 = vmul.f32 %v691_v40, %v691_v40 }
 0x129   : > { %v699_v42 = vsel %vm666_vm1, %v695_v41, 0.0 }
 0x12a   : > { %700 = vadd.xlane.f32.xlu2 %v699_v42  ;;  %v672_v43 = vpop.xlane.xlu0 %671 }
 0x12b   : > { %v688_v44 = vmul.f32 %v4265_v37, %v672_v43 }
 0x12d   : > { %v4272_v45 = vsub.f32 %v4247_v19, %v688_v44 }
 0x12f   : > { %v696_v46 = vmul.f32 %v4272_v45, %v4272_v45 }
 0x131   : > { %v702_v47 = vsel %vm666_vm1, %v696_v46, 0.0 }
 0x132   : > { %v675_v48 = vpop.xlane.xlu1 %674  ;;  %703 = vadd.xlane.f32.xlu2 %v702_v47 }
 0x133   : > { %v689_v49 = vmul.f32 %v4265_v37, %v675_v48 }
 0x135   : > { %v4279_v50 = vsub.f32 %v4254_v24, %v689_v49 }
 0x137   : > { %v697_v51 = vmul.f32 %v4279_v50, %v4279_v50 }
 0x139   : > { %v705_v52 = vsel %vm666_vm1, %v697_v51, 0.0 }
 0x13a   : > { %v679_v53 = vpop.xlane.xlu1 %678  ;;  %706 = vadd.xlane.f32.xlu0 %v705_v52 }
 0x13b   : > { %v690_v54 = vmul.f32 %v4265_v37, %v679_v53 }
 0x13d   : > { %v4286_v55 = vsub.f32 %v4261_v29, %v690_v54 }
 0x13f   : > { %v698_v56 = vmul.f32 %v4286_v55, %v4286_v55 }
 0x141   : > { %v708_v57 = vsel %vm676_vm2, %v698_v56, 0.0 }
 0x142   : > { %709 = vadd.xlane.f32.xlu1 %v708_v57 }
 0x19d   : > { %v701_v62 = vpop.xlane.xlu2 %700 }
 0x19e   : > { %v711_v63 = vmul.f32 %v701_v62, %v4265_v37 }
 0x1a0   : > { %v715_v0 = vadd.f32 1e-05, %v711_v63 }
 0x1a2   : > { %3809 = vrsqrt.f32 %v715_v0  ;;  %vm725_vm5 = vweird.f32 %v715_v0 }
 0x1a5   : > { %v704_v1 = vpop.xlane.xlu2 %703 }
 0x1a6   : > { %v712_v2 = vmul.f32 %v704_v1, %v4265_v37 }
 0x1a8   : > { %v3810_v3 = vpop.eup %3809  ;;  %v716_v4 = vadd.f32 1e-05, %v712_v2 }
 0x1a9   : > { %v720_v5 = vmul.f32 %v3810_v3, %v715_v0  ;;  %vm726_vm4 = vweird.f32 %v3810_v3 }
 0x1aa   : > { %3811 = vrsqrt.f32 %v716_v4  ;;  %vm727_vm6 = vmor %vm725_vm5, %vm726_vm4  ;;  %vm735_vm8 = vweird.f32 %v716_v4  ;;  %vm898_vm4 = vcmask 196608   ;;  %vm957_vm5 = vcmask 1040384  }
 0x1ab   : > { %v721_v6 = vmul.f32 %v3810_v3, %v720_v5 }
 0x1ad   : > { %v722_v7 = vmul.f32 0.5, %v721_v6  ;;  %v707_v8 = vpop.xlane.xlu0 %706 }
 0x1ae   : > { %v713_v9 = vmul.f32 %v707_v8, %v4265_v37 }
 0x1af   : > { %v723_v10 = vsub.f32 1.5, %v722_v7 }
 0x1b0   : > { %v3812_v11 = vpop.eup %3811  ;;  %v717_v12 = vadd.f32 1e-05, %v713_v9 }
 0x1b1   : > { %v724_v13 = vmul.f32 %v3810_v3, %v723_v10  ;;  %v730_v15 = vmul.f32 %v3812_v11, %v716_v4  ;;  %vm736_vm7 = vweird.f32 %v3812_v11 }
 0x1b2   : > { %3813 = vrsqrt.f32 %v717_v12  ;;  %vm737_vm9 = vmor %vm735_vm8, %vm736_vm7  ;;  %vm745_vm11 = vweird.f32 %v717_v12 }
 0x1b3   : > { %v731_v17 = vmul.f32 %v3812_v11, %v730_v15  ;;  %v728_v18 = vsel %vm727_vm6, %v3810_v3, %v724_v13 }
 0x1b4   : > { %v759_v20 = vmul.f32 %v728_v18, %v691_v40 }
 0x1b5   : > { %v732_v22 = vmul.f32 0.5, %v731_v17  ;;  %v710_v23 = vpop.xlane.xlu1 %709 }
 0x1b6   : > { %v714_v25 = vmul.f32 %v710_v23, %v4265_v37  ;;  %v764_v26 = vmul.f32 %v3793_v16, %v759_v20 }
 0x1b7   : > { %v733_v27 = vsub.f32 1.5, %v732_v22 }
 0x1b8   : > { %v3814_v28 = vpop.eup %3813  ;;  %v718_v30 = vadd.f32 1e-05, %v714_v25  ;;  %v769_v31 = vadd.f32 %v3794_v21, %v764_v26 }
 0x1b9   : > { %v734_v32 = vmul.f32 %v3812_v11, %v733_v27  ;;  %v740_v33 = vmul.f32 %v3814_v28, %v717_v12  ;;  %vm746_vm10 = vweird.f32 %v3814_v28 }
 0x1ba   : > { %3815 = vrsqrt.f32 %v718_v30  ;;  %3508 = vmatmul.msk.f32.vlgmr.msra.gmra.mxu1 %vm666_vm1, %v769_v31  ;;  %vm747_vm12 = vmor %vm745_vm11, %vm746_vm10  ;;  %vm755_vm14 = vweird.f32 %v718_v30 }
 0x1bb   : > { %v741_v34 = vmul.f32 %v3814_v28, %v740_v33  ;;  %v738_v35 = vsel %vm737_vm9, %v3812_v11, %v734_v32 }
 0x1bc   : > { %v760_v36 = vmul.f32 %v738_v35, %v4272_v45 }
 0x1bd   : > { %v742_v38 = vmul.f32 0.5, %v741_v34 }
 0x1be   : > { %v765_v39 = vmul.f32 %v3793_v16, %v760_v36 }
 0x1bf   : > { %v743_v40 = vsub.f32 1.5, %v742_v38 }
 0x1c0   : > { %v3816_v41 = vpop.eup %3815  ;;  %v770_v42 = vadd.f32 %v3794_v21, %v765_v39 }
 0x1c1   : > { %v744_v43 = vmul.f32 %v3814_v28, %v743_v40  ;;  %v750_v44 = vmul.f32 %v3816_v41, %v718_v30  ;;  %vm756_vm13 = vweird.f32 %v3816_v41 }
 0x1c2   : > { %3509 = vmatmul.msk.f32.gmra.mxu1 %vm666_vm1, %v770_v42  ;;  %vm757_vm15 = vmor %vm755_vm14, %vm756_vm13 }
 0x1c3   : > { %v751_v46 = vmul.f32 %v3816_v41, %v750_v44  ;;  %v748_v47 = vsel %vm747_vm12, %v3814_v28, %v744_v43 }
 0x1c4   : > { %v761_v48 = vmul.f32 %v748_v47, %v4279_v50 }
 0x1c5   : > { %v752_v49 = vmul.f32 0.5, %v751_v46 }
 0x1c6   : > { %v766_v51 = vmul.f32 %v3793_v16, %v761_v48 }
 0x1c7   : > { %v753_v52 = vsub.f32 1.5, %v752_v49 }
 0x1c8   : > { %v771_v45 = vadd.f32 %v3794_v21, %v766_v51  ;;  %v818_v51 = vld [vmem:[%s5318_s7] sm:$0xff] }
 0x1c9   : > { %v754_v53 = vmul.f32 %v3816_v41, %v753_v52 }
 0x1ca   : > { %3510 = vmatmul.msk.f32.gmra.mxu1 %vm666_vm1, %v771_v45 }
 0x1cb   : > { %v758_v54 = vsel %vm757_vm15, %v3816_v41, %v754_v53 }
 0x1cc   : > { %v762_v56 = vmul.f32 %v758_v54, %v4286_v55 }
 0x1ce   : > { %v767_v57 = vmul.f32 %v3793_v16, %v762_v56 }
 0x1d0   : > { %v772_v58 = vadd.f32 %v3794_v21, %v767_v57 }
 0x1d2   : > { %3511 = vmatmul.msk.f32.gmra.mxu1 %vm666_vm1, %v772_v58 }
 0x237   : > { %v4320_v59 = vpop.f32.mrf.mxu1 }
 0x238   : > { %v4341_v1 = vmul.f32 0.17677669, %v4320_v59 }
 0x23f   : > { %v4322_v50 = vpop.f32.mrf.mxu1 }
 0x240   : > { %832 = vrot.lane.b32.xlu1 %v4322_v50, %s4052_s25  ;;  %v4346_v2 = vmul.f32 0.17677669, %v4322_v50 }
 0x247   : > { %v4326_v60 = vpop.f32.mrf.mxu1 }
 0x248   : > { %834 = vrot.lane.b32.xlu0 %v4326_v60, %s4052_s25  ;;  %v4351_v3 = vmul.f32 0.17677669, %v4326_v60  ;;  %v4368_v13 = vpack.i.bf16 %v4322_v50, %v4326_v60 }
 0x24f   : > { %v4330_v61 = vpop.f32.mrf.mxu1 }
 0x250   : > { %836 = vrot.lane.b32.xlu2 %v4330_v61, %s4052_s25  ;;  %v4356_v4 = vmul.f32 0.17677669, %v4330_v61 }
 0x258   : > { %830 = vrot.lane.b32.xlu2 %v4320_v59, %s4052_s25 }
 0x2aa   : > { %v837_v55 = vpop.permute.xlu2 %836 }
 0x2ab   : > { %3512 = vmatpush.xpose.msk.msra.mxu2 %vm838_vm0, %v837_v55 }
 0x2b2   : > { %v833_v63 = vpop.permute.xlu1 %832  ;;  %v831_v0 = vpop.permute.xlu2 %830 }
 0x2ba   : > { %v835_v62 = vpop.permute.xlu0 %834 }
 0x2bb   : > { %3513 = vmatpush.xpose.msk.msra.mxu2 %vm838_vm0, %v835_v62 }
 0x2bf   : > { %3514 = vmatpush.xpose.msk.msra.mxu2 %vm838_vm0, %v833_v63 }
 0x2c3   : > { %3515 = vmatpush.xpose.msk.msra.mxu2 %vm838_vm0, %v831_v0 }
 0x2c6   : > { %3516 = vmatmul.msk.f32.vlgmr.msra.gmra.mxu2 %vm838_vm0, %v4341_v1 }
 0x2c7   : > { %1216 = vmatpush.msrb.mxu2 %v818_v51 }
 0x2ce   : > { %3517 = vmatmul.msk.f32.gmra.mxu2 %vm838_vm0, %v4346_v2 }
 0x2d6   : > { %3518 = vmatmul.msk.f32.gmra.mxu2 %vm838_vm0, %v4351_v3 }
 0x2de   : > { %3519 = vmatmul.msk.f32.gmra.mxu2 %vm838_vm0, %v4356_v4 }
 0x349   : > { %v876_v5 = vpop.f32.mrf.mxu2 }
 0x34a   : > { %v889_v6 = vsel %vm888_vm3, %v876_v5, -inf }
 0x34b   : > { %890 = vmax.xlane.f32.xlu0 %v889_v6 }
 0x351   : > { %v879_v7 = vpop.f32.mrf.mxu2 }
 0x352   : > { %v892_v8 = vsel %vm888_vm3, %v879_v7, -inf }
 0x353   : > { %893 = vmax.xlane.f32.xlu2 %v892_v8 }
 0x359   : > { %v882_v9 = vpop.f32.mrf.mxu2 }
 0x35a   : > { %v895_v10 = vsel %vm888_vm3, %v882_v9, -inf }
 0x35b   : > { %896 = vmax.xlane.f32.xlu1 %v895_v10 }
 0x361   : > { %v885_v11 = vpop.f32.mrf.mxu2 }
 0x362   : > { %v899_v12 = vsel %vm898_vm4, %v885_v11, -inf }
 0x363   : > { %900 = vmax.xlane.f32.xlu0 %v899_v12 }
 0x374   : > { %940 = vrot.lane.b32.xlu1 %v4330_v61, %s4053_s0 }
 0x377   : > { %3753 = vrot.lane.b32.xlu0 %v4368_v13, %s4053_s0 }
 0x3be   : > { %v891_v15 = vpop.xlane.xlu0 %890 }
 0x3bf   : > { %v902_v16 = vsub.f32 %v876_v5, %v891_v15 }
 0x3c1   : > { %v906_v17 = vmul.f32 1.442695, %v902_v16 }
 0x3c3   : > { %3817 = vpow2.f32 %v906_v17 }
 0x3c6   : > { %v894_v18 = vpop.xlane.xlu2 %893 }
 0x3c7   : > { %v903_v20 = vsub.f32 %v879_v7, %v894_v18 }
 0x3c9   : > { %v4372_v21 = vpop.eup %3817  ;;  %v908_v22 = vmul.f32 1.442695, %v903_v20 }
 0x3ca   : > { %v914_v23 = vsel %vm888_vm3, %v4372_v21, 0.0 }
 0x3cb   : > { %3819 = vpow2.f32 %v908_v22  ;;  %915 = vadd.xlane.f32.xlu2 %v914_v23 }
 0x3ce   : > { %v897_v25 = vpop.xlane.xlu1 %896 }
 0x3cf   : > { %v904_v26 = vsub.f32 %v882_v9, %v897_v25 }
 0x3d1   : > { %v4376_v27 = vpop.eup %3819  ;;  %v910_v28 = vmul.f32 1.442695, %v904_v26 }
 0x3d2   : > { %v917_v30 = vsel %vm888_vm3, %v4376_v27, 0.0 }
 0x3d3   : > { %3821 = vpow2.f32 %v910_v28  ;;  %918 = vadd.xlane.f32.xlu2 %v917_v30 }
 0x3d6   : > { %v901_v31 = vpop.xlane.xlu0 %900 }
 0x3d7   : > { %v905_v32 = vsub.f32 %v885_v11, %v901_v31 }
 0x3d9   : > { %v4380_v33 = vpop.eup %3821  ;;  %v912_v34 = vmul.f32 1.442695, %v905_v32 }
 0x3da   : > { %v920_v35 = vsel %vm888_vm3, %v4380_v33, 0.0 }
 0x3db   : > { %3823 = vpow2.f32 %v912_v34  ;;  %921 = vadd.xlane.f32.xlu0 %v920_v35 }
 0x3e1   : > { %v4384_v36 = vpop.eup %3823 }
 0x3e2   : > { %v923_v38 = vsel %vm898_vm4, %v4384_v36, 0.0 }
 0x3e3   : > { %924 = vadd.xlane.f32.xlu1 %v923_v38 }
 0x3e6   : > { %v941_v39 = vpop.permute.xlu1 %940 }
 0x3e7   : > { %3520 = vmatpush.msk.msra.mxu3 %vm957_vm5, %v941_v39 }
 0x3e9   : > { %v3754_v40 = vpop.permute.xlu0 %3753 }
 0x3ea   : > { %v3755_v41 = vunpack.i.l.bf16 %v3754_v40  ;;  %v3756_v42 = vunpack.i.h.bf16 %v3754_v40 }
 0x3eb   : > { %934 = vrot.lane.b32.xlu2 %v4320_v59, %s4053_s0 }
 0x3ec   : > { %973 = vmatpush.msra.mxu3 %v3755_v41 }
 0x3ee   : > { %974 = vmatpush.msra.mxu3 %v3756_v42 }
 0x3ef   : > { %989 = vrot.lane.b32.xlu0 %v4341_v1, %s4054_s20 }
 0x3f3   : > { %1003 = vrot.lane.b32.xlu2 %v4330_v61, %s4055_s2 }
 0x3f7   : > { %1244 = vrot.lane.b32.xlu0 %v4330_v61, %s5353_s21 }
 0x3fb   : > { %1001 = vrot.lane.b32.xlu2 %v4326_v60, %s4055_s2 }
 0x3fc   : > { %991 = vrot.lane.b32.xlu1 %v4346_v2, %s4054_s20 }
 0x3ff   : > { %1444 = vrot.lane.b32.xlu0 %v4322_v50, %s5351_s26 }
 0x403   : > { %999 = vrot.lane.b32.xlu2 %v4322_v50, %s4055_s2 }
 0x404   : > { %1242 = vrot.lane.b32.xlu1 %v4326_v60, %s5353_s21 }
 0x407   : > { %1442 = vrot.lane.b32.xlu0 %v4320_v59, %s5351_s26 }
 0x40b   : > { %997 = vrot.lane.b32.xlu2 %v4320_v59, %s4055_s2 }
 0x40c   : > { %1240 = vrot.lane.b32.xlu1 %v4322_v50, %s5353_s21 }
 0x40f   : > { %1230 = vrot.lane.b32.xlu0 %v4341_v1, %s5349_s3 }
 0x413   : > { %1448 = vrot.lane.b32.xlu2 %v4330_v61, %s5351_s26 }
 0x414   : > { %1238 = vrot.lane.b32.xlu1 %v4320_v59, %s5353_s21  ;;  %s5383_s21 = smov 40  }
 0x417   : > { %1438 = vrot.lane.b32.xlu0 %v4351_v3, %s5347_s24 }
 0x41b   : > { %993 = vrot.lane.b32.xlu2 %v4351_v3, %s4054_s20 }
 0x41c   : > { %1232 = vrot.lane.b32.xlu1 %v4346_v2, %s5349_s3 }
 0x41f   : > { %1236 = vrot.lane.b32.xlu0 %v4356_v4, %s5349_s3 }
 0x423   : > { %1446 = vrot.lane.b32.xlu2 %v4326_v60, %s5351_s26 }
 0x424   : > { %1440 = vrot.lane.b32.xlu1 %v4356_v4, %s5347_s24 }
 0x42b   : > { %995 = vrot.lane.b32.xlu2 %v4356_v4, %s4054_s20 }
 0x433   : > { %1434 = vrot.lane.b32.xlu2 %v4341_v1, %s5347_s24 }
 0x43b   : > { %1436 = vrot.lane.b32.xlu2 %v4346_v2, %s5347_s24 }
 0x43e   : > { %v916_v43 = vpop.xlane.xlu2 %915 }
 0x43f   : > { %3825 = vrcp.f32 %v916_v43 }
 0x443   : > { %1234 = vrot.lane.b32.xlu2 %v4351_v3, %s5349_s3 }
 0x445   : > { %v3826_v46 = vpop.eup %3825 }
 0x446   : > { %v919_v44 = vpop.xlane.xlu2 %918  ;;  %v930_v48 = vmul.f32 %v3826_v46, %v4372_v21 }
 0x447   : > { %3827 = vrcp.f32 %v919_v44 }
 0x44d   : > { %v3828_v52 = vpop.eup %3827 }
 0x44e   : > { %v935_v47 = vpop.permute.xlu2 %934  ;;  %v922_v49 = vpop.xlane.xlu0 %921  ;;  %v931_v53 = vmul.f32 %v3828_v52, %v4376_v27 }
 0x44f   : > { %975 = vmatpush.msra.mxu3 %v935_v47  ;;  %3829 = vrcp.f32 %v922_v49 }
 0x450   : > { %3521 = vmatmul.msk.f32.vlgmr.msra.gmra.mxu3 %vm888_vm3, %v930_v48 }
 0x455   : > { %v3830_v56 = vpop.eup %3829 }
 0x456   : > { %v1004_v45 = vpop.permute.xlu2 %1003  ;;  %v925_v54 = vpop.xlane.xlu1 %924  ;;  %v932_v58 = vmul.f32 %v3830_v56, %v4380_v33 }
 0x457   : > { %3525 = vmatpush.xpose.msk.msrb.mxu1 %vm838_vm0, %v1004_v45  ;;  %3831 = vrcp.f32 %v925_v54 }
 0x458   : > { %3522 = vmatmul.msk.f32.gmra.mxu3 %vm888_vm3, %v931_v53 }
 0x45d   : > { %v3832_v50 = vpop.eup %3831 }
 0x45e   : > { %v1002_v57 = vpop.permute.xlu2 %1001  ;;  %v933_v62 = vmul.f32 %v3832_v50, %v4384_v36 }
 0x45f   : > { %3526 = vmatpush.xpose.msk.msrb.mxu1 %vm838_vm0, %v1002_v57 }
 0x460   : > { %3523 = vmatmul.msk.f32.gmra.mxu3 %vm888_vm3, %v932_v58 }
 0x461   : > { %v990_v60 = vpop.permute.xlu0 %989 }
 0x466   : > { %v1000_v55 = vpop.permute.xlu2 %999 }
 0x467   : > { %3527 = vmatpush.xpose.msk.msrb.mxu1 %vm838_vm0, %v1000_v55 }
 0x468   : > { %3524 = vmatmul.msk.f32.gmra.mxu3 %vm888_vm3, %v933_v62 }
 0x469   : > { %v1245_v1 = vpop.permute.xlu0 %1244 }
 0x46e   : > { %v998_v63 = vpop.permute.xlu2 %997  ;;  %v992_v0 = vpop.permute.xlu1 %991 }
 0x46f   : > { %3528 = vmatpush.xpose.msk.msrb.mxu1 %vm838_vm0, %v998_v63 }
 0x471   : > { %v1445_v6 = vpop.permute.xlu0 %1444 }
 0x472   : > { %3529 = vmatmul.msk.f32.vlgmr.msrb.gmra.mxu1 %vm838_vm0, %v990_v60 }
 0x473   : > { %3546 = vmatpush.xpose.msk.msra.mxu1 %vm838_vm0, %v1245_v1 }
 0x476   : > { %v1449_v2 = vpop.permute.xlu2 %1448  ;;  %v1243_v3 = vpop.permute.xlu1 %1242 }
 0x477   : > { %3547 = vmatpush.xpose.msk.msra.mxu1 %vm838_vm0, %v1243_v3  ;;  %3563 = vmatpush.xpose.msk.msra.mxu2 %vm838_vm0, %v1449_v2 }
 0x479   : > { %v1443_v9 = vpop.permute.xlu0 %1442 }
 0x47a   : > { %3530 = vmatmul.msk.f32.gmra.mxu1 %vm838_vm0, %v992_v0 }
 0x47e   : > { %v994_v4 = vpop.permute.xlu2 %993  ;;  %v1241_v5 = vpop.permute.xlu1 %1240 }
 0x47f   : > { %3548 = vmatpush.xpose.msk.msra.mxu1 %vm838_vm0, %v1241_v5 }
 0x481   : > { %v1231_v11 = vpop.permute.xlu0 %1230 }
 0x482   : > { %3531 = vmatmul.msk.f32.gmra.mxu1 %vm838_vm0, %v994_v4 }
 0x486   : > { %v1447_v7 = vpop.permute.xlu2 %1446  ;;  %v1239_v8 = vpop.permute.xlu1 %1238 }
 0x487   : > { %3549 = vmatpush.xpose.msk.msra.mxu1 %vm838_vm0, %v1239_v8  ;;  %3564 = vmatpush.xpose.msk.msra.mxu2 %vm838_vm0, %v1447_v7 }
 0x489   : > { %v1439_v17 = vpop.permute.xlu0 %1438 }
 0x48b   : > { %3565 = vmatpush.xpose.msk.msra.mxu2 %vm838_vm0, %v1445_v6 }
 0x48e   : > { %v996_v10 = vpop.permute.xlu2 %995  ;;  %v1233_v15 = vpop.permute.xlu1 %1232 }
 0x48f   : > { %3532 = vmatmul.msk.f32.gmra.mxu1 %vm838_vm0, %v996_v10  ;;  %3566 = vmatpush.xpose.msk.msra.mxu2 %vm838_vm0, %v1443_v9 }
 0x491   : > { %v1237_v20 = vpop.permute.xlu0 %1236 }
 0x496   : > { %v1435_v12 = vpop.permute.xlu2 %1434  ;;  %v1441_v33 = vpop.permute.xlu1 %1440 }
 0x497   : > { %3550 = vmatmul.msk.f32.vlgmr.msra.gmra.mxu1 %vm838_vm0, %v1231_v11 }
 0x49e   : > { %v1437_v16 = vpop.permute.xlu2 %1436 }
 0x49f   : > { %3551 = vmatmul.msk.f32.gmra.mxu1 %vm838_vm0, %v1233_v15 }
 0x4a6   : > { %v1235_v18 = vpop.permute.xlu2 %1234 }
 0x4a7   : > { %3552 = vmatmul.msk.f32.gmra.mxu1 %vm838_vm0, %v1235_v18 }
 0x4af   : > { %3553 = vmatmul.msk.f32.gmra.mxu1 %vm838_vm0, %v1237_v20 }
 0x4d3   : > { %v977_v21 = vpop.f32.mrf.mxu3 }
 0x4d4   : > { %3542 = vmatmul.msk.f32.vlgmr.msrb.gmra.mxu2 %vm838_vm0, %v977_v21 }
 0x4db   : > { %v980_v22 = vpop.f32.mrf.mxu3 }
 0x4dc   : > { %3543 = vmatmul.msk.f32.gmra.mxu2 %vm838_vm0, %v980_v22 }
 0x4e3   : > { %v983_v23 = vpop.f32.mrf.mxu3 }
 0x4e4   : > { %3544 = vmatmul.msk.f32.gmra.mxu2 %vm838_vm0, %v983_v23 }
 0x4eb   : > { %v986_v25 = vpop.f32.mrf.mxu3 }
 0x4ec   : > { %3545 = vmatmul.msk.f32.gmra.mxu2 %vm838_vm0, %v986_v25 }
 0x4ef   : > { %v1038_v26 = vpop.f32.mrf.mxu1 }
 0x4f0   : > { %v1050_v27 = vsel %vm888_vm3, %v1038_v26, -inf }
 0x4f1   : > { %1051 = vmax.xlane.f32.xlu2 %v1050_v27 }
 0x4f4   : > { %3567 = vmatmul.msk.f32.vlgmr.msra.gmra.mxu2 %vm838_vm0, %v1435_v12 }
 0x4f7   : > { %v1041_v28 = vpop.f32.mrf.mxu1 }
 0x4f8   : > { %v1053_v30 = vsel %vm888_vm3, %v1041_v28, -inf }
 0x4f9   : > { %1054 = vmax.xlane.f32.xlu1 %v1053_v30 }
 0x4fc   : > { %3568 = vmatmul.msk.f32.gmra.mxu2 %vm838_vm0, %v1437_v16 }
 0x4ff   : > { %v1044_v31 = vpop.f32.mrf.mxu1 }
 0x500   : > { %v1056_v32 = vsel %vm888_vm3, %v1044_v31, -inf }
 0x501   : > { %1057 = vmax.xlane.f32.xlu0 %v1056_v32 }
 0x504   : > { %3569 = vmatmul.msk.f32.gmra.mxu2 %vm838_vm0, %v1439_v17 }
 0x50c   : > { %v1047_v34 = vpop.f32.mrf.mxu1  ;;  %3570 = vmatmul.msk.f32.gmra.mxu2 %vm838_vm0, %v1441_v33 }
 0x50d   : > { %v1059_v35 = vsel %vm898_vm4, %v1047_v34, -inf }
 0x50e   : > { %1060 = vmax.xlane.f32.xlu2 %v1059_v35 }
 0x514   : > { %v4482_v36 = vpop.f32.mrf.mxu1 }
 0x515   : > { %v1291_v38 = vsel %vm888_vm3, %v4482_v36, -inf }
 0x516   : > { %1292 = vmax.xlane.f32.xlu1 %v1291_v38 }
 0x51c   : > { %v4486_v39 = vpop.f32.mrf.mxu1 }
 0x51d   : > { %v1294_v40 = vsel %vm888_vm3, %v4486_v39, -inf }
 0x51e   : > { %1295 = vmax.xlane.f32.xlu2 %v1294_v40 }
 0x524   : > { %v4490_v41 = vpop.f32.mrf.mxu1 }
 0x525   : > { %v1297_v42 = vsel %vm888_vm3, %v4490_v41, -inf }
 0x526   : > { %1298 = vmax.xlane.f32.xlu0 %v1297_v42 }
 0x52c   : > { %v4494_v43 = vpop.f32.mrf.mxu1 }
 0x52d   : > { %v1300_v44 = vsel %vm898_vm4, %v4494_v43, -inf }
 0x52e   : > { %1301 = vmax.xlane.f32.xlu2 %v1300_v44 }
 0x53a   : > { %1100 = vrot.lane.b32.xlu0 %v4330_v61, %s5345_s22 }
 0x557   : > { %v4500_v46 = vpop.f32.mrf.mxu2 }
 0x55f   : > { %v4502_v47 = vpop.f32.mrf.mxu2 }
 0x564   : > { %v1052_v48 = vpop.xlane.xlu2 %1051 }
 0x565   : > { %v1062_v49 = vsub.f32 %v1038_v26, %v1052_v48 }
 0x567   : > { %v1066_v51 = vmul.f32 1.442695, %v1062_v49  ;;  %v4504_v52 = vpop.f32.mrf.mxu2 }
 0x569   : > { %3833 = vpow2.f32 %v1066_v51 }
 0x56c   : > { %v1055_v45 = vpop.xlane.xlu1 %1054 }
 0x56d   : > { %v1063_v53 = vsub.f32 %v1041_v28, %v1055_v45 }
 0x56f   : > { %v4506_v54 = vpop.eup %3833  ;;  %v1068_v56 = vmul.f32 1.442695, %v1063_v53  ;;  %v4508_v57 = vpop.f32.mrf.mxu2 }
 0x570   : > { %v1074_v58 = vsel %vm888_vm3, %v4506_v54, 0.0 }
 0x571   : > { %3835 = vpow2.f32 %v1068_v56  ;;  %1075 = vadd.xlane.f32.xlu1 %v1074_v58 }
 0x574   : > { %v1058_v50 = vpop.xlane.xlu0 %1057 }
 0x575   : > { %v1064_v60 = vsub.f32 %v1044_v31, %v1058_v50 }
 0x577   : > { %v4512_v55 = vpop.eup %3835  ;;  %v1070_v62 = vmul.f32 1.442695, %v1064_v60  ;;  %v1483_v63 = vpop.f32.mrf.mxu2 }
 0x578   : > { %v1077_v0 = vsel %vm888_vm3, %v4512_v55, 0.0  ;;  %v1495_v1 = vsel %vm888_vm3, %v1483_v63, -inf }
 0x579   : > { %3837 = vpow2.f32 %v1070_v62  ;;  %1078 = vadd.xlane.f32.xlu2 %v1077_v0  ;;  %1496 = vmax.xlane.f32.xlu0 %v1495_v1 }
 0x57f   : > { %v4517_v2 = vpop.eup %3837  ;;  %v1486_v3 = vpop.f32.mrf.mxu2 }
 0x580   : > { %v1080_v4 = vsel %vm888_vm3, %v4517_v2, 0.0  ;;  %v1498_v5 = vsel %vm888_vm3, %v1486_v3, -inf }
 0x581   : > { %1081 = vadd.xlane.f32.xlu2 %v1080_v4  ;;  %1499 = vmax.xlane.f32.xlu1 %v1498_v5  ;;  %v1061_v6 = vpop.xlane.xlu2 %1060 }
 0x582   : > { %v1065_v8 = vsub.f32 %v1047_v34, %v1061_v6 }
 0x584   : > { %v1072_v9 = vmul.f32 1.442695, %v1065_v8 }
 0x586   : > { %3839 = vpow2.f32 %v1072_v9 }
 0x587   : > { %v4551_v26 = vpop.f32.mrf.mxu2 }
 0x588   : > { %v1501_v27 = vsel %vm888_vm3, %v4551_v26, -inf }
 0x589   : > { %v1293_v11 = vpop.xlane.xlu1 %1292 }
 0x58a   : > { %v1303_v12 = vsub.f32 %v4482_v36, %v1293_v11 }
 0x58c   : > { %v4536_v15 = vpop.eup %3839  ;;  %v1307_v16 = vmul.f32 1.442695, %v1303_v12 }
 0x58d   : > { %1094 = vrot.lane.b32.xlu0 %v4320_v59, %s5345_s22  ;;  %v1083_v17 = vsel %vm898_vm4, %v4536_v15, 0.0 }
 0x58e   : > { %3841 = vpow2.f32 %v1307_v16 }
 0x58f   : > { %v4555_v28 = vpop.f32.mrf.mxu2 }
 0x590   : > { %v1504_v30 = vsel %vm898_vm4, %v4555_v28, -inf }
 0x591   : > { %v1296_v18 = vpop.xlane.xlu2 %1295 }
 0x594   : > { %v4541_v21 = vpop.eup %3841 }
 0x595   : > { %v1315_v22 = vsel %vm888_vm3, %v4541_v21, 0.0 }
 0x599   : > { %1341 = vrot.lane.b32.xlu2 %v4330_v61, %s5343_s23  ;;  %v1299_v7 = vpop.xlane.xlu0 %1298 }
 0x59a   : > { %3758 = vrot.lane.b32.xlu1 %v4368_v13, %s5345_s22  ;;  %v1305_v31 = vsub.f32 %v4490_v41, %v1299_v7  ;;  %s5379_s22 = smov 112  }
 0x5a1   : > { %3763 = vrot.lane.b32.xlu2 %v4368_v13, %s5343_s23  ;;  %v1302_v32 = vpop.xlane.xlu2 %1301 }
 0x5a2   : > { %v1306_v9 = vsub.f32 %v4494_v43, %v1302_v32 }
 0x5a4   : > { %v1313_v11 = vmul.f32 1.442695, %v1306_v9 }
 0x5a9   : > { %3768 = vrot.lane.b32.xlu2 %v4368_v13, %s5341_s27  ;;  %v1304_v13 = vsub.f32 %v4486_v39, %v1296_v18 }
 0x5ab   : > { %v1309_v20 = vmul.f32 1.442695, %v1304_v13 }
 0x5ac   : > { %v1101_v10 = vpop.permute.xlu0 %1100 }
 0x5ad   : > { %3533 = vmatpush.msk.msrb.mxu3 %vm957_vm5, %v1101_v10  ;;  %3843 = vpow2.f32 %v1309_v20 }
 0x5b1   : > { %1335 = vrot.lane.b32.xlu2 %v4320_v59, %s5343_s23 }
 0x5b3   : > { %v4545_v23 = vpop.eup %3843 }
 0x5b4   : > { %v1318_v25 = vsel %vm888_vm3, %v4545_v23, 0.0 }
 0x5b7   : > { %1084 = vadd.xlane.f32.xlu0 %v1083_v17 }
 0x5c4   : > { %1316 = vadd.xlane.f32.xlu1 %v1315_v22 }
 0x5cb   : > { %1545 = vrot.lane.b32.xlu0 %v4330_v61, %s5341_s27  ;;  %v1311_v61 = vmul.f32 1.442695, %v1305_v31 }
 0x5cc   : > { %1319 = vadd.xlane.f32.xlu1 %v1318_v25 }
 0x5cd   : > { %3845 = vpow2.f32 %v1311_v61 }
 0x5d3   : > { %v4560_v39 = vpop.eup %3845 }
 0x5d4   : > { %v1321_v44 = vsel %vm888_vm3, %v4560_v39, 0.0 }
 0x5da   : > { %1502 = vmax.xlane.f32.xlu2 %v1501_v27 }
 0x5e2   : > { %1505 = vmax.xlane.f32.xlu2 %v1504_v30 }
 0x5e4   : > { %v1076_v33 = vpop.xlane.xlu1 %1075 }
 0x5ec   : > { %v1079_v34 = vpop.xlane.xlu2 %1078  ;;  %v1497_v35 = vpop.xlane.xlu0 %1496 }
 0x5ed   : > { %v1507_v36 = vsub.f32 %v1483_v63, %v1497_v35 }
 0x5ef   : > { %v1511_v38 = vmul.f32 1.442695, %v1507_v36 }
 0x5f1   : > { %3847 = vpow2.f32 %v1511_v38 }
 0x5f4   : > { %v1082_v40 = vpop.xlane.xlu2 %1081  ;;  %v1500_v42 = vpop.xlane.xlu1 %1499 }
 0x5f5   : > { %v1508_v48 = vsub.f32 %v1486_v3, %v1500_v42  ;;  %1322 = vadd.xlane.f32.xlu0 %v1321_v44 }
 0x5f7   : > { %v4564_v49 = vpop.eup %3847  ;;  %v1513_v41 = vmul.f32 1.442695, %v1508_v48 }
 0x5f8   : > { %v1519_v51 = vsel %vm888_vm3, %v4564_v49, 0.0 }
 0x5f9   : > { %3849 = vpow2.f32 %v1513_v41  ;;  %1520 = vadd.xlane.f32.xlu2 %v1519_v51  ;;  %v819_v51 = vld [vmem:[%s5318_s7 + $0x8] sm:$0xff] }
 0x5fa   : > { %3851 = vrcp.f32 %v1076_v33  ;;  %1175 = vmatpush.msrb.mxu0 %v819_v51 }
 0x5fb   : > { %3853 = vrcp.f32 %v1079_v34 }
 0x5fc   : > { %v1342_v45 = vpop.permute.xlu2 %1341  ;;  %3855 = vrcp.f32 %v1082_v40 }
 0x5ff   : > { %v4568_v53 = vpop.eup %3849  ;;  %v1095_v1 = vpop.permute.xlu0 %1094 }
 0x600   : > { %v1522_v56 = vsel %vm888_vm3, %v4568_v53, 0.0  ;;  %v3852_v62 = vpop.eup %3851 }
 0x601   : > { %1523 = vadd.xlane.f32.xlu1 %v1522_v56  ;;  %v1090_v3 = vmul.f32 %v3852_v62, %v4506_v54  ;;  %v3854_v5 = vpop.eup %3853 }
 0x602   : > { %v1091_v8 = vmul.f32 %v3854_v5, %v4512_v55 }
 0x604   : > { %v3764_v58 = vpop.permute.xlu2 %3763 }
 0x605   : > { %v3765_v4 = vunpack.i.l.bf16 %v3764_v58  ;;  %v3766_v6 = vunpack.i.h.bf16 %v3764_v58  ;;  %v820_v58 = vld [vmem:[%s5318_s7 + $0x10] sm:$0xff] }
 0x606   : > { %1416 = vmatpush.msra.mxu0 %v820_v58 }
 0x60c   : > { %v3759_v50 = vpop.permute.xlu1 %3758  ;;  %v3769_v0 = vpop.permute.xlu2 %3768 }
 0x60d   : > { %v3760_v60 = vunpack.i.l.bf16 %v3759_v50  ;;  %v3761_v63 = vunpack.i.h.bf16 %v3759_v50  ;;  %v3770_v43 = vunpack.i.l.bf16 %v3769_v0  ;;  %v3771_v25 = vunpack.i.h.bf16 %v3769_v0 }
 0x60f   : > { %1132 = vmatpush.msrb.mxu3 %v3760_v60 }
 0x611   : > { %1133 = vmatpush.msrb.mxu3 %v3761_v63  ;;  %1539 = vrot.lane.b32.xlu2 %v4320_v59, %s5341_s27  ;;  %v3856_v59 = vpop.eup %3855  ;;  %s5381_s27 = smov 56  }
 0x612   : > { %v1092_v54 = vmul.f32 %v3856_v59, %v4517_v2 }
 0x613   : > { %1134 = vmatpush.msrb.mxu3 %v1095_v1 }
 0x614   : > { %3534 = vmatmul.msk.f32.vlgmr.msrb.gmra.mxu3 %vm888_vm3, %v1090_v3  ;;  %v1336_v7 = vpop.permute.xlu2 %1335 }
 0x615   : > { %3554 = vmatpush.msk.msra.mxu3 %vm957_vm5, %v1342_v45 }
 0x617   : > { %1373 = vmatpush.msra.mxu3 %v3765_v4  ;;  %v821_v4 = vld [vmem:[%s5318_s7 + $0x18] sm:$0xff] }
 0x619   : > { %1374 = vmatpush.msra.mxu3 %v3766_v6 }
 0x61b   : > { %1375 = vmatpush.msra.mxu3 %v1336_v7 }
 0x61c   : > { %3535 = vmatmul.msk.f32.gmra.mxu3 %vm888_vm3, %v1091_v8 }
 0x61d   : > { %1620 = vmatpush.msrb.mxu3 %v821_v4 }
 0x624   : > { %3536 = vmatmul.msk.f32.gmra.mxu3 %vm888_vm3, %v1092_v54 }
 0x62a   : > { %v1085_v10 = vpop.xlane.xlu0 %1084 }
 0x62b   : > { %3857 = vrcp.f32 %v1085_v10 }
 0x62c   : > { %3859 = vpow2.f32 %v1313_v11 }
 0x631   : > { %v3858_v12 = vpop.eup %3857 }
 0x632   : > { %v1093_v16 = vmul.f32 %v3858_v12, %v4536_v15  ;;  %v4584_v55 = vpop.eup %3859 }
 0x633   : > { %v1324_v2 = vsel %vm898_vm4, %v4584_v55, 0.0 }
 0x634   : > { %3537 = vmatmul.msk.f32.gmra.mxu3 %vm888_vm3, %v1093_v16 }
 0x637   : > { %v1317_v17 = vpop.xlane.xlu1 %1316 }
 0x638   : > { %3861 = vrcp.f32 %v1317_v17 }
 0x63a   : > { %1325 = vadd.xlane.f32.xlu2 %v1324_v2 }
 0x63d   : > { %v1546_v18 = vpop.permute.xlu0 %1545 }
 0x63e   : > { %v3862_v13 = vpop.eup %3861  ;;  %3571 = vmatpush.msk.msrb.mxu1 %vm957_vm5, %v1546_v18 }
 0x63f   : > { %v1331_v20 = vmul.f32 %v3862_v13, %v4541_v21  ;;  %v1320_v22 = vpop.xlane.xlu1 %1319 }
 0x640   : > { %3863 = vrcp.f32 %v1320_v22  ;;  %1577 = vmatpush.msrb.mxu1 %v3770_v43 }
 0x641   : > { %3555 = vmatmul.msk.f32.vlgmr.msra.gmra.mxu3 %vm888_vm3, %v1331_v20 }
 0x642   : > { %1578 = vmatpush.msrb.mxu1 %v3771_v25 }
 0x646   : > { %v3864_v15 = vpop.eup %3863 }
 0x647   : > { %v1332_v27 = vmul.f32 %v3864_v15, %v4545_v23  ;;  %v3795_v15 = vld [vmem:[%s5319_s8] ss:$0 sm:$0xff] }
 0x649   : > { %3556 = vmatmul.msk.f32.gmra.mxu3 %vm888_vm3, %v1332_v27 }
 0x64d   : > { %v1503_v30 = vpop.xlane.xlu2 %1502 }
 0x64e   : > { %v1509_v31 = vsub.f32 %v4551_v26, %v1503_v30 }
 0x650   : > { %v1515_v32 = vmul.f32 1.442695, %v1509_v31 }
 0x652   : > { %3865 = vpow2.f32 %v1515_v32 }
 0x655   : > { %v1506_v61 = vpop.xlane.xlu2 %1505 }
 0x656   : > { %v1510_v21 = vsub.f32 %v4555_v28, %v1506_v61 }
 0x658   : > { %v3866_v33 = vpop.eup %3865  ;;  %v1517_v34 = vmul.f32 1.442695, %v1510_v21 }
 0x659   : > { %v1525_v35 = vsel %vm888_vm3, %v3866_v33, 0.0 }
 0x65a   : > { %3867 = vpow2.f32 %v1517_v34  ;;  %1526 = vadd.xlane.f32.xlu1 %v1525_v35 }
 0x660   : > { %v3868_v36 = vpop.eup %3867 }
 0x661   : > { %v1528_v38 = vsel %vm898_vm4, %v3868_v36, 0.0 }
 0x662   : > { %1529 = vadd.xlane.f32.xlu1 %v1528_v38 }
 0x668   : > { %v1323_v23 = vpop.xlane.xlu0 %1322 }
 0x669   : > { %3869 = vrcp.f32 %v1323_v23 }
 0x66c   : > { %v1521_v40 = vpop.xlane.xlu2 %1520 }
 0x66d   : > { %3871 = vrcp.f32 %v1521_v40 }
 0x66f   : > { %v3870_v26 = vpop.eup %3869 }
 0x670   : > { %v1333_v42 = vmul.f32 %v3870_v26, %v4560_v39 }
 0x672   : > { %3557 = vmatmul.msk.f32.gmra.mxu3 %vm888_vm3, %v1333_v42 }
 0x673   : > { %v3872_v28 = vpop.eup %3871 }
 0x674   : > { %v1535_v44 = vmul.f32 %v3872_v28, %v4564_v49  ;;  %v1524_v48 = vpop.xlane.xlu1 %1523  ;;  %v1540_v41 = vpop.permute.xlu2 %1539 }
 0x675   : > { %3873 = vrcp.f32 %v1524_v48  ;;  %1579 = vmatpush.msrb.mxu1 %v1540_v41 }
 0x676   : > { %3572 = vmatmul.msk.f32.vlgmr.msrb.gmra.mxu1 %vm888_vm3, %v1535_v44 }
 0x67b   : > { %v3874_v45 = vpop.eup %3873 }
 0x67c   : > { %v1536_v56 = vmul.f32 %v3874_v45, %v4568_v53 }
 0x67e   : > { %3573 = vmatmul.msk.f32.gmra.mxu1 %vm888_vm3, %v1536_v56 }
 0x697   : > { %v1136_v39 = vpop.f32.mrf.mxu3 }
 0x698   : > { %3538 = vmatmul.msk.f32.vlgmr.msrb.gmra.mxu0 %vm838_vm0, %v1136_v39 }
 0x69f   : > { %v1139_v49 = vpop.f32.mrf.mxu3 }
 0x6a0   : > { %3539 = vmatmul.msk.f32.gmra.mxu0 %vm838_vm0, %v1139_v49 }
 0x6a7   : > { %v1142_v50 = vpop.f32.mrf.mxu3 }
 0x6a8   : > { %3540 = vmatmul.msk.f32.gmra.mxu0 %vm838_vm0, %v1142_v50 }
 0x6ad   : > { %v1326_v60 = vpop.xlane.xlu2 %1325 }
 0x6ae   : > { %3875 = vrcp.f32 %v1326_v60 }
 0x6b4   : > { %v3876_v62 = vpop.eup %3875 }
 0x6b5   : > { %v1334_v53 = vmul.f32 %v3876_v62, %v4584_v55 }
 0x6b7   : > { %v1145_v63 = vpop.f32.mrf.mxu3  ;;  %3558 = vmatmul.msk.f32.gmra.mxu3 %vm888_vm3, %v1334_v53 }
 0x6b8   : > { %3541 = vmatmul.msk.f32.gmra.mxu0 %vm838_vm0, %v1145_v63 }
 0x6c4   : > { %v1377_v0 = vpop.f32.mrf.mxu3 }
 0x6c5   : > { %3559 = vmatmul.msk.f32.vlgmr.msra.gmra.mxu0 %vm838_vm0, %v1377_v0 }
 0x6cc   : > { %v1380_v1 = vpop.f32.mrf.mxu3 }
 0x6cd   : > { %3560 = vmatmul.msk.f32.gmra.mxu0 %vm838_vm0, %v1380_v1  ;;  %v1527_v3 = vpop.xlane.xlu1 %1526 }
 0x6ce   : > { %3877 = vrcp.f32 %v1527_v3 }
 0x6d4   : > { %v3878_v5 = vpop.eup %3877 }
 0x6d5   : > { %v1530_v6 = vpop.xlane.xlu1 %1529  ;;  %v1537_v7 = vmul.f32 %v3878_v5, %v3866_v33 }
 0x6d6   : > { %3879 = vrcp.f32 %v1530_v6 }
 0x6d7   : > { %3574 = vmatmul.msk.f32.gmra.mxu1 %vm888_vm3, %v1537_v7 }
 0x6dc   : > { %v3880_v8 = vpop.eup %3879 }
 0x6dd   : > { %v1538_v59 = vmul.f32 %v3880_v8, %v3868_v36 }
 0x6df   : > { %3575 = vmatmul.msk.f32.gmra.mxu1 %vm888_vm3, %v1538_v59 }
 0x6f3   : > { %v1581_v54 = vpop.f32.mrf.mxu1 }
 0x6f4   : > { %3576 = vmatmul.msk.f32.vlgmr.msrb.gmra.mxu3 %vm838_vm0, %v1581_v54  ;;  %v1751_v54 = vld [vmem:[%s5322_s11 + $0x18] sm:$0xff] }
 0x6f5   : > { %v1383_v9 = vpop.f32.mrf.mxu3  ;;  %1778 = vmatpush.msrb.mxu0 %v1751_v54 }
 0x6f6   : > { %3561 = vmatmul.msk.f32.gmra.mxu0 %vm838_vm0, %v1383_v9  ;;  %v1750_v9 = vld [vmem:[%s5322_s11 + $0x10] sm:$0xff] }
 0x6f7   : > { %1779 = vmatpush.msrb.mxu0 %v1750_v9 }
 0x6fb   : > { %v1584_v10 = vpop.f32.mrf.mxu1 }
 0x6fc   : > { %3577 = vmatmul.msk.f32.gmra.mxu3 %vm838_vm0, %v1584_v10  ;;  %v1749_v10 = vld [vmem:[%s5322_s11 + $0x8] sm:$0xff] }
 0x6fd   : > { %1780 = vmatpush.msrb.mxu0 %v1749_v10 }
 0x715   : > { %v1177_v12 = vpop.f32.mrf.mxu0 }
 0x716   : > { %v1219_v43 = vadd.f32 %v4500_v46, %v1177_v12 }
 0x71d   : > { %v1180_v55 = vpop.f32.mrf.mxu0 }
 0x71e   : > { %v1222_v31 = vadd.f32 %v4502_v47, %v1180_v55 }
 0x725   : > { %v1183_v2 = vpop.f32.mrf.mxu0 }
 0x726   : > { %v1225_v47 = vadd.f32 %v4504_v52, %v1183_v2 }
 0x735   : > { %v1186_v18 = vpop.f32.mrf.mxu0 }
 0x736   : > { %v1228_v28 = vadd.f32 %v4508_v57, %v1186_v18 }
 0x73a   : > { %v1386_v11 = vpop.f32.mrf.mxu3 }
 0x73b   : > { %3562 = vmatmul.msk.f32.gmra.mxu0 %vm838_vm0, %v1386_v11  ;;  %v1748_v11 = vld [vmem:[%s5322_s11] sm:$0xff] }
 0x73c   : > { %1781 = vmatpush.msrb.mxu0 %v1748_v11 }
 0x742   : > { %v1418_v13 = vpop.f32.mrf.mxu0 }
 0x743   : > { %v1430_v20 = vadd.f32 %v1418_v13, %v1219_v43 }
 0x74a   : > { %v1421_v30 = vpop.f32.mrf.mxu0 }
 0x74b   : > { %v1431_v61 = vadd.f32 %v1421_v30, %v1222_v31  ;;  %v3796_v31 = vld [vmem:[%s5320_s9] ss:$0 sm:$0xff] }
 0x754   : > { %v1587_v16 = vpop.f32.mrf.mxu1 }
 0x755   : > { %3578 = vmatmul.msk.f32.gmra.mxu3 %vm838_vm0, %v1587_v16 }
 0x75c   : > { %v1590_v17 = vpop.f32.mrf.mxu1 }
 0x75d   : > { %3579 = vmatmul.msk.f32.gmra.mxu3 %vm838_vm0, %v1590_v17 }
 0x777   : > { %v1622_v22 = vpop.f32.mrf.mxu3 }
 0x778   : > { %v1634_v25 = vadd.f32 %v1622_v22, %v1430_v20 }
 0x77a   : > { %v1638_v27 = vadd.f32 %v1634_v25, %v4240_v14  ;;  %v1424_v14 = vpop.f32.mrf.mxu0 }
 0x77b   : > { %v1432_v38 = vadd.f32 %v1424_v14, %v1225_v47 }
 0x77c   : > { %v4634_v32 = vadd.f32 %v3795_v15, %v1638_v27 }
 0x77e   : > { %v1650_v21 = vsel %vm666_vm1, %v4634_v32, 0.0 }
 0x77f   : > { %1651 = vadd.xlane.f32.xlu1 %v1650_v21  ;;  %v1625_v46 = vpop.f32.mrf.mxu3 }
 0x780   : > { %v1635_v33 = vadd.f32 %v1625_v46, %v1431_v61 }
 0x782   : > { %v1639_v34 = vadd.f32 %v1635_v33, %v4247_v19  ;;  %v3797_v33 = vld [vmem:[%s5321_s10] ss:$0 sm:$0xff] }
 0x784   : > { %v4639_v35 = vadd.f32 %v3795_v15, %v1639_v34 }
 0x786   : > { %v1653_v36 = vsel %vm666_vm1, %v4639_v35, 0.0 }
 0x787   : > { %1654 = vadd.xlane.f32.xlu1 %v1653_v36 }
 0x7b8   : > { %v1427_v42 = vpop.f32.mrf.mxu0 }
 0x7b9   : > { %v1433_v19 = vadd.f32 %v1427_v42, %v1228_v28 }
 0x7d8   : > { %v1628_v23 = vpop.f32.mrf.mxu3 }
 0x7d9   : > { %v1636_v40 = vadd.f32 %v1628_v23, %v1432_v38 }
 0x7db   : > { %v1640_v26 = vadd.f32 %v1636_v40, %v4254_v24 }
 0x7dd   : > { %v4646_v44 = vadd.f32 %v3795_v15, %v1640_v26 }
 0x7df   : > { %v1656_v48 = vsel %vm666_vm1, %v4646_v44, 0.0 }
 0x7e0   : > { %1657 = vadd.xlane.f32.xlu1 %v1656_v48  ;;  %v1631_v41 = vpop.f32.mrf.mxu3 }
 0x7e1   : > { %v1637_v51 = vadd.f32 %v1631_v41, %v1433_v19 }
 0x7e3   : > { %v1641_v45 = vadd.f32 %v1637_v51, %v4261_v29 }
 0x7e5   : > { %v4651_v52 = vadd.f32 %v3795_v15, %v1641_v45 }
 0x7e7   : > { %v1659_v56 = vsel %vm676_vm2, %v4651_v52, 0.0 }
 0x7e8   : > { %1660 = vadd.xlane.f32.xlu1 %v1659_v56 }
 0x7f2   : > { %v1652_v24 = vpop.xlane.xlu1 %1651 }
 0x7f3   : > { %v1662_v57 = vmul.f32 %v1652_v24, %v4265_v37 }
 0x7f5   : > { %v1666_v39 = vsub.f32 %v4634_v32, %v1662_v57 }
 0x7f7   : > { %v1670_v49 = vmul.f32 %v1666_v39, %v1666_v39 }
 0x7f9   : > { %v1674_v58 = vsel %vm666_vm1, %v1670_v49, 0.0 }
 0x7fa   : > { %1675 = vadd.xlane.f32.xlu0 %v1674_v58  ;;  %v1655_v50 = vpop.xlane.xlu1 %1654 }
 0x7fb   : > { %v1663_v60 = vmul.f32 %v1655_v50, %v4265_v37 }
 0x7fd   : > { %v1667_v29 = vsub.f32 %v4639_v35, %v1663_v60 }
 0x7ff   : > { %v1671_v62 = vmul.f32 %v1667_v29, %v1667_v29 }
 0x801   : > { %v1677_v53 = vsel %vm666_vm1, %v1671_v62, 0.0 }
 0x802   : > { %1678 = vadd.xlane.f32.xlu2 %v1677_v53 }
 0x853   : > { %v1658_v63 = vpop.xlane.xlu1 %1657 }
 0x854   : > { %v1664_v0 = vmul.f32 %v1658_v63, %v4265_v37 }
 0x856   : > { %v4663_v1 = vsub.f32 %v4646_v44, %v1664_v0 }
 0x858   : > { %v1672_v3 = vmul.f32 %v4663_v1, %v4663_v1 }
 0x85a   : > { %v1680_v4 = vsel %vm666_vm1, %v1672_v3, 0.0 }
 0x85b   : > { %1681 = vadd.xlane.f32.xlu1 %v1680_v4  ;;  %v1661_v5 = vpop.xlane.xlu1 %1660 }
 0x85c   : > { %v1665_v6 = vmul.f32 %v1661_v5, %v4265_v37 }
 0x85e   : > { %v4670_v7 = vsub.f32 %v4651_v52, %v1665_v6 }
 0x860   : > { %v1673_v8 = vmul.f32 %v4670_v7, %v4670_v7 }
 0x862   : > { %v1683_v59 = vsel %vm676_vm2, %v1673_v8, 0.0 }
 0x863   : > { %1684 = vadd.xlane.f32.xlu0 %v1683_v59 }
 0x86d   : > { %v1676_v12 = vpop.xlane.xlu0 %1675 }
 0x86e   : > { %v1686_v16 = vmul.f32 %v1676_v12, %v4265_v37 }
 0x870   : > { %v1690_v55 = vadd.f32 1e-05, %v1686_v16 }
 0x872   : > { %3881 = vrsqrt.f32 %v1690_v55  ;;  %vm1700_vm7 = vweird.f32 %v1690_v55 }
 0x875   : > { %v1679_v17 = vpop.xlane.xlu2 %1678 }
 0x876   : > { %v1687_v2 = vmul.f32 %v1679_v17, %v4265_v37 }
 0x878   : > { %v3882_v18 = vpop.eup %3881  ;;  %v1691_v13 = vadd.f32 1e-05, %v1687_v2 }
 0x879   : > { %v1695_v43 = vmul.f32 %v3882_v18, %v1690_v55  ;;  %vm1701_vm6 = vweird.f32 %v3882_v18  ;;  %v1978_v55 = vld [vmem:[%s5324_s13 + $0x38] sm:$0xff] }
 0x87a   : > { %3883 = vrsqrt.f32 %v1691_v13  ;;  %vm1702_vm8 = vmor %vm1700_vm7, %vm1701_vm6  ;;  %vm1710_vm10 = vweird.f32 %v1691_v13  ;;  %2002 = vmatpush.msrb.mxu2 %v1978_v55 }
 0x87b   : > { %v1696_v20 = vmul.f32 %v3882_v18, %v1695_v43 }
 0x87d   : > { %v1697_v22 = vmul.f32 0.5, %v1696_v20 }
 0x87f   : > { %v1698_v25 = vsub.f32 1.5, %v1697_v22 }
 0x880   : > { %v3884_v15 = vpop.eup %3883 }
 0x881   : > { %v1699_v27 = vmul.f32 %v3882_v18, %v1698_v25  ;;  %v1705_v30 = vmul.f32 %v3884_v15, %v1691_v13  ;;  %vm1711_vm9 = vweird.f32 %v3884_v15  ;;  %v1977_v13 = vld [vmem:[%s5324_s13 + $0x30] sm:$0xff]  ;;  %v1976_v25 = vld [vmem:[%s5324_s13 + $0x28] sm:$0xff] }
 0x882   : > { %vm1712_vm11 = vmor %vm1710_vm10, %vm1711_vm9  ;;  %2003 = vmatpush.msrb.mxu2 %v1977_v13 }
 0x883   : > { %v1703_v61 = vsel %vm1702_vm8, %v3882_v18, %v1699_v27  ;;  %v1706_v21 = vmul.f32 %v3884_v15, %v1705_v30 }
 0x884   : > { %v1734_v46 = vmul.f32 %v1703_v61, %v1666_v39  ;;  %2004 = vmatpush.msrb.mxu2 %v1976_v25 }
 0x885   : > { %v1707_v34 = vmul.f32 0.5, %v1706_v21 }
 0x886   : > { %v1739_v36 = vmul.f32 %v3796_v31, %v1734_v46 }
 0x887   : > { %v1708_v14 = vsub.f32 1.5, %v1707_v34 }
 0x888   : > { %v1744_v47 = vadd.f32 %v3797_v33, %v1739_v36 }
 0x889   : > { %v1709_v38 = vmul.f32 %v3884_v15, %v1708_v14 }
 0x88a   : > { %3580 = vmatmul.msk.f32.vlgmr.msrb.gmra.mxu0 %vm666_vm1, %v1744_v47  ;;  %v1973_v47 = vld [vmem:[%s5324_s13 + $0x10] sm:$0xff] }
 0x88b   : > { %v1713_v23 = vsel %vm1712_vm11, %v3884_v15, %v1709_v38 }
 0x88c   : > { %v1735_v40 = vmul.f32 %v1713_v23, %v1667_v29 }
 0x88e   : > { %v1740_v26 = vmul.f32 %v3796_v31, %v1735_v40 }
 0x890   : > { %v1745_v42 = vadd.f32 %v3797_v33, %v1740_v26 }
 0x892   : > { %3581 = vmatmul.msk.f32.gmra.mxu0 %vm666_vm1, %v1745_v42  ;;  %v1972_v42 = vld [vmem:[%s5324_s13 + $0x8] sm:$0xff] }
 0x8ce   : > { %v1682_v28 = vpop.xlane.xlu1 %1681 }
 0x8cf   : > { %v1688_v19 = vmul.f32 %v1682_v28, %v4265_v37 }
 0x8d1   : > { %v1692_v48 = vadd.f32 1e-05, %v1688_v19 }
 0x8d3   : > { %3885 = vrsqrt.f32 %v1692_v48  ;;  %vm1720_vm13 = vweird.f32 %v1692_v48 }
 0x8d6   : > { %v1685_v41 = vpop.xlane.xlu0 %1684 }
 0x8d7   : > { %v1689_v51 = vmul.f32 %v1685_v41, %v4265_v37  ;;  %v1971_v41 = vld [vmem:[%s5324_s13] sm:$0xff] }
 0x8d9   : > { %v3886_v45 = vpop.eup %3885  ;;  %v1693_v56 = vadd.f32 1e-05, %v1689_v51 }
 0x8da   : > { %v1715_v24 = vmul.f32 %v3886_v45, %v1692_v48  ;;  %vm1721_vm12 = vweird.f32 %v3886_v45 }
 0x8db   : > { %3887 = vrsqrt.f32 %v1693_v56  ;;  %vm1722_vm14 = vmor %vm1720_vm13, %vm1721_vm12  ;;  %vm1730_vm6 = vweird.f32 %v1693_v56 }
 0x8dc   : > { %v1716_v57 = vmul.f32 %v3886_v45, %v1715_v24 }
 0x8de   : > { %v1717_v39 = vmul.f32 0.5, %v1716_v57 }
 0x8e0   : > { %v1718_v49 = vsub.f32 1.5, %v1717_v39 }
 0x8e1   : > { %v3888_v58 = vpop.eup %3887 }
 0x8e2   : > { %v1719_v50 = vmul.f32 %v3886_v45, %v1718_v49  ;;  %v1725_v60 = vmul.f32 %v3888_v58, %v1693_v56  ;;  %vm1731_vm15 = vweird.f32 %v3888_v58 }
 0x8e3   : > { %vm1732_vm7 = vmor %vm1730_vm6, %vm1731_vm15 }
 0x8e4   : > { %v1723_v29 = vsel %vm1722_vm14, %v3886_v45, %v1719_v50  ;;  %v1726_v62 = vmul.f32 %v3888_v58, %v1725_v60  ;;  %vm1981_vm14 = vcmask 523264  }
 0x8e5   : > { %v1736_v53 = vmul.f32 %v1723_v29, %v4663_v1  ;;  %v4706_v1 = vld [vmem:[%s5323_s12] ss:$0 sm:$0xff] }
 0x8e6   : > { %v1727_v63 = vmul.f32 0.5, %v1726_v62 }
 0x8e7   : > { %v1741_v0 = vmul.f32 %v3796_v31, %v1736_v53 }
 0x8e8   : > { %v1728_v3 = vsub.f32 1.5, %v1727_v63 }
 0x8e9   : > { %v1746_v4 = vadd.f32 %v3797_v33, %v1741_v0 }
 0x8ea   : > { %v1729_v5 = vmul.f32 %v3888_v58, %v1728_v3 }
 0x8eb   : > { %3582 = vmatmul.msk.f32.gmra.mxu0 %vm666_vm1, %v1746_v4 }
 0x8ec   : > { %v1733_v6 = vsel %vm1732_vm7, %v3888_v58, %v1729_v5 }
 0x8ed   : > { %v1737_v8 = vmul.f32 %v1733_v6, %v4670_v7 }
 0x8ef   : > { %v1742_v59 = vmul.f32 %v3796_v31, %v1737_v8  ;;  %v1975_v31 = vld [vmem:[%s5324_s13 + $0x20] sm:$0xff] }
 0x8f0   : > { %2005 = vmatpush.msrb.mxu2 %v1975_v31 }
 0x8f1   : > { %v1747_v54 = vadd.f32 %v3797_v33, %v1742_v59  ;;  %v1974_v33 = vld [vmem:[%s5324_s13 + $0x18] sm:$0xff] }
 0x8f2   : > { %2006 = vmatpush.msrb.mxu2 %v1974_v33 }
 0x8f3   : > { %3583 = vmatmul.msk.f32.gmra.mxu0 %vm666_vm1, %v1747_v54 }
 0x8f4   : > { %2007 = vmatpush.msrb.mxu2 %v1973_v47 }
 0x8f6   : > { %2008 = vmatpush.msrb.mxu2 %v1972_v42 }
 0x8f8   : > { %2009 = vmatpush.msrb.mxu2 %v1971_v41 }
 0x907   : > { %v1783_v9 = vpop.f32.mrf.mxu0 }
 0x908   : > { %v4709_v10 = vadd.f32 %v4706_v1, %v1783_v9 }
 0x90a   : > { %v4712_v11 = vmul.f32 0.70710677, %v4709_v10 }
 0x90c   : > { %v1803_v12 = vmul.f32 %v4712_v11, %v4712_v11 }
 0x90e   : > { %v1804_v7 = vmin.f32 %v1803_v12, 16.0 }
 0x90f   : > { %v1786_v16 = vpop.f32.mrf.mxu0 }
 0x910   : > { %v1805_v17 = vmul.f32 2.1237322e-06, %v1804_v7  ;;  %v1816_v2 = vmul.f32 3.8918573e-05, %v1804_v7  ;;  %v4720_v18 = vadd.f32 %v4706_v1, %v1786_v16 }
 0x912   : > { %v1806_v43 = vadd.f32 0.00028619796, %v1805_v17  ;;  %v1817_v20 = vadd.f32 0.001143296, %v1816_v2  ;;  %v4726_v22 = vmul.f32 0.70710677, %v4720_v18 }
 0x914   : > { %v1807_v15 = vmul.f32 %v1806_v43, %v1804_v7  ;;  %v1818_v27 = vmul.f32 %v1817_v20, %v1804_v7  ;;  %v1843_v30 = vmul.f32 %v4726_v22, %v4726_v22 }
 0x916   : > { %v1819_v61 = vadd.f32 0.014752088, %v1818_v27  ;;  %v1808_v21 = vadd.f32 0.0036580483, %v1807_v15  ;;  %v1844_v46 = vmin.f32 %v1843_v30, 16.0 }
 0x918   : > { %v1820_v34 = vmul.f32 %v1819_v61, %v1804_v7  ;;  %v1845_v36 = vmul.f32 2.1237322e-06, %v1844_v46  ;;  %v1856_v14 = vmul.f32 3.8918573e-05, %v1844_v46  ;;  %v1809_v23 = vmul.f32 %v1808_v21, %v1804_v7 }
 0x91a   : > { %v1821_v38 = vadd.f32 0.112945676, %v1820_v34  ;;  %v1846_v40 = vadd.f32 0.00028619796, %v1845_v36  ;;  %v1857_v26 = vadd.f32 0.001143296, %v1856_v14 }
 0x91b   : > { %v1810_v45 = vadd.f32 0.05243302, %v1809_v23  ;;  %v1795_v36 = vmul.f32 0.5, %v4709_v10 }
 0x91c   : > { %v1822_v28 = vmul.f32 %v1821_v38, %v1804_v7  ;;  %v1847_v19 = vmul.f32 %v1846_v40, %v1844_v46  ;;  %v1858_v48 = vmul.f32 %v1857_v26, %v1844_v46 }
 0x91d   : > { %v1811_v58 = vmul.f32 %v1810_v45, %v1804_v7 }
 0x91e   : > { %v1823_v51 = vadd.f32 0.4994258, %v1822_v28  ;;  %v1859_v56 = vadd.f32 0.014752088, %v1858_v48  ;;  %v1848_v57 = vadd.f32 0.0036580483, %v1847_v19 }
 0x91f   : > { %v1812_v62 = vadd.f32 0.18741608, %v1811_v58  ;;  %v1796_v28 = vmul.f32 0.5, %v4720_v18 }
 0x920   : > { %v1824_v24 = vmul.f32 %v1823_v51, %v1804_v7  ;;  %v1860_v39 = vmul.f32 %v1859_v56, %v1844_v46  ;;  %v1849_v60 = vmul.f32 %v1848_v57, %v1844_v46 }
 0x921   : > { %v1813_v4 = vmul.f32 %v1812_v62, %v1804_v7 }
 0x922   : > { %v1825_v49 = vadd.f32 1.0, %v1824_v24  ;;  %v1861_v50 = vadd.f32 0.112945676, %v1860_v39  ;;  %v1850_v63 = vadd.f32 0.05243302, %v1849_v60 }
 0x923   : > { %v1814_v9 = vadd.f32 1.1283791, %v1813_v4 }
 0x924   : > { %3889 = vrcp.f32 %v1825_v49  ;;  %v1862_v29 = vmul.f32 %v1861_v50, %v1844_v46  ;;  %v1851_v8 = vmul.f32 %v1850_v63, %v1844_v46  ;;  %v1837_v54 = vand.u32 2147483648, %v1825_v49 }
 0x925   : > { %v1835_v16 = vand.u32 2147483647, %v1825_v49  ;;  %vm1831_vm9 = vweird.f32 %v1825_v49  ;;  %v1815_v43 = vmul.f32 %v1814_v9, %v4712_v11 }
 0x926   : > { %v1863_v53 = vadd.f32 0.4994258, %v1862_v29  ;;  %v1852_v55 = vadd.f32 0.18741608, %v1851_v8  ;;  %v1838_v2 = vor.u32 1.1754944e-38, %v1837_v54 }
 0x927   : > { %vm1836_vm11 = vcmp.eq.f32.partialorder %v1835_v16, 8.507059e+37 }
 0x928   : > { %v1864_v0 = vmul.f32 %v1863_v53, %v1844_v46  ;;  %v1853_v25 = vmul.f32 %v1852_v55, %v1844_v46 }
 0x92a   : > { %v3890_v3 = vpop.eup %3889  ;;  %v1865_v6 = vadd.f32 1.0, %v1864_v0  ;;  %v1854_v21 = vadd.f32 1.1283791, %v1853_v25 }
 0x92b   : > { %v1827_v5 = vmul.f32 %v3890_v3, %v1825_v49  ;;  %vm1832_vm8 = vweird.f32 %v3890_v3 }
 0x92c   : > { %3891 = vrcp.f32 %v1865_v6  ;;  %vm1833_vm10 = vmor %vm1831_vm9, %vm1832_vm8  ;;  %v1877_v61 = vand.u32 2147483648, %v1865_v6  ;;  %v1875_v34 = vand.u32 2147483647, %v1865_v6  ;;  %vm1871_vm13 = vweird.f32 %v1865_v6 }
 0x92d   : > { %v1828_v59 = vsub.f32 1.0, %v1827_v5  ;;  %v1855_v46 = vmul.f32 %v1854_v21, %v4726_v22 }
 0x92e   : > { %v1878_v38 = vor.u32 1.1754944e-38, %v1877_v61  ;;  %vm1876_vm6 = vcmp.eq.f32.partialorder %v1875_v34, 8.507059e+37 }
 0x92f   : > { %v1829_v12 = vmul.f32 %v3890_v3, %v1828_v59 }
 0x931   : > { %v1830_v17 = vadd.f32 %v3890_v3, %v1829_v12 }
 0x932   : > { %v3892_v13 = vpop.eup %3891 }
 0x933   : > { %v1834_v20 = vsel %vm1833_vm10, %v3890_v3, %v1830_v17  ;;  %v1867_v15 = vmul.f32 %v3892_v13, %v1865_v6  ;;  %vm1872_vm12 = vweird.f32 %v3892_v13 }
 0x934   : > { %v1839_v7 = vsel %vm1836_vm11, %v1838_v2, %v1834_v20  ;;  %vm1873_vm15 = vmor %vm1871_vm13, %vm1872_vm12 }
 0x935   : > { %v1840_v27 = vmul.f32 %v1839_v7, %v1815_v43  ;;  %v1868_v30 = vsub.f32 1.0, %v1867_v15 }
 0x937   : > { %v3584_v31 = vclamps-f32 %v1840_v27, 1.0  ;;  %v1869_v33 = vmul.f32 %v3892_v13, %v1868_v30 }
 0x939   : > { %v1963_v14 = vadd.f32 1.0, %v3584_v31  ;;  %v1870_v47 = vadd.f32 %v3892_v13, %v1869_v33 }
 0x93b   : > { %v1967_v11 = vmul.f32 %v1963_v14, %v1795_v36  ;;  %v1874_v23 = vsel %vm1873_vm15, %v3892_v13, %v1870_v47 }
 0x93c   : > { %v1879_v40 = vsel %vm1876_vm6, %v1878_v38, %v1874_v23 }
 0x93d   : > { %3588 = vmatmul.msk.f32.vlgmr.msrb.gmra.mxu2 %vm1981_vm14, %v1967_v11  ;;  %v1880_v26 = vmul.f32 %v1879_v40, %v1855_v46 }
 0x93f   : > { %v3585_v42 = vclamps-f32 %v1880_v26, 1.0 }
 0x941   : > { %v1964_v19 = vadd.f32 1.0, %v3585_v42 }
 0x943   : > { %v1968_v10 = vmul.f32 %v1964_v19, %v1796_v28 }
 0x945   : > { %3589 = vmatmul.msk.f32.gmra.mxu2 %vm1981_vm14, %v1968_v10 }
 0x968   : > { %v1789_v48 = vpop.f32.mrf.mxu0 }
 0x969   : > { %v4755_v41 = vadd.f32 %v4706_v1, %v1789_v48 }
 0x96b   : > { %v1801_v51 = vmul.f32 0.70710677, %v4755_v41 }
 0x96d   : > { %v1883_v22 = vmul.f32 %v1801_v51, %v1801_v51 }
 0x96f   : > { %v1884_v45 = vmin.f32 %v1883_v22, 16.0 }
 0x970   : > { %v1792_v56 = vpop.f32.mrf.mxu0 }
 0x971   : > { %v1885_v24 = vmul.f32 2.1237322e-06, %v1884_v45  ;;  %v1896_v57 = vmul.f32 3.8918573e-05, %v1884_v45  ;;  %v4759_v39 = vadd.f32 %v4706_v1, %v1792_v56 }
 0x973   : > { %v1886_v49 = vadd.f32 0.00028619796, %v1885_v24  ;;  %v1897_v18 = vadd.f32 0.001143296, %v1896_v57  ;;  %v4762_v58 = vmul.f32 0.70710677, %v4759_v39 }
 0x975   : > { %v1887_v50 = vmul.f32 %v1886_v49, %v1884_v45  ;;  %v1898_v60 = vmul.f32 %v1897_v18, %v1884_v45  ;;  %v1923_v29 = vmul.f32 %v4762_v58, %v4762_v58 }
 0x977   : > { %v1899_v62 = vadd.f32 0.014752088, %v1898_v60  ;;  %v1888_v53 = vadd.f32 0.0036580483, %v1887_v50  ;;  %v1924_v63 = vmin.f32 %v1923_v29, 16.0  ;;  %v1797_v29 = vmul.f32 0.5, %v4755_v41 }
 0x978   : > { %v3799_v41 = vld [vmem:[%s5325_s14] ss:$0 sm:$0xff] }
 0x979   : > { %v1900_v0 = vmul.f32 %v1899_v62, %v1884_v45  ;;  %v1925_v3 = vmul.f32 2.1237322e-06, %v1924_v63  ;;  %v1936_v4 = vmul.f32 3.8918573e-05, %v1924_v63  ;;  %v1889_v6 = vmul.f32 %v1888_v53, %v1884_v45 }
 0x97b   : > { %v1901_v5 = vadd.f32 0.112945676, %v1900_v0  ;;  %v1926_v1 = vadd.f32 0.00028619796, %v1925_v3  ;;  %v1937_v8 = vadd.f32 0.001143296, %v1936_v4 }
 0x97c   : > { %v1890_v16 = vadd.f32 0.05243302, %v1889_v6 }
 0x97d   : > { %v1902_v59 = vmul.f32 %v1901_v5, %v1884_v45  ;;  %v1927_v54 = vmul.f32 %v1926_v1, %v1924_v63  ;;  %v1938_v9 = vmul.f32 %v1937_v8, %v1924_v63  ;;  %v1798_v1 = vmul.f32 0.5, %v4759_v39 }
 0x97e   : > { %v1891_v20 = vmul.f32 %v1890_v16, %v1884_v45 }
 0x97f   : > { %v1903_v12 = vadd.f32 0.4994258, %v1902_v59  ;;  %v1939_v55 = vadd.f32 0.014752088, %v1938_v9  ;;  %v1928_v2 = vadd.f32 0.0036580483, %v1927_v54 }
 0x980   : > { %v1892_v27 = vadd.f32 0.18741608, %v1891_v20 }
 0x981   : > { %v1904_v17 = vmul.f32 %v1903_v12, %v1884_v45  ;;  %v1940_v13 = vmul.f32 %v1939_v55, %v1924_v63  ;;  %v1929_v25 = vmul.f32 %v1928_v2, %v1924_v63 }
 0x982   : > { %v1893_v33 = vmul.f32 %v1892_v27, %v1884_v45 }
 0x983   : > { %v1905_v43 = vadd.f32 1.0, %v1904_v17  ;;  %v1941_v7 = vadd.f32 0.112945676, %v1940_v13  ;;  %v1930_v31 = vadd.f32 0.05243302, %v1929_v25 }
 0x984   : > { %v1894_v38 = vadd.f32 1.1283791, %v1893_v33 }
 0x985   : > { %3893 = vrcp.f32 %v1905_v43  ;;  %v1942_v15 = vmul.f32 %v1941_v7, %v1924_v63  ;;  %v1931_v14 = vmul.f32 %v1930_v31, %v1924_v63  ;;  %v1917_v11 = vand.u32 2147483648, %v1905_v43 }
 0x986   : > { %v1915_v23 = vand.u32 2147483647, %v1905_v43  ;;  %vm1911_vm8 = vweird.f32 %v1905_v43  ;;  %v1895_v19 = vmul.f32 %v1894_v38, %v1801_v51 }
 0x987   : > { %v1943_v30 = vadd.f32 0.4994258, %v1942_v15  ;;  %v1932_v40 = vadd.f32 0.18741608, %v1931_v14  ;;  %v1918_v42 = vor.u32 1.1754944e-38, %v1917_v11 }
 0x988   : > { %vm1916_vm10 = vcmp.eq.f32.partialorder %v1915_v23, 8.507059e+37 }
 0x989   : > { %v1944_v61 = vmul.f32 %v1943_v30, %v1924_v63  ;;  %v1933_v22 = vmul.f32 %v1932_v40, %v1924_v63 }
 0x98b   : > { %v3894_v21 = vpop.eup %3893  ;;  %v1945_v36 = vadd.f32 1.0, %v1944_v61  ;;  %v1934_v18 = vadd.f32 1.1283791, %v1933_v22 }
 0x98c   : > { %v1907_v34 = vmul.f32 %v3894_v21, %v1905_v43  ;;  %vm1912_vm7 = vweird.f32 %v3894_v21 }
 0x98d   : > { %3895 = vrcp.f32 %v1945_v36  ;;  %vm1913_vm9 = vmor %vm1911_vm8, %vm1912_vm7  ;;  %v1957_v57 = vand.u32 2147483648, %v1945_v36  ;;  %v1955_v60 = vand.u32 2147483647, %v1945_v36  ;;  %vm1951_vm12 = vweird.f32 %v1945_v36 }
 0x98e   : > { %v1908_v47 = vsub.f32 1.0, %v1907_v34  ;;  %v1935_v3 = vmul.f32 %v1934_v18, %v4762_v58 }
 0x98f   : > { %v1958_v51 = vor.u32 1.1754944e-38, %v1957_v57  ;;  %vm1956_vm15 = vcmp.eq.f32.partialorder %v1955_v60, 8.507059e+37 }
 0x990   : > { %v1909_v46 = vmul.f32 %v3894_v21, %v1908_v47 }
 0x992   : > { %v1910_v26 = vadd.f32 %v3894_v21, %v1909_v46 }
 0x993   : > { %v3896_v28 = vpop.eup %3895 }
 0x994   : > { %v1914_v10 = vsel %vm1913_vm9, %v3894_v21, %v1910_v26  ;;  %v1947_v45 = vmul.f32 %v3896_v28, %v1945_v36  ;;  %vm1952_vm11 = vweird.f32 %v3896_v28 }
 0x995   : > { %v1919_v48 = vsel %vm1916_vm10, %v1918_v42, %v1914_v10  ;;  %vm1953_vm13 = vmor %vm1951_vm12, %vm1952_vm11  ;;  %v3593_v10 = vld [vmem:[%s5317_s6 + $0x28] sm:$0xff] }
 0x996   : > { %v1920_v56 = vmul.f32 %v1919_v48, %v1895_v19  ;;  %v1948_v24 = vsub.f32 1.0, %v1947_v45  ;;  %v3594_v19 = vld [vmem:[%s5317_s6 + $0x30] sm:$0xff]  ;;  %v3592_v48 = vld [vmem:[%s5317_s6 + $0x20] sm:$0xff] }
 0x998   : > { %v3586_v49 = vclamps-f32 %v1920_v56, 1.0  ;;  %v1949_v50 = vmul.f32 %v3896_v28, %v1948_v24 }
 0x99a   : > { %v1965_v62 = vadd.f32 1.0, %v3586_v49  ;;  %v1950_v53 = vadd.f32 %v3896_v28, %v1949_v50 }
 0x99c   : > { %v1969_v0 = vmul.f32 %v1965_v62, %v1797_v29  ;;  %v1954_v63 = vsel %vm1953_vm13, %v3896_v28, %v1950_v53  ;;  %v3595_v28 = vld [vmem:[%s5317_s6 + $0x38] sm:$0xff] }
 0x99d   : > { %v1959_v4 = vsel %vm1956_vm15, %v1958_v51, %v1954_v63  ;;  %2156 = vmatpush.msra.mxu1 %v3595_v28 }
 0x99e   : > { %3590 = vmatmul.msk.f32.gmra.mxu2 %vm1981_vm14, %v1969_v0  ;;  %v1960_v5 = vmul.f32 %v1959_v4, %v1935_v3  ;;  %v3800_v0 = vld [vmem:[%s5375_s4 + $0x1] ss:$0 sm:$0xff] }
 0x99f   : > { %2157 = vmatpush.msra.mxu1 %v3594_v19 }
 0x9a0   : > { %v3587_v6 = vclamps-f32 %v1960_v5, 1.0 }
 0x9a1   : > { %2158 = vmatpush.msra.mxu1 %v3593_v10 }
 0x9a2   : > { %v1966_v8 = vadd.f32 1.0, %v3587_v6  ;;  %v3801_v6 = vld [vmem:[%s5376_s5 + $0x1] ss:$0 sm:$0xff] }
 0x9a3   : > { %2159 = vmatpush.msra.mxu1 %v3592_v48 }
 0x9a4   : > { %v1970_v59 = vmul.f32 %v1966_v8, %v1798_v1 }
 0x9a6   : > { %3591 = vmatmul.msk.f32.gmra.mxu2 %vm1981_vm14, %v1970_v59 }
 0x9c0   : > { %v2011_v54 = vpop.f32.mrf.mxu2 }
 0x9c1   : > { %v2012_v9 = vadd.f32 %v3799_v41, %v2011_v54 }
 0x9c3   : > { %v4775_v58 = vadd.f32 %v2012_v9, %v4634_v32 }
 0x9c5   : > { %v2029_v12 = vsel %vm666_vm1, %v4775_v58, 0.0 }
 0x9c6   : > { %2030 = vadd.xlane.f32.xlu2 %v2029_v12 }
 0x9c8   : > { %v2014_v16 = vpop.f32.mrf.mxu2 }
 0x9c9   : > { %v2015_v55 = vadd.f32 %v3799_v41, %v2014_v16 }
 0x9cb   : > { %v4780_v39 = vadd.f32 %v2015_v55, %v4639_v35 }
 0x9cd   : > { %v2032_v17 = vsel %vm666_vm1, %v4780_v39, 0.0 }
 0x9ce   : > { %2033 = vadd.xlane.f32.xlu1 %v2032_v17 }
 0xa21   : > { %v2017_v2 = vpop.f32.mrf.mxu2 }
 0xa22   : > { %v2018_v13 = vadd.f32 %v3799_v41, %v2017_v2 }
 0xa24   : > { %v4785_v43 = vadd.f32 %v2018_v13, %v4646_v44 }
 0xa26   : > { %v2035_v32 = vsel %vm666_vm1, %v4785_v43, 0.0 }
 0xa27   : > { %2036 = vadd.xlane.f32.xlu0 %v2035_v32 }
 0xa29   : > { %v2020_v20 = vpop.f32.mrf.mxu2 }
 0xa2a   : > { %v2021_v7 = vadd.f32 %v3799_v41, %v2020_v20 }
 0xa2c   : > { %v4790_v25 = vadd.f32 %v2021_v7, %v4651_v52 }
 0xa2e   : > { %v2038_v35 = vsel %vm676_vm2, %v4790_v25, 0.0 }
 0xa2f   : > { %2039 = vadd.xlane.f32.xlu2 %v2038_v35 }
 0xa39   : > { %v2031_v15 = vpop.xlane.xlu2 %2030 }
 0xa3a   : > { %v2041_v27 = vmul.f32 %v2031_v15, %v4265_v37 }
 0xa3c   : > { %v2045_v30 = vsub.f32 %v4775_v58, %v2041_v27 }
 0xa3e   : > { %v2049_v44 = vmul.f32 %v2045_v30, %v2045_v30 }
 0xa40   : > { %v2053_v31 = vsel %vm666_vm1, %v2049_v44, 0.0 }
 0xa41   : > { %2054 = vadd.xlane.f32.xlu1 %v2053_v31  ;;  %v2034_v61 = vpop.xlane.xlu1 %2033 }
 0xa42   : > { %v2042_v21 = vmul.f32 %v2034_v61, %v4265_v37 }
 0xa44   : > { %v2046_v33 = vsub.f32 %v4780_v39, %v2042_v21 }
 0xa46   : > { %v2050_v52 = vmul.f32 %v2046_v33, %v2046_v33 }
 0xa48   : > { %v2056_v34 = vsel %vm666_vm1, %v2050_v52, 0.0 }
 0xa49   : > { %2057 = vadd.xlane.f32.xlu0 %v2056_v34 }
 0xa9a   : > { %v2037_v36 = vpop.xlane.xlu0 %2036 }
 0xa9b   : > { %v2043_v14 = vmul.f32 %v2037_v36, %v4265_v37 }
 0xa9d   : > { %v4802_v47 = vsub.f32 %v4785_v43, %v2043_v14 }
 0xa9f   : > { %v2051_v11 = vmul.f32 %v4802_v47, %v4802_v47 }
 0xaa1   : > { %v2059_v38 = vsel %vm666_vm1, %v2051_v11, 0.0 }
 0xaa2   : > { %2060 = vadd.xlane.f32.xlu2 %v2059_v38  ;;  %v2040_v46 = vpop.xlane.xlu2 %2039 }
 0xaa3   : > { %v2044_v23 = vmul.f32 %v2040_v46, %v4265_v37 }
 0xaa5   : > { %v4809_v40 = vsub.f32 %v4790_v25, %v2044_v23 }
 0xaa7   : > { %v2052_v26 = vmul.f32 %v4809_v40, %v4809_v40 }
 0xaa9   : > { %v2062_v42 = vsel %vm676_vm2, %v2052_v26, 0.0 }
 0xaaa   : > { %2063 = vadd.xlane.f32.xlu1 %v2062_v42 }
 0xab4   : > { %v2055_v22 = vpop.xlane.xlu1 %2054 }
 0xab5   : > { %v2065_v45 = vmul.f32 %v2055_v22, %v4265_v37 }
 0xab7   : > { %v2069_v56 = vadd.f32 1e-05, %v2065_v45 }
 0xab9   : > { %3897 = vrsqrt.f32 %v2069_v56  ;;  %vm2079_vm7 = vweird.f32 %v2069_v56 }
 0xabc   : > { %v2058_v24 = vpop.xlane.xlu0 %2057 }
 0xabd   : > { %v2066_v57 = vmul.f32 %v2058_v24, %v4265_v37 }
 0xabf   : > { %v3898_v49 = vpop.eup %3897  ;;  %v2070_v50 = vadd.f32 1e-05, %v2066_v57 }
 0xac0   : > { %v2074_v18 = vmul.f32 %v3898_v49, %v2069_v56  ;;  %vm2080_vm6 = vweird.f32 %v3898_v49 }
 0xac1   : > { %3899 = vrsqrt.f32 %v2070_v50  ;;  %vm2081_vm8 = vmor %vm2079_vm7, %vm2080_vm6  ;;  %vm2089_vm10 = vweird.f32 %v2070_v50 }
 0xac2   : > { %v2075_v60 = vmul.f32 %v3898_v49, %v2074_v18 }
 0xac4   : > { %v2076_v29 = vmul.f32 0.5, %v2075_v60 }
 0xac6   : > { %v2077_v62 = vsub.f32 1.5, %v2076_v29 }
 0xac7   : > { %v3900_v53 = vpop.eup %3899 }
 0xac8   : > { %v2078_v51 = vmul.f32 %v3898_v49, %v2077_v62  ;;  %v2084_v3 = vmul.f32 %v3900_v53, %v2070_v50  ;;  %vm2090_vm9 = vweird.f32 %v3900_v53 }
 0xac9   : > { %vm2091_vm11 = vmor %vm2089_vm10, %vm2090_vm9 }
 0xaca   : > { %v2082_v63 = vsel %vm2081_vm8, %v3898_v49, %v2078_v51  ;;  %v2085_v5 = vmul.f32 %v3900_v53, %v2084_v3 }
 0xacb   : > { %v2113_v4 = vmul.f32 %v2082_v63, %v2045_v30 }
 0xacc   : > { %v2086_v8 = vmul.f32 0.5, %v2085_v5 }
 0xacd   : > { %v2118_v1 = vmul.f32 %v3800_v0, %v2113_v4 }
 0xace   : > { %v2087_v59 = vsub.f32 1.5, %v2086_v8 }
 0xacf   : > { %v2123_v41 = vadd.f32 %v3801_v6, %v2118_v1 }
 0xad0   : > { %v2088_v54 = vmul.f32 %v3900_v53, %v2087_v59 }
 0xad1   : > { %3596 = vmatmul.msk.f32.vlgmr.msra.gmra.mxu1 %vm666_vm1, %v2123_v41 }
 0xad2   : > { %v2092_v9 = vsel %vm2091_vm11, %v3900_v53, %v2088_v54 }
 0xad3   : > { %v2114_v12 = vmul.f32 %v2092_v9, %v2046_v33 }
 0xad5   : > { %v2119_v16 = vmul.f32 %v3800_v0, %v2114_v12 }
 0xad7   : > { %v2124_v55 = vadd.f32 %v3801_v6, %v2119_v16 }
 0xad9   : > { %3597 = vmatmul.msk.f32.gmra.mxu1 %vm666_vm1, %v2124_v55 }
 0xb15   : > { %v2061_v17 = vpop.xlane.xlu2 %2060 }
 0xb16   : > { %v2067_v2 = vmul.f32 %v2061_v17, %v4265_v37 }
 0xb18   : > { %v2071_v13 = vadd.f32 1e-05, %v2067_v2 }
 0xb1a   : > { %3901 = vrsqrt.f32 %v2071_v13  ;;  %vm2099_vm13 = vweird.f32 %v2071_v13 }
 0xb1d   : > { %v2064_v32 = vpop.xlane.xlu1 %2063 }
 0xb1e   : > { %v2068_v20 = vmul.f32 %v2064_v32, %v4265_v37 }
 0xb20   : > { %v3902_v7 = vpop.eup %3901  ;;  %v2072_v15 = vadd.f32 1e-05, %v2068_v20 }
 0xb21   : > { %v2094_v35 = vmul.f32 %v3902_v7, %v2071_v13  ;;  %vm2100_vm12 = vweird.f32 %v3902_v7 }
 0xb22   : > { %3903 = vrsqrt.f32 %v2072_v15  ;;  %vm2101_vm15 = vmor %vm2099_vm13, %vm2100_vm12  ;;  %vm2109_vm7 = vweird.f32 %v2072_v15 }
 0xb23   : > { %v2095_v27 = vmul.f32 %v3902_v7, %v2094_v35 }
 0xb25   : > { %v2096_v30 = vmul.f32 0.5, %v2095_v27 }
 0xb27   : > { %v2097_v44 = vsub.f32 1.5, %v2096_v30 }
 0xb28   : > { %v3904_v31 = vpop.eup %3903 }
 0xb29   : > { %v2098_v61 = vmul.f32 %v3902_v7, %v2097_v44  ;;  %v2104_v21 = vmul.f32 %v3904_v31, %v2072_v15  ;;  %vm2110_vm6 = vweird.f32 %v3904_v31 }
 0xb2a   : > { %vm2111_vm8 = vmor %vm2109_vm7, %vm2110_vm6 }
 0xb2b   : > { %v2102_v33 = vsel %vm2101_vm15, %v3902_v7, %v2098_v61  ;;  %v2105_v52 = vmul.f32 %v3904_v31, %v2104_v21 }
 0xb2c   : > { %v2115_v34 = vmul.f32 %v2102_v33, %v4802_v47 }
 0xb2d   : > { %v2106_v36 = vmul.f32 0.5, %v2105_v52 }
 0xb2e   : > { %v2120_v14 = vmul.f32 %v3800_v0, %v2115_v34 }
 0xb2f   : > { %v2107_v11 = vsub.f32 1.5, %v2106_v36 }
 0xb30   : > { %v2125_v38 = vadd.f32 %v3801_v6, %v2120_v14 }
 0xb31   : > { %v2108_v46 = vmul.f32 %v3904_v31, %v2107_v11 }
 0xb32   : > { %3598 = vmatmul.msk.f32.gmra.mxu1 %vm666_vm1, %v2125_v38 }
 0xb33   : > { %v2112_v23 = vsel %vm2111_vm8, %v3904_v31, %v2108_v46 }
 0xb34   : > { %v2116_v26 = vmul.f32 %v2112_v23, %v4809_v40 }
 0xb36   : > { %v2121_v42 = vmul.f32 %v3800_v0, %v2116_v26 }
 0xb38   : > { %v2126_v28 = vadd.f32 %v3801_v6, %v2121_v42 }
 0xb3a   : > { %3599 = vmatmul.msk.f32.gmra.mxu1 %vm666_vm1, %v2126_v28  ;;  %v3600_v28 = vld [vmem:[%s5318_s7 + $0x20] sm:$0xff] }
 0xb4e   : > { %v4842_v19 = vpop.f32.mrf.mxu1 }
 0xb4f   : > { %v4863_v24 = vmul.f32 0.17677669, %v4842_v19 }
 0xb56   : > { %v4844_v47 = vpop.f32.mrf.mxu1 }
 0xb57   : > { %2188 = vrot.lane.b32.xlu1 %v4844_v47, %s4052_s25  ;;  %v4868_v57 = vmul.f32 0.17677669, %v4844_v47 }
 0xbaf   : > { %v4848_v10 = vpop.f32.mrf.mxu1 }
 0xbb0   : > { %2190 = vrot.lane.b32.xlu2 %v4848_v10, %s4052_s25  ;;  %v4873_v49 = vmul.f32 0.17677669, %v4848_v10  ;;  %v4890_v63 = vpack.i.bf16 %v4844_v47, %v4848_v10 }
 0xbb7   : > { %v4852_v48 = vpop.f32.mrf.mxu1 }
 0xbb8   : > { %2192 = vrot.lane.b32.xlu0 %v4852_v48, %s4052_s25  ;;  %v4878_v18 = vmul.f32 0.17677669, %v4852_v48 }
 0xbc0   : > { %2186 = vrot.lane.b32.xlu0 %v4842_v19, %s4052_s25  ;;  %s5377_s25 = smov 80  }
 0xbc9   : > { %v2189_v45 = vpop.permute.xlu1 %2188 }
 0xc0a   : > { %v2191_v22 = vpop.permute.xlu2 %2190 }
 0xc2a   : > { %v2193_v40 = vpop.permute.xlu0 %2192 }
 0xc2b   : > { %3604 = vmatpush.xpose.msk.msra.mxu3 %vm838_vm0, %v2193_v40 }
 0xc2f   : > { %3605 = vmatpush.xpose.msk.msra.mxu3 %vm838_vm0, %v2191_v22 }
 0xc32   : > { %v2187_v56 = vpop.permute.xlu0 %2186 }
 0xc33   : > { %3606 = vmatpush.xpose.msk.msra.mxu3 %vm838_vm0, %v2189_v45 }
 0xc37   : > { %3607 = vmatpush.xpose.msk.msra.mxu3 %vm838_vm0, %v2187_v56 }
 0xc3a   : > { %3608 = vmatmul.msk.f32.vlgmr.msra.gmra.mxu3 %vm838_vm0, %v4863_v24 }
 0xc42   : > { %3609 = vmatmul.msk.f32.gmra.mxu3 %vm838_vm0, %v4868_v57 }
 0xc4a   : > { %3610 = vmatmul.msk.f32.gmra.mxu3 %vm838_vm0, %v4873_v49 }
 0xc52   : > { %3611 = vmatmul.msk.f32.gmra.mxu3 %vm838_vm0, %v4878_v18 }
 0xcbd   : > { %v2231_v50 = vpop.f32.mrf.mxu3 }
 0xcbe   : > { %v2243_v60 = vsel %vm888_vm3, %v2231_v50, -inf }
 0xcbf   : > { %2244 = vmax.xlane.f32.xlu0 %v2243_v60 }
 0xcc5   : > { %v2234_v29 = vpop.f32.mrf.mxu3 }
 0xcc6   : > { %v2246_v62 = vsel %vm888_vm3, %v2234_v29, -inf }
 0xcc7   : > { %2247 = vmax.xlane.f32.xlu2 %v2246_v62 }
 0xccd   : > { %v2237_v53 = vpop.f32.mrf.mxu3 }
 0xcce   : > { %v2249_v51 = vsel %vm888_vm3, %v2237_v53, -inf }
 0xccf   : > { %2250 = vmax.xlane.f32.xlu1 %v2249_v51 }
 0xcd5   : > { %v2240_v0 = vpop.f32.mrf.mxu3 }
 0xcd6   : > { %v2252_v3 = vsel %vm898_vm4, %v2240_v0, -inf }
 0xcd7   : > { %2253 = vmax.xlane.f32.xlu0 %v2252_v3 }
 0xce8   : > { %2293 = vrot.lane.b32.xlu1 %v4852_v48, %s4053_s0 }
 0xceb   : > { %3773 = vrot.lane.b32.xlu0 %v4890_v63, %s4053_s0 }
 0xd32   : > { %v2245_v4 = vpop.xlane.xlu0 %2244 }
 0xd33   : > { %v2255_v5 = vsub.f32 %v2231_v50, %v2245_v4 }
 0xd35   : > { %v2259_v6 = vmul.f32 1.442695, %v2255_v5 }
 0xd37   : > { %3905 = vpow2.f32 %v2259_v6 }
 0xd3a   : > { %v2248_v1 = vpop.xlane.xlu2 %2247 }
 0xd3b   : > { %v2256_v8 = vsub.f32 %v2234_v29, %v2248_v1 }
 0xd3d   : > { %v3906_v59 = vpop.eup %3905  ;;  %v2261_v41 = vmul.f32 1.442695, %v2256_v8 }
 0xd3e   : > { %v2267_v54 = vsel %vm888_vm3, %v3906_v59, 0.0 }
 0xd3f   : > { %3907 = vpow2.f32 %v2261_v41  ;;  %2268 = vadd.xlane.f32.xlu2 %v2267_v54 }
 0xd42   : > { %v2251_v9 = vpop.xlane.xlu1 %2250 }
 0xd43   : > { %v2257_v12 = vsub.f32 %v2237_v53, %v2251_v9 }
 0xd45   : > { %v3908_v16 = vpop.eup %3907  ;;  %v2263_v55 = vmul.f32 1.442695, %v2257_v12 }
 0xd46   : > { %v2270_v17 = vsel %vm888_vm3, %v3908_v16, 0.0 }
 0xd47   : > { %3909 = vpow2.f32 %v2263_v55  ;;  %2271 = vadd.xlane.f32.xlu2 %v2270_v17 }
 0xd4a   : > { %v2254_v2 = vpop.xlane.xlu0 %2253 }
 0xd4b   : > { %v2258_v13 = vsub.f32 %v2240_v0, %v2254_v2 }
 0xd4d   : > { %v3910_v32 = vpop.eup %3909  ;;  %v2265_v20 = vmul.f32 1.442695, %v2258_v13 }
 0xd4e   : > { %v2273_v7 = vsel %vm888_vm3, %v3910_v32, 0.0 }
 0xd4f   : > { %3911 = vpow2.f32 %v2265_v20  ;;  %2274 = vadd.xlane.f32.xlu0 %v2273_v7 }
 0xd55   : > { %v3912_v35 = vpop.eup %3911 }
 0xd56   : > { %v2276_v15 = vsel %vm898_vm4, %v3912_v35, 0.0 }
 0xd57   : > { %2277 = vadd.xlane.f32.xlu1 %v2276_v15 }
 0xd5a   : > { %v2294_v27 = vpop.permute.xlu1 %2293 }
 0xd5b   : > { %3612 = vmatpush.msk.msra.mxu0 %vm957_vm5, %v2294_v27 }
 0xd5d   : > { %v3774_v30 = vpop.permute.xlu0 %3773 }
 0xd5e   : > { %v3775_v44 = vunpack.i.l.bf16 %v3774_v30  ;;  %v3776_v31 = vunpack.i.h.bf16 %v3774_v30 }
 0xd5f   : > { %2287 = vrot.lane.b32.xlu2 %v4842_v19, %s4053_s0  ;;  %s5378_s0 = smov 72  }
 0xd60   : > { %2325 = vmatpush.msra.mxu0 %v3775_v44 }
 0xd62   : > { %2326 = vmatpush.msra.mxu0 %v3776_v31 }
 0xd63   : > { %2341 = vrot.lane.b32.xlu0 %v4863_v24, %s4054_s20 }
 0xd67   : > { %2355 = vrot.lane.b32.xlu2 %v4852_v48, %s4055_s2 }
 0xd6b   : > { %2594 = vrot.lane.b32.xlu0 %v4848_v10, %s5377_s25 }
 0xd6f   : > { %2353 = vrot.lane.b32.xlu2 %v4848_v10, %s4055_s2 }
 0xd70   : > { %2343 = vrot.lane.b32.xlu1 %v4868_v57, %s4054_s20 }
 0xd73   : > { %2590 = vrot.lane.b32.xlu0 %v4842_v19, %s5377_s25 }
 0xd77   : > { %2351 = vrot.lane.b32.xlu2 %v4844_v47, %s4055_s2 }
 0xd78   : > { %2592 = vrot.lane.b32.xlu1 %v4844_v47, %s5377_s25 }
 0xd7b   : > { %2796 = vrot.lane.b32.xlu0 %v4844_v47, %s5378_s0 }
 0xd7f   : > { %2349 = vrot.lane.b32.xlu2 %v4842_v19, %s4055_s2  ;;  %s5380_s2 = smov 104  }
 0xd80   : > { %2798 = vrot.lane.b32.xlu1 %v4848_v10, %s5378_s0 }
 0xd83   : > { %2584 = vrot.lane.b32.xlu0 %v4868_v57, %s5379_s22 }
 0xd87   : > { %2345 = vrot.lane.b32.xlu2 %v4873_v49, %s4054_s20 }
 0xd88   : > { %2794 = vrot.lane.b32.xlu1 %v4842_v19, %s5378_s0 }
 0xd8f   : > { %2347 = vrot.lane.b32.xlu2 %v4878_v18, %s4054_s20  ;;  %s3439_s20 = scalar_lea.hbm %s5330_s19, %s4184_s1 }
 0xd90   : > { %2586 = vrot.lane.b32.xlu1 %v4873_v49, %s5379_s22  ;;  %s3443_s24 = sshll.u32 %s3439_s20, 4  ;;  %s3444_s24 = int_to_ptr.hbm [resolvable:$true] %s3443_s24 }
 0xd91   : > { %s4001_s4 = sshra.s32 %s3444_s24, 4  ;;  %s4002_s4 = int_to_ptr.hbm [resolvable:$true] %s4001_s4 }
 0xd92   : > { %s4003_s5 = scalar_lea.hbm %s4002_s4, 1  ;;  %p4008_p0 = scmp.lt.s32.totalorder %s4002_s4, %s5330_s19 }
 0xd93   : > { %p4004_p11 = scmp.ne.s32.totalorder %s4002_s4, %s4003_s5 }
 0xd95   : > { %p4005_p12 = pnand %p4004_p11, %p4201_p5 }
 0xd97   : > { %2596 = vrot.lane.b32.xlu2 %v4852_v48, %s5377_s25  ;;  %p4006_p13 = pneg %p4005_p12 }
 0xd9f   : > { %2800 = vrot.lane.b32.xlu2 %v4852_v48, %s5378_s0  ;;  %s593_s0 = sand.u32 1, %s4041_s30  }
 0xda0   : > { %s594_s26 = scalar_lea.vmem [#allocation2], %s593_s0  ;;  %s3431_s25 = scalar_lea.sflag [#allocation3], %s593_s0 }
 0xda1   : > { %s3441_s3 = sshll.u32 %s594_s26, 4  ;;  %s3442_s3 = int_to_ptr.vmem [resolvable:$true] %s3441_s3 }
 0xda7   : > { %2582 = vrot.lane.b32.xlu2 %v4863_v24, %s5379_s22 }
 0xdaf   : > { %2786 = vrot.lane.b32.xlu2 %v4863_v24, %s5380_s2 }
 0xdb2   : > { %v2269_v61 = vpop.xlane.xlu2 %2268 }
 0xdb3   : > { %3913 = vrcp.f32 %v2269_v61 }
 0xdb7   : > { %2588 = vrot.lane.b32.xlu2 %v4878_v18, %s5379_s22 }
 0xdb9   : > { %v3914_v33 = vpop.eup %3913 }
 0xdba   : > { %v2272_v21 = vpop.xlane.xlu2 %2271  ;;  %v2283_v52 = vmul.f32 %v3914_v33, %v3906_v59 }
 0xdbb   : > { %3915 = vrcp.f32 %v2272_v21 }
 0xdc1   : > { %v3916_v14 = vpop.eup %3915 }
 0xdc2   : > { %v2288_v34 = vpop.permute.xlu2 %2287  ;;  %v2275_v36 = vpop.xlane.xlu0 %2274  ;;  %v2284_v38 = vmul.f32 %v3916_v14, %v3908_v16 }
 0xdc3   : > { %2327 = vmatpush.msra.mxu0 %v2288_v34  ;;  %3917 = vrcp.f32 %v2275_v36 }
 0xdc4   : > { %3613 = vmatmul.msk.f32.vlgmr.msra.gmra.mxu0 %vm888_vm3, %v2283_v52 }
 0xdc5   : > { %2568 = vmatpush.msrb.mxu0 %v3600_v28 }
 0xdc9   : > { %v3918_v23 = vpop.eup %3917 }
 0xdca   : > { %v2356_v11 = vpop.permute.xlu2 %2355  ;;  %v2278_v46 = vpop.xlane.xlu1 %2277  ;;  %v2285_v42 = vmul.f32 %v3918_v23, %v3910_v32 }
 0xdcb   : > { %3617 = vmatpush.xpose.msk.msra.mxu2 %vm838_vm0, %v2356_v11  ;;  %3919 = vrcp.f32 %v2278_v46 }
 0xdcc   : > { %3614 = vmatmul.msk.f32.gmra.mxu0 %vm888_vm3, %v2284_v38 }
 0xdd1   : > { %v3920_v47 = vpop.eup %3919 }
 0xdd2   : > { %v2354_v26 = vpop.permute.xlu2 %2353  ;;  %v2286_v40 = vmul.f32 %v3920_v47, %v3912_v35 }
 0xdd3   : > { %3618 = vmatpush.xpose.msk.msra.mxu2 %vm838_vm0, %v2354_v26 }
 0xdd4   : > { %3615 = vmatmul.msk.f32.gmra.mxu0 %vm888_vm3, %v2285_v42 }
 0xdd5   : > { %v2342_v45 = vpop.permute.xlu0 %2341 }
 0xdda   : > { %v2352_v10 = vpop.permute.xlu2 %2351 }
 0xddb   : > { %3619 = vmatpush.xpose.msk.msra.mxu2 %vm838_vm0, %v2352_v10 }
 0xddc   : > { %3616 = vmatmul.msk.f32.gmra.mxu0 %vm888_vm3, %v2286_v40 }
 0xddd   : > { %v2595_v60 = vpop.permute.xlu0 %2594 }
 0xde2   : > { %v2350_v22 = vpop.permute.xlu2 %2349  ;;  %v2344_v24 = vpop.permute.xlu1 %2343 }
 0xde3   : > { %3620 = vmatpush.xpose.msk.msra.mxu2 %vm838_vm0, %v2350_v22 }
 0xde5   : > { %v2591_v53 = vpop.permute.xlu0 %2590 }
 0xde6   : > { %3621 = vmatmul.msk.f32.vlgmr.msra.gmra.mxu2 %vm838_vm0, %v2342_v45 }
 0xde7   : > { %3700 = vmatpush.msrb.mxu2 %v3600_v28 }
 0xdea   : > { %v2346_v56 = vpop.permute.xlu2 %2345  ;;  %v2593_v29 = vpop.permute.xlu1 %2592 }
 0xded   : > { %v2797_v3 = vpop.permute.xlu0 %2796 }
 0xdee   : > { %3622 = vmatmul.msk.f32.gmra.mxu2 %vm838_vm0, %v2344_v24 }
 0xdf2   : > { %v2348_v50 = vpop.permute.xlu2 %2347  ;;  %v2799_v0 = vpop.permute.xlu1 %2798 }
 0xdf5   : > { %v2585_v54 = vpop.permute.xlu0 %2584 }
 0xdf6   : > { %3623 = vmatmul.msk.f32.gmra.mxu2 %vm838_vm0, %v2346_v56 }
 0xdfa   : > { %v2597_v62 = vpop.permute.xlu2 %2596  ;;  %v2795_v4 = vpop.permute.xlu1 %2794 }
 0xdfb   : > { %3638 = vmatpush.xpose.msk.msra.mxu2 %vm838_vm0, %v2597_v62 }
 0xdfe   : > { %3624 = vmatmul.msk.f32.gmra.mxu2 %vm838_vm0, %v2348_v50 }
 0xdff   : > { %3639 = vmatpush.xpose.msk.msra.mxu2 %vm838_vm0, %v2595_v60 }
 0xe02   : > { %v2801_v51 = vpop.permute.xlu2 %2800  ;;  %v2587_v16 = vpop.permute.xlu1 %2586 }
 0xe03   : > { %3640 = vmatpush.xpose.msk.msra.mxu2 %vm838_vm0, %v2593_v29  ;;  %3655 = vmatpush.xpose.msk.msra.mxu0 %vm838_vm0, %v2801_v51 }
 0xe07   : > { %3641 = vmatpush.xpose.msk.msra.mxu2 %vm838_vm0, %v2591_v53  ;;  %3656 = vmatpush.xpose.msk.msra.mxu0 %vm838_vm0, %v2799_v0 }
 0xe0a   : > { %v2583_v6 = vpop.permute.xlu2 %2582 }
 0xe0b   : > { %3657 = vmatpush.xpose.msk.msra.mxu0 %vm838_vm0, %v2797_v3 }
 0xe0f   : > { %3658 = vmatpush.xpose.msk.msra.mxu0 %vm838_vm0, %v2795_v4 }
 0xe12   : > { %v2787_v8 = vpop.permute.xlu2 %2786 }
 0xe1a   : > { %v2589_v2 = vpop.permute.xlu2 %2588 }
 0xe41   : > { %v2329_v5 = vpop.f32.mrf.mxu0 }
 0xe42   : > { %3634 = vmatmul.msk.f32.vlgmr.msrb.gmra.mxu0 %vm838_vm0, %v2329_v5 }
 0xe49   : > { %v2332_v1 = vpop.f32.mrf.mxu0 }
 0xe4a   : > { %3635 = vmatmul.msk.f32.gmra.mxu0 %vm838_vm0, %v2332_v1 }
 0xe51   : > { %v2335_v59 = vpop.f32.mrf.mxu0 }
 0xe52   : > { %3636 = vmatmul.msk.f32.vlgmr.msrb.gmra.mxu2 %vm838_vm0, %v2335_v59  ;;  %3659 = vmatmul.msk.f32.vlgmr.msra.gmra.mxu0 %vm838_vm0, %v2787_v8 }
 0xe59   : > { %v2338_v41 = vpop.f32.mrf.mxu0 }
 0xe5a   : > { %3637 = vmatmul.msk.f32.gmra.mxu2 %vm838_vm0, %v2338_v41 }
 0xe62   : > { %3642 = vmatmul.msk.f32.vlgmr.msra.gmra.mxu2 %vm838_vm0, %v2583_v6 }
 0xe69   : > { %v2390_v9 = vpop.f32.mrf.mxu2 }
 0xe6a   : > { %3643 = vmatmul.msk.f32.gmra.mxu2 %vm838_vm0, %v2585_v54  ;;  %v2402_v12 = vsel %vm888_vm3, %v2390_v9, -inf }
 0xe6b   : > { %2403 = vmax.xlane.f32.xlu0 %v2402_v12 }
 0xe71   : > { %v2393_v55 = vpop.f32.mrf.mxu2 }
 0xe72   : > { %3644 = vmatmul.msk.f32.gmra.mxu2 %vm838_vm0, %v2587_v16  ;;  %v2405_v17 = vsel %vm888_vm3, %v2393_v55, -inf }
 0xe73   : > { %2406 = vmax.xlane.f32.xlu1 %v2405_v17 }
 0xe79   : > { %v2396_v13 = vpop.f32.mrf.mxu2 }
 0xe7a   : > { %3645 = vmatmul.msk.f32.gmra.mxu2 %vm838_vm0, %v2589_v2  ;;  %v2408_v32 = vsel %vm888_vm3, %v2396_v13, -inf }
 0xe7b   : > { %2409 = vmax.xlane.f32.xlu2 %v2408_v32 }
 0xe81   : > { %v2399_v20 = vpop.f32.mrf.mxu2 }
 0xe82   : > { %v2411_v7 = vsel %vm898_vm4, %v2399_v20, -inf }
 0xe83   : > { %2412 = vmax.xlane.f32.xlu0 %v2411_v7 }
 0xebf   : > { %v4979_v35 = vpop.f32.mrf.mxu0 }
 0xec7   : > { %v4981_v15 = vpop.f32.mrf.mxu0 }
 0xecf   : > { %v2835_v27 = vpop.f32.mrf.mxu0 }
 0xed0   : > { %v2847_v30 = vsel %vm888_vm3, %v2835_v27, -inf }
 0xed1   : > { %2848 = vmax.xlane.f32.xlu2 %v2847_v30 }
 0xed5   : > { %v4984_v44 = vpop.f32.mrf.mxu2 }
 0xedd   : > { %v4986_v31 = vpop.f32.mrf.mxu2 }
 0xede   : > { %v2404_v61 = vpop.xlane.xlu0 %2403 }
 0xedf   : > { %v2414_v21 = vsub.f32 %v2390_v9, %v2404_v61 }
 0xee1   : > { %v2418_v33 = vmul.f32 1.442695, %v2414_v21 }
 0xee3   : > { %3921 = vpow2.f32 %v2418_v33 }
 0xee5   : > { %v2631_v52 = vpop.f32.mrf.mxu2 }
 0xee6   : > { %v2407_v34 = vpop.xlane.xlu1 %2406  ;;  %v2643_v36 = vsel %vm888_vm3, %v2631_v52, -inf }
 0xee7   : > { %v2415_v14 = vsub.f32 %v2393_v55, %v2407_v34  ;;  %2644 = vmax.xlane.f32.xlu1 %v2643_v36 }
 0xee9   : > { %v3922_v11 = vpop.eup %3921  ;;  %v2420_v38 = vmul.f32 1.442695, %v2415_v14  ;;  %3778 = vrot.lane.b32.xlu2 %v4890_v63, %s5381_s27 }
 0xeea   : > { %v2426_v46 = vsel %vm888_vm3, %v3922_v11, 0.0 }
 0xeeb   : > { %3923 = vpow2.f32 %v2420_v38  ;;  %2427 = vadd.xlane.f32.xlu0 %v2426_v46 }
 0xeed   : > { %v5024_v41 = vpop.f32.mrf.mxu2 }
 0xeee   : > { %v2410_v42 = vpop.xlane.xlu2 %2409  ;;  %v2646_v12 = vsel %vm888_vm3, %v5024_v41, -inf }
 0xeef   : > { %v2416_v28 = vsub.f32 %v2396_v13, %v2410_v42 }
 0xef1   : > { %v3924_v23 = vpop.eup %3923  ;;  %v2422_v47 = vmul.f32 1.442695, %v2416_v28 }
 0xef2   : > { %v2429_v26 = vsel %vm888_vm3, %v3924_v23, 0.0 }
 0xef3   : > { %2430 = vadd.xlane.f32.xlu0 %v2429_v26  ;;  %3925 = vpow2.f32 %v2422_v47  ;;  %v3601_v47 = vld [vmem:[%s5318_s7 + $0x28] sm:$0xff] }
 0xef4   : > { %2527 = vmatpush.msrb.mxu3 %v3601_v47 }
 0xef5   : > { %v5032_v32 = vpop.f32.mrf.mxu2 }
 0xef6   : > { %v2413_v22 = vpop.xlane.xlu0 %2412  ;;  %v2649_v30 = vsel %vm888_vm3, %v5032_v32, -inf }
 0xef7   : > { %v2417_v45 = vsub.f32 %v2399_v20, %v2413_v22 }
 0xef9   : > { %v3926_v10 = vpop.eup %3925  ;;  %v2424_v56 = vmul.f32 1.442695, %v2417_v45 }
 0xefa   : > { %v2432_v40 = vsel %vm888_vm3, %v3926_v10, 0.0 }
 0xefb   : > { %3927 = vpow2.f32 %v2424_v56 }
 0xf00   : > { %2452 = vrot.lane.b32.xlu1 %v4852_v48, %s5381_s27 }
 0xf01   : > { %v3928_v24 = vpop.eup %3927 }
 0xf02   : > { %v2435_v50 = vsel %vm898_vm4, %v3928_v24, 0.0 }
 0xf07   : > { %2446 = vrot.lane.b32.xlu0 %v4842_v19, %s5381_s27 }
 0xf0f   : > { %3783 = vrot.lane.b32.xlu0 %v4890_v63, %s5382_s28 }
 0xf12   : > { %2433 = vadd.xlane.f32.xlu2 %v2432_v40 }
 0xf17   : > { %2687 = vrot.lane.b32.xlu0 %v4842_v19, %s5382_s28 }
 0xf2a   : > { %2436 = vadd.xlane.f32.xlu1 %v2435_v50  ;;  %2897 = vrot.lane.b32.xlu2 %v4852_v48, %s5383_s21 }
 0xf32   : > { %2891 = vrot.lane.b32.xlu2 %v4842_v19, %s5383_s21 }
 0xf43   : > { %2693 = vrot.lane.b32.xlu1 %v4852_v48, %s5382_s28  ;;  %s5384_s28 = sld [smem:[#allocation18_spill]] }
 0xf44   : > { %v2849_v60 = vpop.xlane.xlu2 %2848 }
 0xf45   : > { %v2859_v29 = vsub.f32 %v2835_v27, %v2849_v60 }
 0xf47   : > { %v2863_v62 = vmul.f32 1.442695, %v2859_v29 }
 0xf49   : > { %3929 = vpow2.f32 %v2863_v62 }
 0xf4b   : > { %3788 = vrot.lane.b32.xlu1 %v4890_v63, %s5383_s21 }
 0xf4c   : > { %v3779_v5 = vpop.permute.xlu2 %3778 }
 0xf4d   : > { %v3780_v1 = vunpack.i.l.bf16 %v3779_v5  ;;  %v3781_v8 = vunpack.i.h.bf16 %v3779_v5 }
 0xf4f   : > { %v5013_v53 = vpop.eup %3929 }
 0xf50   : > { %v2871_v0 = vsel %vm888_vm3, %v5013_v53, 0.0 }
 0xf53   : > { %2788 = vrot.lane.b32.xlu1 %v4868_v57, %s5380_s2 }
 0xf5a   : > { %v2645_v51 = vpop.xlane.xlu1 %2644 }
 0xf5b   : > { %v2655_v19 = vsub.f32 %v2631_v52, %v2645_v51  ;;  %2872 = vadd.xlane.f32.xlu2 %v2871_v0 }
 0xf5d   : > { %v2659_v3 = vmul.f32 1.442695, %v2655_v19 }
 0xf5e   : > { %v2428_v4 = vpop.xlane.xlu0 %2427 }
 0xf5f   : > { %3931 = vpow2.f32 %v2659_v3 }
 0xf60   : > { %3933 = vrcp.f32 %v2428_v4 }
 0xf65   : > { %v5017_v48 = vpop.eup %3931 }
 0xf66   : > { %v2667_v63 = vsel %vm888_vm3, %v5017_v48, 0.0  ;;  %v2431_v57 = vpop.xlane.xlu0 %2430  ;;  %v3934_v59 = vpop.eup %3933 }
 0xf67   : > { %2668 = vadd.xlane.f32.xlu0 %v2667_v63  ;;  %3935 = vrcp.f32 %v2431_v57  ;;  %v2442_v54 = vmul.f32 %v3934_v59, %v3922_v11 }
 0xf72   : > { %v2453_v6 = vpop.permute.xlu1 %2452 }
 0xf73   : > { %3625 = vmatpush.msk.msrb.mxu1 %vm957_vm5, %v2453_v6  ;;  %2792 = vrot.lane.b32.xlu2 %v4878_v18, %s5380_s2  ;;  %v3936_v18 = vpop.eup %3935 }
 0xf74   : > { %v2443_v16 = vmul.f32 %v3936_v18, %v3924_v23 }
 0xf75   : > { %2484 = vmatpush.msrb.mxu1 %v3780_v1 }
 0xf77   : > { %2485 = vmatpush.msrb.mxu1 %v3781_v8 }
 0xf79   : > { %v2447_v9 = vpop.permute.xlu0 %2446 }
 0xf7a   : > { %2486 = vmatpush.msrb.mxu1 %v2447_v9 }
 0xf7b   : > { %2790 = vrot.lane.b32.xlu0 %v4873_v49, %s5380_s2  ;;  %3626 = vmatmul.msk.f32.vlgmr.msrb.gmra.mxu1 %vm888_vm3, %v2442_v54  ;;  %v2640_v49 = vpop.f32.mrf.mxu2  ;;  %s4007_s2 = scalar_lea.hbm %s5330_s19, 2 }
 0xf7c   : > { %v2652_v20 = vsel %vm898_vm4, %v2640_v49, -inf  ;;  %p4009_p1 = scmp.lt.s32.totalorder %s4007_s2, %s4003_s5 }
 0xf7d   : > { %2647 = vmax.xlane.f32.xlu1 %v2646_v12 }
 0xf7e   : > { %p4010_p2 = por %p4009_p1, %p4008_p0 }
 0xf80   : > { %p4011_p3 = pnand %p4010_p2, %p4006_p13 }
 0xf81   : > { %v3784_v21 = vpop.permute.xlu0 %3783 }
 0xf82   : > { %v3785_v52 = vunpack.i.l.bf16 %v3784_v21  ;;  %v3786_v34 = vunpack.i.h.bf16 %v3784_v21 }
 0xf83   : > { %3627 = vmatmul.msk.f32.gmra.mxu1 %vm888_vm3, %v2443_v16 }
 0xf85   : > { %v2434_v55 = vpop.xlane.xlu2 %2433 }
 0xf86   : > { %3937 = vrcp.f32 %v2434_v55 }
 0xf89   : > { %v2688_v36 = vpop.permute.xlu0 %2687 }
 0xf8c   : > { %v3938_v17 = vpop.eup %3937 }
 0xf8d   : > { %v2898_v2 = vpop.permute.xlu2 %2897  ;;  %v2444_v13 = vmul.f32 %v3938_v17, %v3926_v10 }
 0xf8e   : > { %3663 = vmatpush.msk.msrb.mxu2 %vm957_vm5, %v2898_v2 }
 0xf8f   : > { %3628 = vmatmul.msk.f32.gmra.mxu1 %vm888_vm3, %v2444_v13 }
 0xf95   : > { %v2892_v46 = vpop.permute.xlu2 %2891 }
 0xf9c   : > { %2653 = vmax.xlane.f32.xlu2 %v2652_v20 }
 0xf9d   : > { %v2437_v7 = vpop.xlane.xlu1 %2436 }
 0xf9e   : > { %3939 = vrcp.f32 %v2437_v7 }
 0xfa4   : > { %v3940_v27 = vpop.eup %3939 }
 0xfa5   : > { %2650 = vmax.xlane.f32.xlu0 %v2649_v30  ;;  %v2445_v61 = vmul.f32 %v3940_v27, %v3928_v24 }
 0xfa7   : > { %3629 = vmatmul.msk.f32.gmra.mxu1 %vm888_vm3, %v2445_v61 }
 0xfb5   : > { %v2694_v33 = vpop.permute.xlu1 %2693 }
 0xfb6   : > { %3646 = vmatpush.msk.msra.mxu1 %vm957_vm5, %v2694_v33 }
 0xfb8   : > { %2725 = vmatpush.msra.mxu1 %v3785_v52 }
 0xfba   : > { %2726 = vmatpush.msra.mxu1 %v3786_v34 }
 0xfbc   : > { %2727 = vmatpush.msra.mxu1 %v2688_v36 }
 0xfbd   : > { %v3789_v14 = vpop.permute.xlu1 %3788 }
 0xfbe   : > { %v3790_v11 = vunpack.i.l.bf16 %v3789_v14  ;;  %v3791_v38 = vunpack.i.h.bf16 %v3789_v14 }
 0xfc0   : > { %2929 = vmatpush.msrb.mxu2 %v3790_v11 }
 0xfc2   : > { %2930 = vmatpush.msrb.mxu2 %v3791_v38 }
 0xfc4   : > { %2931 = vmatpush.msrb.mxu2 %v2892_v46 }
 0xfc5   : > { %v2789_v23 = vpop.permute.xlu1 %2788 }
 0xfc6   : > { %3660 = vmatmul.msk.f32.gmra.mxu0 %vm838_vm0, %v2789_v23 }
 0xfce   : > { %v2873_v26 = vpop.xlane.xlu2 %2872 }
 0xfcf   : > { %3941 = vrcp.f32 %v2873_v26 }
 0xfd5   : > { %v3942_v42 = vpop.eup %3941 }
 0xfd6   : > { %v2887_v28 = vmul.f32 %v3942_v42, %v5013_v53  ;;  %v2793_v60 = vpop.permute.xlu2 %2792 }
 0xfd8   : > { %3664 = vmatmul.msk.f32.vlgmr.msrb.gmra.mxu2 %vm888_vm3, %v2887_v28 }
 0xfda   : > { %v2669_v10 = vpop.xlane.xlu0 %2668 }
 0xfdb   : > { %3943 = vrcp.f32 %v2669_v10 }
 0xfe1   : > { %v3944_v40 = vpop.eup %3943 }
 0xfe2   : > { %v2683_v22 = vmul.f32 %v3944_v40, %v5017_v48 }
 0xfe4   : > { %3647 = vmatmul.msk.f32.vlgmr.msra.gmra.mxu1 %vm888_vm3, %v2683_v22 }
 0xfed   : > { %v2791_v45 = vpop.permute.xlu0 %2790 }
 0xfee   : > { %3661 = vmatmul.msk.f32.gmra.mxu0 %vm838_vm0, %v2791_v45 }
 0xff0   : > { %v2648_v56 = vpop.xlane.xlu1 %2647 }
 0xff1   : > { %v2656_v24 = vsub.f32 %v5024_v41, %v2648_v56  ;;  %v3602_v41 = vld [vmem:[%s5318_s7 + $0x30] sm:$0xff] }
 0xff2   : > { %2768 = vmatpush.msra.mxu3 %v3602_v41 }
 0xff3   : > { %v2661_v50 = vmul.f32 1.442695, %v2656_v24 }
 0xff5   : > { %3945 = vpow2.f32 %v2661_v50 }
 0xff6   : > { %3662 = vmatmul.msk.f32.gmra.mxu0 %vm838_vm0, %v2793_v60 }
 0xff8   : > { %v2488_v29 = vpop.f32.mrf.mxu1 }
 0xff9   : > { %3630 = vmatmul.msk.f32.vlgmr.msrb.gmra.mxu3 %vm838_vm0, %v2488_v29 }
 0xffb   : > { %v3946_v62 = vpop.eup %3945 }
 0xffc   : > { %v2670_v53 = vsel %vm888_vm3, %v3946_v62, 0.0 }
 0xffd   : > { %2671 = vadd.xlane.f32.xlu1 %v2670_v53 }
0x1000   : > { %v2491_v51 = vpop.f32.mrf.mxu1 }
0x1001   : > { %3631 = vmatmul.msk.f32.gmra.mxu3 %vm838_vm0, %v2491_v51 }
0x100c   : > { %v2494_v0 = vpop.f32.mrf.mxu1 }
0x100d   : > { %3632 = vmatmul.msk.f32.gmra.mxu3 %vm838_vm0, %v2494_v0 }
0x100f   : > { %v2654_v19 = vpop.xlane.xlu2 %2653 }
0x1010   : > { %v2658_v3 = vsub.f32 %v2640_v49, %v2654_v19  ;;  %v3603_v49 = vld [vmem:[%s5318_s7 + $0x38] sm:$0xff] }
0x1011   : > { %2972 = vmatpush.msrb.mxu1 %v3603_v49  ;;  %v3674_v49 = vld [vmem:[%s5322_s11 + $0x30] sm:$0xff] }
0x1012   : > { %v2665_v48 = vmul.f32 1.442695, %v2658_v3 }
0x1014   : > { %3947 = vpow2.f32 %v2665_v48  ;;  %v5090_v48 = vld [vmem:[%s5319_s8 + $0x1] ss:$0 sm:$0xff] }
0x1018   : > { %v2651_v63 = vpop.xlane.xlu0 %2650 }
0x1019   : > { %v2657_v4 = vsub.f32 %v5032_v32, %v2651_v63 }
0x101a   : > { %v3948_v5 = vpop.eup %3947 }
0x101b   : > { %v2663_v57 = vmul.f32 1.442695, %v2657_v4  ;;  %v2676_v6 = vsel %vm898_vm4, %v3948_v5, 0.0 }
0x101c   : > { %2677 = vadd.xlane.f32.xlu2 %v2676_v6 }
0x101d   : > { %3949 = vpow2.f32 %v2663_v57 }
0x1023   : > { %v3950_v1 = vpop.eup %3949 }
0x1024   : > { %v2497_v8 = vpop.f32.mrf.mxu1  ;;  %v2673_v59 = vsel %vm888_vm3, %v3950_v1, 0.0 }
0x1025   : > { %2674 = vadd.xlane.f32.xlu0 %v2673_v59  ;;  %3633 = vmatmul.msk.f32.gmra.mxu3 %vm838_vm0, %v2497_v8 }
0x1043   : > { %v2838_v54 = vpop.f32.mrf.mxu0 }
0x1044   : > { %v2850_v9 = vsel %vm888_vm3, %v2838_v54, -inf }
0x1045   : > { %2851 = vmax.xlane.f32.xlu1 %v2850_v9 }
0x105b   : > { %v2933_v33 = vpop.f32.mrf.mxu2 }
0x1061   : > { %v2729_v12 = vpop.f32.mrf.mxu1 }
0x1062   : > { %3651 = vmatmul.msk.f32.vlgmr.msra.gmra.mxu3 %vm838_vm0, %v2729_v12 }
0x106b   : > { %v2841_v18 = vpop.f32.mrf.mxu0 }
0x106c   : > { %v2853_v16 = vsel %vm888_vm3, %v2841_v18, -inf }
0x106d   : > { %2854 = vmax.xlane.f32.xlu0 %v2853_v16 }
0x1070   : > { %v2672_v55 = vpop.xlane.xlu1 %2671 }
0x1071   : > { %3951 = vrcp.f32 %v2672_v55 }
0x1073   : > { %v2844_v17 = vpop.f32.mrf.mxu0 }
0x1074   : > { %v2856_v2 = vsel %vm898_vm4, %v2844_v17, -inf }
0x1075   : > { %2857 = vmax.xlane.f32.xlu2 %v2856_v2 }
0x1077   : > { %v3952_v13 = vpop.eup %3951 }
0x1078   : > { %v2684_v32 = vmul.f32 %v3952_v13, %v3946_v62 }
0x107a   : > { %3648 = vmatmul.msk.f32.gmra.mxu1 %vm888_vm3, %v2684_v32  ;;  %v3675_v32 = vld [vmem:[%s5322_s11 + $0x38] sm:$0xff] }
0x107b   : > { %3131 = vmatpush.msrb.mxu3 %v3675_v32 }
0x107c   : > { %v2529_v56 = vpop.f32.mrf.mxu3 }
0x107d   : > { %v2571_v51 = vadd.f32 %v4979_v35, %v2529_v56  ;;  %3132 = vmatpush.msrb.mxu3 %v3674_v49  ;;  %v3688_v49 = vld [vmem:[%s5324_s13 + $0x60] sm:$0xff] }
0x1084   : > { %v5078_v24 = vpop.f32.mrf.mxu3 }
0x108f   : > { %v2678_v7 = vpop.xlane.xlu2 %2677 }
0x1090   : > { %v5080_v50 = vpop.f32.mrf.mxu3 }
0x1098   : > { %v2675_v20 = vpop.xlane.xlu0 %2674 }
0x1099   : > { %3953 = vrcp.f32 %v2675_v20  ;;  %v3673_v20 = vld [vmem:[%s5322_s11 + $0x28] sm:$0xff] }
0x109a   : > { %3955 = vrcp.f32 %v2678_v7  ;;  %3133 = vmatpush.msrb.mxu3 %v3673_v20  ;;  %v3672_v7 = vld [vmem:[%s5322_s11 + $0x20] sm:$0xff] }
0x109c   : > { %3134 = vmatpush.msrb.mxu3 %v3672_v7 }
0x109f   : > { %v3954_v27 = vpop.eup %3953 }
0x10a0   : > { %v2685_v30 = vmul.f32 %v3954_v27, %v3950_v1  ;;  %v3956_v61 = vpop.eup %3955 }
0x10a1   : > { %v2686_v21 = vmul.f32 %v3956_v61, %v3948_v5 }
0x10a2   : > { %3649 = vmatmul.msk.f32.gmra.mxu1 %vm888_vm3, %v2685_v30 }
0x10a8   : > { %v5083_v29 = vpop.f32.mrf.mxu3 }
0x10aa   : > { %3650 = vmatmul.msk.f32.gmra.mxu1 %vm888_vm3, %v2686_v21 }
0x10b2   : > { %3668 = vmatmul.msk.f32.vlgmr.msrb.gmra.mxu1 %vm838_vm0, %v2933_v33 }
0x10b8   : > { %v2852_v52 = vpop.xlane.xlu1 %2851 }
0x10b9   : > { %v2860_v34 = vsub.f32 %v2838_v54, %v2852_v52 }
0x10bb   : > { %v2865_v36 = vmul.f32 1.442695, %v2860_v34 }
0x10bd   : > { %3957 = vpow2.f32 %v2865_v36 }
0x10c3   : > { %v3958_v14 = vpop.eup %3957 }
0x10c4   : > { %v2874_v11 = vsel %vm888_vm3, %v3958_v14, 0.0 }
0x10c5   : > { %2875 = vadd.xlane.f32.xlu1 %v2874_v11  ;;  %v5123_v11 = vld [vmem:[%s5320_s9 + $0x1] ss:$0 sm:$0xff] }
0x10e0   : > { %v2855_v38 = vpop.xlane.xlu0 %2854 }
0x10e1   : > { %v2861_v46 = vsub.f32 %v2841_v18, %v2855_v38 }
0x10e3   : > { %v2867_v23 = vmul.f32 1.442695, %v2861_v46  ;;  %v5128_v46 = vld [vmem:[%s5321_s10 + $0x1] ss:$0 sm:$0xff] }
0x10e5   : > { %3959 = vpow2.f32 %v2867_v23  ;;  %v2770_v53 = vpop.f32.mrf.mxu3 }
0x10e6   : > { %v2782_v0 = vadd.f32 %v2770_v53, %v2571_v51  ;;  %v2577_v53 = vadd.f32 %v4984_v44, %v5080_v50 }
0x10e8   : > { %v2858_v26 = vpop.xlane.xlu2 %2857 }
0x10e9   : > { %v2862_v42 = vsub.f32 %v2844_v17, %v2858_v26 }
0x10eb   : > { %v3960_v28 = vpop.eup %3959  ;;  %v2869_v47 = vmul.f32 1.442695, %v2862_v42 }
0x10ec   : > { %v2877_v10 = vsel %vm888_vm3, %v3960_v28, 0.0 }
0x10ed   : > { %3961 = vpow2.f32 %v2869_v47  ;;  %2878 = vadd.xlane.f32.xlu0 %v2877_v10 }
0x10f3   : > { %v3962_v40 = vpop.eup %3961 }
0x10f4   : > { %v2880_v22 = vsel %vm898_vm4, %v3962_v40, 0.0 }
0x10f5   : > { %2881 = vadd.xlane.f32.xlu2 %v2880_v22 }
0x10f7   : > { %v2732_v45 = vpop.f32.mrf.mxu1 }
0x10f8   : > { %3652 = vmatmul.msk.f32.gmra.mxu3 %vm838_vm0, %v2732_v45 }
0x111f   : > { %v2735_v60 = vpop.f32.mrf.mxu1 }
0x1120   : > { %3653 = vmatmul.msk.f32.gmra.mxu3 %vm838_vm0, %v2735_v60 }
0x1127   : > { %v2738_v62 = vpop.f32.mrf.mxu1 }
0x1128   : > { %3654 = vmatmul.msk.f32.gmra.mxu3 %vm838_vm0, %v2738_v62 }
0x112f   : > { %v2974_v19 = vpop.f32.mrf.mxu1 }
0x1130   : > { %v2986_v3 = vadd.f32 %v2974_v19, %v2782_v0 }
0x1132   : > { %v2990_v63 = vadd.f32 %v2986_v3, %v4775_v58  ;;  %v2580_v3 = vadd.f32 %v4986_v31, %v5083_v29 }
0x1134   : > { %v5094_v4 = vadd.f32 %v5090_v48, %v2990_v63 }
0x1136   : > { %v3002_v5 = vsel %vm666_vm1, %v5094_v4, 0.0 }
0x1137   : > { %3003 = vadd.xlane.f32.xlu1 %v3002_v5 }
0x1138   : > { %v2876_v57 = vpop.xlane.xlu1 %2875 }
0x1139   : > { %3963 = vrcp.f32 %v2876_v57 }
0x113f   : > { %v3964_v35 = vpop.eup %3963 }
0x1140   : > { %v2888_v6 = vmul.f32 %v3964_v35, %v3958_v14 }
0x1142   : > { %3665 = vmatmul.msk.f32.gmra.mxu2 %vm888_vm3, %v2888_v6 }
0x1160   : > { %v2879_v1 = vpop.xlane.xlu0 %2878 }
0x1161   : > { %3965 = vrcp.f32 %v2879_v1  ;;  %v5157_v1 = vld [vmem:[%s5323_s12 + $0x1] ss:$0 sm:$0xff] }
0x1167   : > { %v3966_v8 = vpop.eup %3965 }
0x1168   : > { %v2882_v59 = vpop.xlane.xlu2 %2881  ;;  %v2889_v41 = vmul.f32 %v3966_v8, %v3960_v28  ;;  %v2574_v28 = vadd.f32 %v4981_v15, %v5078_v24 }
0x1169   : > { %3967 = vrcp.f32 %v2882_v59 }
0x116a   : > { %3666 = vmatmul.msk.f32.gmra.mxu2 %vm888_vm3, %v2889_v41 }
0x116f   : > { %v3968_v58 = vpop.eup %3967 }
0x1170   : > { %v2890_v54 = vmul.f32 %v3968_v58, %v3962_v40 }
0x1172   : > { %3667 = vmatmul.msk.f32.gmra.mxu2 %vm888_vm3, %v2890_v54 }
0x117b   : > { %v2773_v42 = vpop.f32.mrf.mxu3 }
0x117c   : > { %v2783_v10 = vadd.f32 %v2773_v42, %v2574_v28 }
0x11a3   : > { %v2776_v62 = vpop.f32.mrf.mxu3 }
0x11a4   : > { %v2784_v51 = vadd.f32 %v2776_v62, %v2577_v53 }
0x11aa   : > { %v3004_v9 = vpop.xlane.xlu1 %3003 }
0x11ab   : > { %v3014_v12 = vmul.f32 %v3004_v9, %v4265_v37  ;;  %v2779_v19 = vpop.f32.mrf.mxu3  ;;  %v3691_v9 = vld [vmem:[%s5324_s13 + $0x78] sm:$0xff] }
0x11ac   : > { %v2785_v63 = vadd.f32 %v2779_v19, %v2580_v3  ;;  %3355 = vmatpush.msrb.mxu0 %v3691_v9 }
0x11ad   : > { %v3018_v18 = vsub.f32 %v5094_v4, %v3014_v12 }
0x11af   : > { %v3022_v16 = vmul.f32 %v3018_v18, %v3018_v18 }
0x11b1   : > { %v3026_v55 = vsel %vm666_vm1, %v3022_v16, 0.0  ;;  %v3690_v16 = vld [vmem:[%s5324_s13 + $0x70] sm:$0xff] }
0x11b2   : > { %3027 = vadd.xlane.f32.xlu0 %v3026_v55  ;;  %3356 = vmatpush.msrb.mxu0 %v3690_v16 }
0x11c5   : > { %v2936_v17 = vpop.f32.mrf.mxu2 }
0x11c6   : > { %3669 = vmatmul.msk.f32.gmra.mxu1 %vm838_vm0, %v2936_v17 }
0x11ed   : > { %v2939_v2 = vpop.f32.mrf.mxu2 }
0x11ee   : > { %3670 = vmatmul.msk.f32.gmra.mxu1 %vm838_vm0, %v2939_v2  ;;  %v3689_v2 = vld [vmem:[%s5324_s13 + $0x68] sm:$0xff] }
0x11ef   : > { %3357 = vmatpush.msrb.mxu0 %v3689_v2 }
0x11f1   : > { %3358 = vmatpush.msrb.mxu0 %v3688_v49 }
0x11f5   : > { %v2942_v13 = vpop.f32.mrf.mxu2 }
0x11f6   : > { %3671 = vmatmul.msk.f32.gmra.mxu1 %vm838_vm0, %v2942_v13 }
0x1225   : > { %v3028_v27 = vpop.xlane.xlu0 %3027 }
0x1226   : > { %v3038_v30 = vmul.f32 %v3028_v27, %v4265_v37  ;;  %v3687_v27 = vld [vmem:[%s5324_s13 + $0x58] sm:$0xff] }
0x1227   : > { %3359 = vmatpush.msrb.mxu0 %v3687_v27 }
0x1228   : > { %v3042_v61 = vadd.f32 1e-05, %v3038_v30 }
0x122a   : > { %3969 = vrsqrt.f32 %v3042_v61  ;;  %vm3052_vm3 = vweird.f32 %v3042_v61 }
0x1230   : > { %v3970_v21 = vpop.eup %3969 }
0x1231   : > { %v3047_v33 = vmul.f32 %v3970_v21, %v3042_v61  ;;  %vm3053_vm0 = vweird.f32 %v3970_v21  ;;  %v3686_v61 = vld [vmem:[%s5324_s13 + $0x50] sm:$0xff] }
0x1232   : > { %vm3054_vm4 = vmor %vm3052_vm3, %vm3053_vm0  ;;  %3360 = vmatpush.msrb.mxu0 %v3686_v61 }
0x1233   : > { %v3048_v52 = vmul.f32 %v3970_v21, %v3047_v33 }
0x1235   : > { %v3049_v34 = vmul.f32 0.5, %v3048_v52  ;;  %v3685_v52 = vld [vmem:[%s5324_s13 + $0x48] sm:$0xff] }
0x1236   : > { %3361 = vmatpush.msrb.mxu0 %v3685_v52 }
0x1237   : > { %v3050_v36 = vsub.f32 1.5, %v3049_v34  ;;  %v3684_v34 = vld [vmem:[%s5324_s13 + $0x40] sm:$0xff] }
0x1238   : > { %3362 = vmatpush.msrb.mxu0 %v3684_v34 }
0x1239   : > { %v3051_v14 = vmul.f32 %v3970_v21, %v3050_v36 }
0x123b   : > { %v3055_v38 = vsel %vm3054_vm4, %v3970_v21, %v3051_v14 }
0x123c   : > { %v3086_v23 = vmul.f32 %v3055_v38, %v3018_v18 }
0x123e   : > { %v3091_v26 = vmul.f32 %v5123_v11, %v3086_v23 }
0x1240   : > { %v3096_v47 = vadd.f32 %v5128_v46, %v3091_v26 }
0x1242   : > { %3676 = vmatmul.msk.f32.vlgmr.msrb.gmra.mxu3 %vm666_vm1, %v3096_v47 }
0x1243   : > { %v2977_v40 = vpop.f32.mrf.mxu1 }
0x1244   : > { %v2987_v22 = vadd.f32 %v2977_v40, %v2783_v10 }
0x1246   : > { %v2991_v45 = vadd.f32 %v2987_v22, %v4780_v39 }
0x1248   : > { %v2997_v56 = vadd.f32 %v5090_v48, %v2991_v45 }
0x124a   : > { %v3005_v60 = vsel %vm666_vm1, %v2997_v56, 0.0 }
0x124b   : > { %3006 = vadd.xlane.f32.xlu2 %v3005_v60 }
0x126b   : > { %v2980_v15 = vpop.f32.mrf.mxu1 }
0x126c   : > { %v2988_v24 = vadd.f32 %v2980_v15, %v2784_v51 }
0x126e   : > { %v2992_v0 = vadd.f32 %v2988_v24, %v4785_v43 }
0x1270   : > { %v2998_v39 = vadd.f32 %v5090_v48, %v2992_v0 }
0x1272   : > { %v3008_v5 = vsel %vm666_vm1, %v2998_v39, 0.0 }
0x1273   : > { %3009 = vadd.xlane.f32.xlu1 %v3008_v5  ;;  %v2983_v57 = vpop.f32.mrf.mxu1 }
0x1274   : > { %v2989_v35 = vadd.f32 %v2983_v57, %v2785_v63 }
0x1276   : > { %v2993_v6 = vadd.f32 %v2989_v35, %v4790_v25 }
0x1278   : > { %v5147_v44 = vadd.f32 %v5090_v48, %v2993_v6 }
0x127a   : > { %v3011_v43 = vsel %vm676_vm2, %v5147_v44, 0.0 }
0x127b   : > { %3012 = vadd.xlane.f32.xlu0 %v3011_v43 }
0x12be   : > { %v3007_v50 = vpop.xlane.xlu2 %3006 }
0x12bf   : > { %v3015_v31 = vmul.f32 %v3007_v50, %v4265_v37 }
0x12c1   : > { %v5152_v29 = vsub.f32 %v2997_v56, %v3015_v31 }
0x12c3   : > { %v3023_v25 = vmul.f32 %v5152_v29, %v5152_v29 }
0x12c5   : > { %v3136_v8 = vpop.f32.mrf.mxu3  ;;  %v3029_v48 = vsel %vm666_vm1, %v3023_v25, 0.0 }
0x12c6   : > { %v5163_v59 = vadd.f32 %v5157_v1, %v3136_v8  ;;  %3030 = vadd.xlane.f32.xlu2 %v3029_v48 }
0x12c8   : > { %v3152_v41 = vmul.f32 0.70710677, %v5163_v59  ;;  %v3148_v8 = vmul.f32 0.5, %v5163_v59 }
0x12ca   : > { %v3156_v58 = vmul.f32 %v3152_v41, %v3152_v41 }
0x12cc   : > { %v3157_v54 = vmin.f32 %v3156_v58, 16.0 }
0x12ce   : > { %v3158_v12 = vmul.f32 2.1237322e-06, %v3157_v54  ;;  %v3169_v18 = vmul.f32 3.8918573e-05, %v3157_v54 }
0x12d0   : > { %v3159_v55 = vadd.f32 0.00028619796, %v3158_v12  ;;  %v3170_v17 = vadd.f32 0.001143296, %v3169_v18 }
0x12d2   : > { %v3160_v13 = vmul.f32 %v3159_v55, %v3157_v54  ;;  %v3171_v32 = vmul.f32 %v3170_v17, %v3157_v54 }
0x12d4   : > { %v3161_v20 = vadd.f32 0.0036580483, %v3160_v13  ;;  %v3172_v7 = vadd.f32 0.014752088, %v3171_v32 }
0x12d6   : > { %v3173_v30 = vmul.f32 %v3172_v7, %v3157_v54  ;;  %v3162_v21 = vmul.f32 %v3161_v20, %v3157_v54 }
0x12d8   : > { %v3174_v33 = vadd.f32 0.112945676, %v3173_v30  ;;  %v3163_v14 = vadd.f32 0.05243302, %v3162_v21 }
0x12da   : > { %v3175_v36 = vmul.f32 %v3174_v33, %v3157_v54  ;;  %v3164_v26 = vmul.f32 %v3163_v14, %v3157_v54 }
0x12dc   : > { %v3176_v38 = vadd.f32 0.4994258, %v3175_v36  ;;  %v3165_v28 = vadd.f32 0.18741608, %v3164_v26 }
0x12de   : > { %v3177_v23 = vmul.f32 %v3176_v38, %v3157_v54  ;;  %v3166_v22 = vmul.f32 %v3165_v28, %v3157_v54 }
0x12e0   : > { %v3178_v42 = vadd.f32 1.0, %v3177_v23  ;;  %v3167_v53 = vadd.f32 1.1283791, %v3166_v22  ;;  %v3806_v23 = vld [vmem:[%s5325_s14 + $0x1] ss:$0 sm:$0xff] }
0x12e2   : > { %3971 = vrcp.f32 %v3178_v42  ;;  %v3190_v51 = vand.u32 2147483648, %v3178_v42  ;;  %v3188_v24 = vand.u32 2147483647, %v3178_v42  ;;  %vm3184_vm9 = vweird.f32 %v3178_v42 }
0x12e3   : > { %v3168_v5 = vmul.f32 %v3167_v53, %v3152_v41 }
0x12e4   : > { %vm3189_vm11 = vcmp.eq.f32.partialorder %v3188_v24, 8.507059e+37 }
0x12e6   : > { %v3010_v47 = vpop.xlane.xlu1 %3009 }
0x12e7   : > { %v3016_v10 = vmul.f32 %v3010_v47, %v4265_v37 }
0x12e8   : > { %v3972_v40 = vpop.eup %3971 }
0x12e9   : > { %v3180_v45 = vmul.f32 %v3972_v40, %v3178_v42  ;;  %v5191_v56 = vsub.f32 %v2998_v39, %v3016_v10  ;;  %vm3185_vm5 = vweird.f32 %v3972_v40  ;;  %v3191_v39 = vor.u32 1.1754944e-38, %v3190_v51 }
0x12ea   : > { %vm3186_vm10 = vmor %vm3184_vm9, %vm3185_vm5 }
0x12eb   : > { %v3181_v60 = vsub.f32 1.0, %v3180_v45  ;;  %v3024_v62 = vmul.f32 %v5191_v56, %v5191_v56 }
0x12ed   : > { %v3182_v15 = vmul.f32 %v3972_v40, %v3181_v60  ;;  %v3032_v0 = vsel %vm666_vm1, %v3024_v62, 0.0 }
0x12ee   : > { %3033 = vadd.xlane.f32.xlu1 %v3032_v0  ;;  %v3013_v19 = vpop.xlane.xlu0 %3012 }
0x12ef   : > { %v3183_v3 = vadd.f32 %v3972_v40, %v3182_v15  ;;  %v3017_v63 = vmul.f32 %v3013_v19, %v4265_v37 }
0x12f1   : > { %v3187_v57 = vsel %vm3186_vm10, %v3972_v40, %v3183_v3  ;;  %v5198_v35 = vsub.f32 %v5147_v44, %v3017_v63 }
0x12f2   : > { %v3192_v6 = vsel %vm3189_vm11, %v3191_v39, %v3187_v57 }
0x12f3   : > { %v3193_v43 = vmul.f32 %v3192_v6, %v3168_v5  ;;  %v3025_v50 = vmul.f32 %v5198_v35, %v5198_v35 }
0x12f5   : > { %v3680_v31 = vclamps-f32 %v3193_v43, 1.0  ;;  %v3035_v25 = vsel %vm676_vm2, %v3025_v50, 0.0 }
0x12f6   : > { %3036 = vadd.xlane.f32.xlu0 %v3035_v25 }
0x12f7   : > { %v3316_v48 = vadd.f32 1.0, %v3680_v31 }
0x12f9   : > { %v3320_v58 = vmul.f32 %v3316_v48, %v3148_v8 }
0x12fb   : > { %3692 = vmatmul.msk.f32.vlgmr.msrb.gmra.mxu0 %vm1981_vm14, %v3320_v58 }
0x1339   : > { %v3031_v41 = vpop.xlane.xlu2 %3030 }
0x133a   : > { %v3039_v54 = vmul.f32 %v3031_v41, %v4265_v37 }
0x133c   : > { %v3043_v44 = vadd.f32 1e-05, %v3039_v54 }
0x133e   : > { %3973 = vrsqrt.f32 %v3043_v44  ;;  %vm3062_vm13 = vweird.f32 %v3043_v44 }
0x1344   : > { %v3974_v9 = vpop.eup %3973 }
0x1345   : > { %v3057_v12 = vmul.f32 %v3974_v9, %v3043_v44  ;;  %vm3063_vm12 = vweird.f32 %v3974_v9 }
0x1346   : > { %vm3064_vm15 = vmor %vm3062_vm13, %vm3063_vm12 }
0x1347   : > { %v3058_v18 = vmul.f32 %v3974_v9, %v3057_v12 }
0x1349   : > { %v3059_v16 = vmul.f32 0.5, %v3058_v18 }
0x134b   : > { %v3060_v55 = vsub.f32 1.5, %v3059_v16 }
0x134d   : > { %v3061_v17 = vmul.f32 %v3974_v9, %v3060_v55 }
0x134f   : > { %v3065_v2 = vsel %vm3064_vm15, %v3974_v9, %v3061_v17 }
0x1350   : > { %v3087_v59 = vmul.f32 %v3065_v2, %v5152_v29 }
0x1352   : > { %v3092_v13 = vmul.f32 %v5123_v11, %v3087_v59 }
0x1354   : > { %v3097_v32 = vadd.f32 %v5128_v46, %v3092_v13 }
0x1356   : > { %3677 = vmatmul.msk.f32.gmra.mxu3 %vm666_vm1, %v3097_v32 }
0x1361   : > { %v3034_v49 = vpop.xlane.xlu1 %3033 }
0x1362   : > { %v3040_v20 = vmul.f32 %v3034_v49, %v4265_v37 }
0x1364   : > { %v3044_v7 = vadd.f32 1e-05, %v3040_v20 }
0x1366   : > { %3975 = vrsqrt.f32 %v3044_v7  ;;  %vm3072_vm7 = vweird.f32 %v3044_v7 }
0x1369   : > { %v3037_v27 = vpop.xlane.xlu0 %3036 }
0x136a   : > { %v3041_v30 = vmul.f32 %v3037_v27, %v4265_v37 }
0x136c   : > { %v3976_v61 = vpop.eup %3975  ;;  %v3045_v21 = vadd.f32 1e-05, %v3041_v30 }
0x136d   : > { %v3067_v33 = vmul.f32 %v3976_v61, %v3044_v7  ;;  %vm3073_vm6 = vweird.f32 %v3976_v61 }
0x136e   : > { %3977 = vrsqrt.f32 %v3045_v21  ;;  %vm3074_vm8 = vmor %vm3072_vm7, %vm3073_vm6  ;;  %vm3082_vm3 = vweird.f32 %v3045_v21 }
0x136f   : > { %v3068_v52 = vmul.f32 %v3976_v61, %v3067_v33 }
0x1371   : > { %v3069_v29 = vmul.f32 0.5, %v3068_v52 }
0x1373   : > { %v3070_v34 = vsub.f32 1.5, %v3069_v29 }
0x1374   : > { %v3978_v36 = vpop.eup %3977 }
0x1375   : > { %v3071_v14 = vmul.f32 %v3976_v61, %v3070_v34  ;;  %v3077_v38 = vmul.f32 %v3978_v36, %v3045_v21  ;;  %vm3083_vm0 = vweird.f32 %v3978_v36 }
0x1376   : > { %vm3084_vm4 = vmor %vm3082_vm3, %vm3083_vm0 }
0x1377   : > { %v3075_v26 = vsel %vm3074_vm8, %v3976_v61, %v3071_v14  ;;  %v3078_v42 = vmul.f32 %v3978_v36, %v3077_v38 }
0x1378   : > { %v3088_v28 = vmul.f32 %v3075_v26, %v5191_v56  ;;  %v3364_v47 = vpop.f32.mrf.mxu0 }
0x1379   : > { %v3079_v10 = vmul.f32 0.5, %v3078_v42  ;;  %v3365_v40 = vadd.f32 %v3806_v23, %v3364_v47 }
0x137a   : > { %v3093_v22 = vmul.f32 %v5123_v11, %v3088_v28 }
0x137b   : > { %v3080_v45 = vsub.f32 1.5, %v3079_v10  ;;  %v3373_v60 = vadd.f32 %v3365_v40, %v5094_v4 }
0x137c   : > { %v3098_v62 = vadd.f32 %v5128_v46, %v3093_v22 }
0x137d   : > { %v3081_v53 = vmul.f32 %v3978_v36, %v3080_v45  ;;  %v3376_v51 = vsel %vm676_vm2, %v3373_v60, 0.0 }
0x137e   : > { %3377 = vadd.xlane.f32.xlu2 %v3376_v51  ;;  %3678 = vmatmul.msk.f32.gmra.mxu3 %vm666_vm1, %v3098_v62 }
0x137f   : > { %v3085_v56 = vsel %vm3084_vm4, %v3978_v36, %v3081_v53 }
0x1380   : > { %v3089_v15 = vmul.f32 %v3085_v56, %v5198_v35 }
0x1382   : > { %v3094_v24 = vmul.f32 %v5123_v11, %v3089_v15 }
0x1384   : > { %v3099_v0 = vadd.f32 %v5128_v46, %v3094_v24 }
0x1386   : > { %3679 = vmatmul.msk.f32.gmra.mxu3 %vm666_vm1, %v3099_v0 }
0x13d9   : > { %v3139_v4 = vpop.f32.mrf.mxu3 }
0x13da   : > { %v3140_v19 = vadd.f32 %v5157_v1, %v3139_v4 }
0x13dc   : > { %v3153_v3 = vmul.f32 0.70710677, %v3140_v19  ;;  %v3149_v22 = vmul.f32 0.5, %v3140_v19 }
0x13de   : > { %v3196_v63 = vmul.f32 %v3153_v3, %v3153_v3 }
0x13e0   : > { %v3197_v39 = vmin.f32 %v3196_v63, 16.0 }
0x13e2   : > { %v3198_v5 = vmul.f32 2.1237322e-06, %v3197_v39  ;;  %v3209_v57 = vmul.f32 3.8918573e-05, %v3197_v39 }
0x13e4   : > { %v3199_v6 = vadd.f32 0.00028619796, %v3198_v5  ;;  %v3210_v43 = vadd.f32 0.001143296, %v3209_v57 }
0x13e6   : > { %v3200_v50 = vmul.f32 %v3199_v6, %v3197_v39  ;;  %v3211_v31 = vmul.f32 %v3210_v43, %v3197_v39 }
0x13e8   : > { %v3212_v25 = vadd.f32 0.014752088, %v3211_v31  ;;  %v3201_v35 = vadd.f32 0.0036580483, %v3200_v50 }
0x13ea   : > { %v3213_v8 = vmul.f32 %v3212_v25, %v3197_v39  ;;  %v3202_v48 = vmul.f32 %v3201_v35, %v3197_v39 }
0x13ec   : > { %v3214_v11 = vadd.f32 0.112945676, %v3213_v8  ;;  %v3203_v41 = vadd.f32 0.05243302, %v3202_v48 }
0x13ee   : > { %v3215_v46 = vmul.f32 %v3214_v11, %v3197_v39  ;;  %v3204_v16 = vmul.f32 %v3203_v41, %v3197_v39 }
0x13f0   : > { %v3216_v58 = vadd.f32 0.4994258, %v3215_v46  ;;  %v3205_v17 = vadd.f32 0.18741608, %v3204_v16 }
0x13f1   : > { %v3378_v54 = vpop.xlane.xlu2 %3377 }
0x13f2   : > { %v3217_v44 = vmul.f32 %v3216_v58, %v3197_v39  ;;  %v3379_v9 = vmul.f32 %v3378_v54, %v4265_v37  ;;  %v3206_v13 = vmul.f32 %v3205_v17, %v3197_v39 }
0x13f4   : > { %v3218_v12 = vadd.f32 1.0, %v3217_v44  ;;  %v5227_v18 = vsub.f32 %v3373_v60, %v3379_v9  ;;  %v3207_v7 = vadd.f32 1.1283791, %v3206_v13 }
0x13f6   : > { %3979 = vrcp.f32 %v3218_v12  ;;  %v3381_v55 = vmul.f32 %v5227_v18, %v5227_v18  ;;  %v3230_v20 = vand.u32 2147483648, %v3218_v12  ;;  %v3228_v30 = vand.u32 2147483647, %v3218_v12 }
0x13f7   : > { %vm3224_vm9 = vweird.f32 %v3218_v12  ;;  %v3208_v34 = vmul.f32 %v3207_v7, %v3153_v3 }
0x13f8   : > { %v3382_v2 = vsel %vm676_vm2, %v3381_v55, 0.0  ;;  %v3231_v52 = vor.u32 1.1754944e-38, %v3230_v20  ;;  %vm3229_vm2 = vcmp.eq.f32.partialorder %v3228_v30, 8.507059e+37 }
0x13f9   : > { %3383 = vadd.xlane.f32.xlu1 %v3382_v2 }
0x13fc   : > { %v3980_v59 = vpop.eup %3979 }
0x13fd   : > { %v3220_v32 = vmul.f32 %v3980_v59, %v3218_v12  ;;  %vm3225_vm5 = vweird.f32 %v3980_v59 }
0x13fe   : > { %vm3226_vm10 = vmor %vm3224_vm9, %vm3225_vm5  ;;  %vm3428_vm5 = vcmask 73728  }
0x13ff   : > { %v3221_v49 = vsub.f32 1.0, %v3220_v32 }
0x1401   : > { %v3222_v27 = vmul.f32 %v3980_v59, %v3221_v49  ;;  %v3142_v61 = vpop.f32.mrf.mxu3 }
0x1402   : > { %v5233_v21 = vadd.f32 %v5157_v1, %v3142_v61 }
0x1403   : > { %v3223_v33 = vadd.f32 %v3980_v59, %v3222_v27 }
0x1404   : > { %v5236_v29 = vmul.f32 0.70710677, %v5233_v21 }
0x1405   : > { %v3227_v36 = vsel %vm3226_vm10, %v3980_v59, %v3223_v33 }
0x1406   : > { %v3232_v14 = vsel %vm3229_vm2, %v3231_v52, %v3227_v36  ;;  %v3236_v38 = vmul.f32 %v5236_v29, %v5236_v29 }
0x1407   : > { %v3233_v23 = vmul.f32 %v3232_v14, %v3208_v34 }
0x1408   : > { %v3237_v26 = vmin.f32 %v3236_v38, 16.0 }
0x1409   : > { %v3681_v42 = vclamps-f32 %v3233_v23, 1.0  ;;  %v3145_v28 = vpop.f32.mrf.mxu3 }
0x140a   : > { %v3238_v47 = vmul.f32 2.1237322e-06, %v3237_v26  ;;  %v3249_v10 = vmul.f32 3.8918573e-05, %v3237_v26  ;;  %v5241_v40 = vadd.f32 %v5157_v1, %v3145_v28 }
0x140b   : > { %v3317_v45 = vadd.f32 1.0, %v3681_v42 }
0x140c   : > { %v3239_v60 = vadd.f32 0.00028619796, %v3238_v47  ;;  %v3250_v62 = vadd.f32 0.001143296, %v3249_v10  ;;  %v5244_v51 = vmul.f32 0.70710677, %v5241_v40 }
0x140d   : > { %v3321_v53 = vmul.f32 %v3317_v45, %v3149_v22 }
0x140e   : > { %v3240_v56 = vmul.f32 %v3239_v60, %v3237_v26  ;;  %v3251_v15 = vmul.f32 %v3250_v62, %v3237_v26  ;;  %v3276_v24 = vmul.f32 %v5244_v51, %v5244_v51 }
0x140f   : > { %3693 = vmatmul.msk.f32.gmra.mxu0 %vm1981_vm14, %v3321_v53  ;;  %v3150_v53 = vmul.f32 0.5, %v5233_v21  ;;  %v3403_v21 = vld [vmem:[%s5328_s17 + $0x18] sm:$0xff] }
0x1410   : > { %v3252_v0 = vadd.f32 0.014752088, %v3251_v15  ;;  %v3241_v4 = vadd.f32 0.0036580483, %v3240_v56  ;;  %v3277_v3 = vmin.f32 %v3276_v24, 16.0  ;;  %3420 = vmatpush.msra.mxu2 %v3403_v21 }
0x1412   : > { %v3253_v1 = vmul.f32 %v3252_v0, %v3237_v26  ;;  %v3278_v63 = vmul.f32 2.1237322e-06, %v3277_v3  ;;  %v3289_v19 = vmul.f32 3.8918573e-05, %v3277_v3  ;;  %v3242_v5 = vmul.f32 %v3241_v4, %v3237_v26 }
0x1414   : > { %v3254_v39 = vadd.f32 0.112945676, %v3253_v1  ;;  %v3279_v57 = vadd.f32 0.00028619796, %v3278_v63  ;;  %v3290_v6 = vadd.f32 0.001143296, %v3289_v19 }
0x1415   : > { %v3243_v35 = vadd.f32 0.05243302, %v3242_v5  ;;  %v3151_v19 = vmul.f32 0.5, %v5241_v40  ;;  %v3400_v40 = vld [vmem:[%s5328_s17] sm:$0xff] }
0x1416   : > { %v3255_v43 = vmul.f32 %v3254_v39, %v3237_v26  ;;  %v3280_v50 = vmul.f32 %v3279_v57, %v3277_v3  ;;  %v3291_v31 = vmul.f32 %v3290_v6, %v3277_v3  ;;  %v3401_v57 = vld [vmem:[%s5328_s17 + $0x8] sm:$0xff] }
0x1417   : > { %v3244_v41 = vmul.f32 %v3243_v35, %v3237_v26 }
0x1418   : > { %v3256_v25 = vadd.f32 0.4994258, %v3255_v43  ;;  %v3292_v8 = vadd.f32 0.014752088, %v3291_v31  ;;  %v3281_v48 = vadd.f32 0.0036580483, %v3280_v50 }
0x1419   : > { %v3245_v12 = vadd.f32 0.18741608, %v3244_v41  ;;  %v3375_v41 = vld [vmem:[%s5327_s16] sm:$0x1] }
0x141a   : > { %v3257_v11 = vmul.f32 %v3256_v25, %v3237_v26  ;;  %v3293_v46 = vmul.f32 %v3292_v8, %v3277_v3  ;;  %v3282_v44 = vmul.f32 %v3281_v48, %v3277_v3 }
0x141b   : > { %v3246_v59 = vmul.f32 %v3245_v12, %v3237_v26 }
0x141c   : > { %v3258_v58 = vadd.f32 1.0, %v3257_v11  ;;  %v3294_v54 = vadd.f32 0.112945676, %v3293_v46  ;;  %v3283_v55 = vadd.f32 0.05243302, %v3282_v44 }
0x141d   : > { %v3247_v27 = vadd.f32 1.1283791, %v3246_v59  ;;  %v3374_v46 = vld [vmem:[%s5326_s15] sm:$0x1] }
0x141e   : > { %3981 = vrcp.f32 %v3258_v58  ;;  %v3295_v9 = vmul.f32 %v3294_v54, %v3277_v3  ;;  %v3284_v49 = vmul.f32 %v3283_v55, %v3277_v3  ;;  %v3270_v7 = vand.u32 2147483648, %v3258_v58 }
0x141f   : > { %v3268_v61 = vand.u32 2147483647, %v3258_v58  ;;  %vm3264_vm12 = vweird.f32 %v3258_v58  ;;  %v3248_v14 = vmul.f32 %v3247_v27, %v5236_v29 }
0x1420   : > { %v3296_v16 = vadd.f32 0.4994258, %v3295_v9  ;;  %v3285_v33 = vadd.f32 0.18741608, %v3284_v49  ;;  %v3271_v34 = vor.u32 1.1754944e-38, %v3270_v7 }
0x1421   : > { %vm3269_vm15 = vcmp.eq.f32.partialorder %v3268_v61, 8.507059e+37 }
0x1422   : > { %v3297_v17 = vmul.f32 %v3296_v16, %v3277_v3  ;;  %v3286_v26 = vmul.f32 %v3285_v33, %v3277_v3 }
0x1424   : > { %v3982_v2 = vpop.eup %3981  ;;  %v3298_v32 = vadd.f32 1.0, %v3297_v17  ;;  %v3287_v45 = vadd.f32 1.1283791, %v3286_v26 }
0x1425   : > { %v3260_v13 = vmul.f32 %v3982_v2, %v3258_v58  ;;  %vm3265_vm11 = vweird.f32 %v3982_v2 }
0x1426   : > { %3983 = vrcp.f32 %v3298_v32  ;;  %vm3266_vm13 = vmor %vm3264_vm12, %vm3265_vm11  ;;  %v3310_v22 = vand.u32 2147483648, %v3298_v32  ;;  %v3308_v62 = vand.u32 2147483647, %v3298_v32  ;;  %vm3304_vm7 = vweird.f32 %v3298_v32 }
0x1427   : > { %v3261_v20 = vsub.f32 1.0, %v3260_v13  ;;  %v3288_v0 = vmul.f32 %v3287_v45, %v5244_v51  ;;  %v3402_v51 = vld [vmem:[%s5328_s17 + $0x10] sm:$0xff] }
0x1428   : > { %v3311_v29 = vor.u32 1.1754944e-38, %v3310_v22  ;;  %vm3309_vm0 = vcmp.eq.f32.partialorder %v3308_v62, 8.507059e+37  ;;  %3421 = vmatpush.msra.mxu2 %v3402_v51 }
0x1429   : > { %v3262_v30 = vmul.f32 %v3982_v2, %v3261_v20 }
0x142a   : > { %3422 = vmatpush.msra.mxu2 %v3401_v57 }
0x142b   : > { %v3263_v52 = vadd.f32 %v3982_v2, %v3262_v30 }
0x142c   : > { %v3984_v36 = vpop.eup %3983  ;;  %3423 = vmatpush.msra.mxu2 %v3400_v40 }
0x142d   : > { %v3267_v38 = vsel %vm3266_vm13, %v3982_v2, %v3263_v52  ;;  %v3300_v42 = vmul.f32 %v3984_v36, %v3298_v32  ;;  %vm3305_vm6 = vweird.f32 %v3984_v36 }
0x142e   : > { %v3272_v23 = vsel %vm3269_vm15, %v3271_v34, %v3267_v38  ;;  %vm3306_vm8 = vmor %vm3304_vm7, %vm3305_vm6 }
0x142f   : > { %v3273_v28 = vmul.f32 %v3272_v23, %v3248_v14  ;;  %v3301_v47 = vsub.f32 1.0, %v3300_v42 }
0x1431   : > { %v3682_v10 = vclamps-f32 %v3273_v28, 1.0  ;;  %v3302_v60 = vmul.f32 %v3984_v36, %v3301_v47 }
0x1433   : > { %v3318_v56 = vadd.f32 1.0, %v3682_v10  ;;  %v3303_v15 = vadd.f32 %v3984_v36, %v3302_v60 }
0x1435   : > { %v3322_v24 = vmul.f32 %v3318_v56, %v3150_v53  ;;  %v3307_v4 = vsel %vm3306_vm8, %v3984_v36, %v3303_v15 }
0x1436   : > { %v3312_v3 = vsel %vm3309_vm0, %v3311_v29, %v3307_v4 }
0x1437   : > { %3694 = vmatmul.msk.f32.gmra.mxu0 %vm1981_vm14, %v3322_v24  ;;  %v3313_v1 = vmul.f32 %v3312_v3, %v3288_v0 }
0x1439   : > { %v3683_v63 = vclamps-f32 %v3313_v1, 1.0 }
0x143b   : > { %v3319_v39 = vadd.f32 1.0, %v3683_v63 }
0x143d   : > { %v3323_v5 = vmul.f32 %v3319_v39, %v3151_v19 }
0x143f   : > { %3695 = vmatmul.msk.f32.gmra.mxu0 %vm1981_vm14, %v3323_v5 }
0x146c   : > { %v3384_v6 = vpop.xlane.xlu1 %3383 }
0x146d   : > { %v3385_v43 = vmul.f32 %v3384_v6, %v4265_v37 }
0x146f   : > { %v3386_v50 = vadd.f32 1e-05, %v3385_v43 }
0x1471   : > { %3985 = vrsqrt.f32 %v3386_v50  ;;  %vm3393_vm3 = vweird.f32 %v3386_v50 }
0x1477   : > { %v3986_v31 = vpop.eup %3985 }
0x1478   : > { %v3388_v25 = vmul.f32 %v3986_v31, %v3386_v50  ;;  %vm3394_vm14 = vweird.f32 %v3986_v31 }
0x1479   : > { %vm3395_vm4 = vmor %vm3393_vm3, %vm3394_vm14 }
0x147a   : > { %v3389_v35 = vmul.f32 %v3986_v31, %v3388_v25 }
0x147c   : > { %v3390_v8 = vmul.f32 0.5, %v3389_v35 }
0x147e   : > { %v3391_v11 = vsub.f32 1.5, %v3390_v8 }
0x1480   : > { %v3392_v48 = vmul.f32 %v3986_v31, %v3391_v11 }
0x1482   : > { %v3396_v58 = vsel %vm3395_vm4, %v3986_v31, %v3392_v48 }
0x1483   : > { %v3397_v37 = vmul.f32 %v3396_v58, %v5227_v18  ;;  %v3404_v18 = vld [vmem:[%s5384_s28] sm:$0x1] }
0x1485   : > { %v3398_v54 = vmul.f32 %v3397_v37, %v3374_v46 }
0x1487   : > { %v3399_v44 = vadd.f32 %v3398_v54, %v3375_v41 }
0x1489   : > { %3696 = vmatmul.msk.f32.vlgmr.msra.gmra.mxu2 %vm666_vm1, %v3399_v44 }
0x148c   : > { %v3367_v9 = vpop.f32.mrf.mxu0 }
0x14b4   : > { %v3369_v12 = vpop.f32.mrf.mxu0 }
0x14bc   : > { %v3371_v16 = vpop.f32.mrf.mxu0 }
0x150c   : > { %v3425_v55 = vpop.f32.mrf.mxu2 }
0x150d   : > { %v3426_v17 = vadd.f32 %v3425_v55, %v3404_v18 }
0x150f   : > { %3429 = vst.msk [vmem:[%s594_s26] sm:$0x1] %vm3428_vm5, %v3426_v17 }
0x1510   : > { %4014 = shalt.err (!%p4011_p3)
}
0x1511   : > { %3701 = dma.vmem_to_hbm [thread:$0]  (%p4201_p5), %s3442_s3, 16, %s3444_s24, %s3431_s25  }
0x1512 PF: > { %s5386_s0 = sld [smem:[#allocation7_spill]] }
0x1513   : > { %s5387_s27 = sld [smem:[#allocation5_spill]] }
0x1518   : > { %p3707_p4 = scmp.ge.s32.totalorder %s5386_s0, 2 }
0x1519   : > { %s3455_s26 = sand.u32 1, %s5387_s27  }
0x151a   : > { %p3704_p7 = pnand %p3707_p4, %p4205_p6  ;;  %s3456_s1 = scalar_lea.sflag [#allocation3], %s3455_s26 }
0x151c   : > { %p3705_p8 = pneg %p3704_p7 }
0x151e   : > { %4032 = dma.done.wait (%p3705_p8), %s3456_s1, 16  }
0x151f   : > { %4034 = vsyncadd (%p3705_p8), %s3456_s1, 4294967280  ;;  %s5389_s21 = sld [smem:[#allocation8_spill]]  ;;  %s5392_s0 = smov %s4041_s30 }
0x1520   : > { %s5390_s4 = sld [smem:[#allocation6_spill]] }
0x1521   : > { %s5391_s20 = sld [smem:[#allocation9_spill]] }
0x1525   : > { %p29_p9 = scmp.ge.s32.totalorder %s5389_s21, 4  }
0x1526   : > { %s5393_s30 = smov %s5390_s4 }
0x1527   :  { %31 = sbr.rel (!%p29_p9) target bundleno = 11 (0xb), region = 135 }
0x152c   :  { %3461 = vsyncpa [#allocation3], 1 }
0x152d   :  { %3463 = vsyncpa [#allocation3 + $0x1], 1 }

</bundles_post_ra>
